<compile_context>
chip_gen: v7x
topology: tpu7x:2x2x1
jax: 0.10.0
libtpu: 0.0.40
codegen_flags: <defaults>
</compile_context>

<pallas_src>
import functools
import math

import jax
import jax.numpy as jnp
from jax.experimental import pallas as pl
from jax.experimental.pallas import tpu as pltpu


# (shift into the 1-pixel zero-padded input, kernel tap index) pairs per output
# parity phase, for ConvTranspose2d(kernel=4, stride=2, padding=1).
_PHASE_TAPS = {0: ((0, 3), (1, 1)), 1: ((1, 2), (2, 0))}


def _round_up(x, m):
    return ((x + m - 1) // m) * m


# ----------------------------------------------------------------------------
# Pallas kernels: per-phase matmul with fused epilogues.
# ----------------------------------------------------------------------------
def _matmul_act_kernel(a_ref, b_ref, o_ref, *, act):
    """o = act(a @ b).  a:(1,tm,Kp) bf16, b:(1,Kp,tn) bf16, o:(1,tm,tn)."""
    r = jnp.dot(a_ref[0], b_ref[0], preferred_element_type=jnp.float32)
    if act == "leaky_relu":
        r = jnp.where(r >= 0, r, 0.3 * r)          # LeakyReLU(negative_slope=0.3)
    elif act == "tanh":
        r = jnp.tanh(r)
    o_ref[0] = r.astype(o_ref.dtype)


def _matmul_leaky_proj_tanh_kernel(a_ref, b_ref, p_ref, o_ref):
    """o = tanh(leaky_relu(a @ b) @ p): conv block fused with the final 1x1 conv."""
    h = jnp.dot(a_ref[0], b_ref[0], preferred_element_type=jnp.float32)
    h = jnp.where(h >= 0, h, 0.3 * h)
    r = jnp.dot(h.astype(p_ref.dtype), p_ref[0], preferred_element_type=jnp.float32)
    o_ref[0] = jnp.tanh(r).astype(o_ref.dtype)


def phase_matmul(a, b, *, act="leaky_relu", proj=None, out_dtype=jnp.bfloat16):
    """Batched-over-phase (P, M, K) @ (P, Kp, Np) with a fused activation.

    `b` (and `proj`) must already be zero-padded to lane-aligned (Kp, Np) and
    are kept VMEM-resident across M tiles.  If `proj` is given the kernel
    computes tanh(leaky_relu(a @ b) @ proj) (fused final 1x1 conv), which
    requires the whole N dimension to fit in a single tile.
    """
    P, M, K = a.shape
    Pb, Kp, Np = b.shape
    assert Pb == P and K <= Kp and Kp % 128 == 0 and Np % 128 == 0

    tm = min(_round_up(M, 8), 512)
    Mp = _round_up(M, tm)
    tn = next(t for t in (2048, 1024, 512, 256, 128) if Np % t == 0)

    ap = jnp.pad(a.astype(jnp.bfloat16), ((0, 0), (0, Mp - M), (0, Kp - K)))

    # Grid order (P, N, M): the weight's block index is constant across the
    # inner M axis, so it is only DMA'd when the phase / N tile changes.
    grid = (P, Np // tn, Mp // tm)
    in_specs = [
        pl.BlockSpec((1, tm, Kp), lambda p, j, i: (p, i, 0)),
        pl.BlockSpec((1, Kp, tn), lambda p, j, i: (p, 0, j)),
    ]
    operands = [ap, b]

    if proj is None:
        kernel = functools.partial(_matmul_act_kernel, act=act)
        n_out, tn_out = Np, tn
    else:
        assert Np // tn == 1, "fused projection needs the full N in one tile"
        n_out = tn_out = proj.shape[-1]
        in_specs.append(pl.BlockSpec((1, Np, n_out), lambda p, j, i: (0, 0, 0)))
        operands.append(proj)
        kernel = _matmul_leaky_proj_tanh_kernel

    out = pl.pallas_call(
        kernel,
        out_shape=jax.ShapeDtypeStruct((P, Mp, n_out), out_dtype),
        grid_spec=pltpu.PrefetchScalarGridSpec(
            num_scalar_prefetch=0,
            grid=grid,
            in_specs=in_specs,
            out_specs=pl.BlockSpec((1, tm, tn_out), lambda p, j, i: (p, i, j)),
        ),
        compiler_params=pltpu.CompilerParams(
            dimension_semantics=("parallel", "parallel", "arbitrary")),
    )(*operands)
    return out[:, :M, :]


# ----------------------------------------------------------------------------
# Sub-pixel (output-phase) lowering of ConvTranspose2d(k=4, s=2, p=1).
# Each of the 4 output phases (oy%2, ox%2) only sees a 2x2 subset of the 4x4
# kernel, so the reduction is over C*4 taps (no structural zeros).
# ----------------------------------------------------------------------------
def _phase_patches(x):
    """NHWC x:(B,H,W,C) -> per-output-phase patches (4, B*H*W, 4*C), bf16."""
    B, H, W, C = x.shape
    xp = jnp.pad(x, ((0, 0), (1, 1), (1, 1), (0, 0)))
    phases = []
    for py in (0, 1):
        for px in (0, 1):
            taps = [xp[:, sy:sy + H, sx:sx + W, :]
                    for sy, _ in _PHASE_TAPS[py] for sx, _ in _PHASE_TAPS[px]]
            p = jnp.stack(taps, axis=3)                       # (B, H, W, 4, C)
            phases.append(p.reshape(B * H * W, 4 * C))
    return jnp.stack(phases, axis=0)


def _phase_weight_matrices(w):
    """ConvTranspose2d weight (C, Cout, 4, 4) -> per-phase matrices (4, 4*C, Cout)."""
    C, Cout = w.shape[0], w.shape[1]
    mats = []
    for py in (0, 1):
        for px in (0, 1):
            taps = [w[:, :, ky, kx]
                    for _, ky in _PHASE_TAPS[py] for _, kx in _PHASE_TAPS[px]]
            mats.append(jnp.stack(taps, axis=0).reshape(4 * C, Cout))
    return jnp.stack(mats, axis=0)


def _pixel_shuffle(y_phase, B, H, W):
    """(4, B*H*W, N) phase-major -> NHWC (B, 2H, 2W, N)."""
    N = y_phase.shape[-1]
    y = y_phase.reshape(2, 2, B, H, W, N).transpose(2, 3, 0, 4, 1, 5)
    return y.reshape(B, 2 * H, 2 * W, N)


# ----------------------------------------------------------------------------
# Parameter init (deterministic Xavier-uniform, bias-free as in the module)
# and one-time conversion into padded bf16 matmul-ready weights.
# ----------------------------------------------------------------------------
def xavier_uniform(key, shape):
    # PyTorch ConvTranspose2d weight is (Cin, Cout, kH, kW):
    # fan_in = Cout*kH*kW, fan_out = Cin*kH*kW (torch convention).
    cin, cout, kh, kw = shape
    fan_in, fan_out = cout * kh * kw, cin * kh * kw
    bound = math.sqrt(6.0 / (fan_in + fan_out))
    return jax.random.uniform(key, shape, jnp.float32, -bound, bound)


def init_generator_params(key, in_channels, out_channels):
    k1, k2, k3, k4 = jax.random.split(key, 4)
    return {
        "w1": xavier_uniform(k1, (in_channels, 256, 8, 8)),
        "w2": xavier_uniform(k2, (256, 128, 4, 4)),
        "w3": xavier_uniform(k3, (128, 64, 4, 4)),
        "w4": xavier_uniform(k4, (64, out_channels, 1, 1)),
    }


def _pad2(x, rows, cols):
    return jnp.pad(x, ((0, rows - x.shape[-2]), (0, cols - x.shape[-1])))


def _pad_phase(x):
    k, n = x.shape[-2], x.shape[-1]
    return jnp.pad(x, ((0, 0), (0, _round_up(k, 128) - k), (0, _round_up(n, 128) - n)))


def prepare_generator_weights(params):
    """Done once at init: flip/gather/flatten/zero-pad weights and cast to bf16."""
    cin = params["w1"].shape[0]
    cout = params["w4"].shape[1]
    # block1 acts on a 1x1 input, i.e. a pure matmul; order N as (ky, kx, co)
    # so the kernel output is directly NHWC.
    w1 = params["w1"].transpose(0, 2, 3, 1).reshape(cin, 8 * 8 * 256)
    w1 = _pad2(w1, _round_up(cin, 128), 8 * 8 * 256)[None]            # (1, Kp, 16384)
    w2 = _pad_phase(_phase_weight_matrices(params["w2"]))             # (4, 1024, 128)
    w3 = _pad_phase(_phase_weight_matrices(params["w3"]))             # (4,  512, 128)
    # Final 1x1 ConvTranspose, row-padded to match block3's padded channel dim.
    w4 = _pad2(params["w4"][:, :, 0, 0], w3.shape[-1], _round_up(cout, 128))[None]
    return {k: v.astype(jnp.bfloat16)
            for k, v in {"w1": w1, "w2": w2, "w3": w3, "w4": w4}.items()}


# ----------------------------------------------------------------------------
# Generator forward.
# ----------------------------------------------------------------------------
def generator_forward(prepared, inputs, *, out_channels):
    """inputs: (B, Cin) or (B, Cin, 1, 1)  ->  (B, out_channels, 32, 32), NCHW."""
    B, cin = inputs.shape[0], inputs.shape[1]
    x = inputs.reshape(B, cin).astype(jnp.bfloat16)          # view(B, Cin, 1, 1)

    # block1: ConvT(Cin, 256, 8, 1, 0) on a 1x1 input == matmul + LeakyReLU(0.3).
    y = phase_matmul(x[None], prepared["w1"], act="leaky_relu")[0]
    y = y.reshape(B, 8, 8, 256)                                       # NHWC

    # block2: ConvT(256, 128, 4, 2, 1) + LeakyReLU(0.3) via 4 output-phase matmuls.
    y = phase_matmul(_phase_patches(y), prepared["w2"], act="leaky_relu")
    y = _pixel_shuffle(y[..., :128], B, 8, 8)                         # (B, 16, 16, 128)

    # block3: ConvT(128, 64, 4, 2, 1) + LeakyReLU(0.3), fused in-kernel with the
    # final 1x1 ConvT + Tanh.
    y = phase_matmul(_phase_patches(y), prepared["w3"], proj=prepared["w4"],
                     out_dtype=jnp.float32)
    y = _pixel_shuffle(y[..., :out_channels], B, 16, 16)              # (B, 32, 32, Cout)
    return y.transpose(0, 3, 1, 2)                                    # NCHW


if __name__ == "__main__":
    in_channels = 64
    out_channels = 3
    batch = 2

    root = jax.random.PRNGKey(0)
    k_param, k_input = jax.random.split(root)

    params = init_generator_params(k_param, in_channels, out_channels)
    prepared = prepare_generator_weights(params)

    x = jax.random.normal(k_input, (batch, in_channels, 1, 1), dtype=jnp.float32)

    fwd = jax.jit(functools.partial(generator_forward, out_channels=out_channels))
    y = jax.block_until_ready(fwd(prepared, x))

    assert y.shape == (batch, out_channels, 32, 32), y.shape
    assert bool(jnp.all(jnp.isfinite(y)))
    assert bool(jnp.all(jnp.abs(y) <= 1.0 + 1e-6))  # tanh output range
    print("KERNEL_OK")
</pallas_src>

<mosaic_0001>
module attributes {stable_mosaic.version = 11 : i64} {
  func.func @_matmul_act_kernel(%arg0: i32, %arg1: i32, %arg2: i32, %arg3: memref<1x8x128xbf16, #tpu.memory_space<vmem>>, %arg4: memref<1x128x2048xbf16, #tpu.memory_space<vmem>>, %arg5: memref<1x8x2048xbf16, #tpu.memory_space<vmem>>) attributes {dimension_semantics = [#tpu.dimension_semantics<parallel>, #tpu.dimension_semantics<parallel>, #tpu.dimension_semantics<arbitrary>], iteration_bounds = array<i64: 1, 8, 1>, scalar_prefetch = 0 : i64, scratch_operands = 0 : i64, tpu.core_type = #tpu.core_type<tc>, window_params = [{transform_indices = @transform_0, window_bounds = array<i64: 1, 8, 128>}, {transform_indices = @transform_1, window_bounds = array<i64: 1, 128, 2048>}, {transform_indices = @transform_2, window_bounds = array<i64: 1, 8, 2048>}]} {
    %c0 = arith.constant 0 : index
    %c0_0 = arith.constant 0 : index
    %c0_1 = arith.constant 0 : index
    %0 = vector.load %arg3[%c0, %c0_0, %c0_1] : memref<1x8x128xbf16, #tpu.memory_space<vmem>>, vector<1x8x128xbf16>
    %1 = vector.shape_cast %0 : vector<1x8x128xbf16> to vector<8x128xbf16>
    %c0_2 = arith.constant 0 : index
    %c0_3 = arith.constant 0 : index
    %c0_4 = arith.constant 0 : index
    %2 = vector.load %arg4[%c0_2, %c0_3, %c0_4] : memref<1x128x2048xbf16, #tpu.memory_space<vmem>>, vector<1x128x2048xbf16>
    %3 = vector.shape_cast %2 : vector<1x128x2048xbf16> to vector<128x2048xbf16>
    %cst = arith.constant dense<0.000000e+00> : vector<8x2048xf32>
    %4 = tpu.matmul %1, %3, %cst {dimension_numbers = #tpu.dot_dimension_numbers<[1], [0], [0], [1], [0, 0, 1, 1], [], []>} : vector<8x128xbf16>, vector<128x2048xbf16>, vector<8x2048xf32> -> vector<8x2048xf32>
    %cst_5 = arith.constant 0.000000e+00 : f32
    %5 = vector.broadcast %cst_5 : f32 to vector<8x2048xf32>
    %6 = arith.cmpf oge, %4, %5 : vector<8x2048xf32>
    %cst_6 = arith.constant 3.000000e-01 : f32
    %7 = vector.broadcast %cst_6 : f32 to vector<8x2048xf32>
    %8 = arith.mulf %7, %4 : vector<8x2048xf32>
    %9 = arith.select %6, %4, %8 : vector<8x2048xi1>, vector<8x2048xf32>
    %10 = arith.truncf %9 : vector<8x2048xf32> to vector<8x2048xbf16>
    %c0_7 = arith.constant 0 : index
    %c0_8 = arith.constant 0 : index
    %c0_9 = arith.constant 0 : index
    %11 = vector.load %arg5[%c0_7, %c0_8, %c0_9] : memref<1x8x2048xbf16, #tpu.memory_space<vmem>>, vector<1x8x2048xbf16>
    %12 = vector.shape_cast %11 : vector<1x8x2048xbf16> to vector<8x2048xbf16>
    %13 = vector.shape_cast %10 : vector<8x2048xbf16> to vector<1x8x2048xbf16>
    tpu.vector_store %arg5[%c0_7, %c0_8, %c0_9], %13 {strides = array<i32>} : memref<1x8x2048xbf16, #tpu.memory_space<vmem>>, vector<1x8x2048xbf16>,
    return
  }
  func.func @transform_0(%arg0: i32, %arg1: i32, %arg2: i32) -> (i32, i32, i32) {
    %c0_i32 = arith.constant 0 : i32
    %c0_i32_0 = arith.constant 0 : i32
    return %arg0, %arg2, %c0_i32 : i32, i32, i32
  }
  func.func @transform_1(%arg0: i32, %arg1: i32, %arg2: i32) -> (i32, i32, i32) {
    %c0_i32 = arith.constant 0 : i32
    %c0_i32_0 = arith.constant 0 : i32
    return %arg0, %c0_i32, %arg1 : i32, i32, i32
  }
  func.func @transform_2(%arg0: i32, %arg1: i32, %arg2: i32) -> (i32, i32, i32) {
    %c0_i32 = arith.constant 0 : i32
    return %arg0, %arg2, %arg1 : i32, i32, i32
  }
}

module attributes {stable_mosaic.version = 11 : i64} {
  func.func @_matmul_act_kernel(%arg0: i32, %arg1: i32, %arg2: i32, %arg3: memref<1x128x1024xbf16, #tpu.memory_space<vmem>>, %arg4: memref<1x1024x128xbf16, #tpu.memory_space<vmem>>, %arg5: memref<1x128x128xbf16, #tpu.memory_space<vmem>>) attributes {dimension_semantics = [#tpu.dimension_semantics<parallel>, #tpu.dimension_semantics<parallel>, #tpu.dimension_semantics<arbitrary>], iteration_bounds = array<i64: 4, 1, 1>, scalar_prefetch = 0 : i64, scratch_operands = 0 : i64, tpu.core_type = #tpu.core_type<tc>, window_params = [{transform_indices = @transform_0, window_bounds = array<i64: 1, 128, 1024>}, {transform_indices = @transform_1, window_bounds = array<i64: 1, 1024, 128>}, {transform_indices = @transform_2, window_bounds = array<i64: 1, 128, 128>}]} {
    %c0 = arith.constant 0 : index
    %c0_0 = arith.constant 0 : index
    %c0_1 = arith.constant 0 : index
    %0 = vector.load %arg3[%c0, %c0_0, %c0_1] : memref<1x128x1024xbf16, #tpu.memory_space<vmem>>, vector<1x128x1024xbf16>
    %1 = vector.shape_cast %0 : vector<1x128x1024xbf16> to vector<128x1024xbf16>
    %c0_2 = arith.constant 0 : index
    %c0_3 = arith.constant 0 : index
    %c0_4 = arith.constant 0 : index
    %2 = vector.load %arg4[%c0_2, %c0_3, %c0_4] : memref<1x1024x128xbf16, #tpu.memory_space<vmem>>, vector<1x1024x128xbf16>
    %3 = vector.shape_cast %2 : vector<1x1024x128xbf16> to vector<1024x128xbf16>
    %cst = arith.constant dense<0.000000e+00> : vector<128x128xf32>
    %4 = tpu.matmul %1, %3, %cst {dimension_numbers = #tpu.dot_dimension_numbers<[1], [0], [0], [1], [0, 0, 1, 1], [], []>} : vector<128x1024xbf16>, vector<1024x128xbf16>, vector<128x128xf32> -> vector<128x128xf32>
    %cst_5 = arith.constant 0.000000e+00 : f32
    %5 = vector.broadcast %cst_5 : f32 to vector<128x128xf32>
    %6 = arith.cmpf oge, %4, %5 : vector<128x128xf32>
    %cst_6 = arith.constant 3.000000e-01 : f32
    %7 = vector.broadcast %cst_6 : f32 to vector<128x128xf32>
    %8 = arith.mulf %7, %4 : vector<128x128xf32>
    %9 = arith.select %6, %4, %8 : vector<128x128xi1>, vector<128x128xf32>
    %10 = arith.truncf %9 : vector<128x128xf32> to vector<128x128xbf16>
    %c0_7 = arith.constant 0 : index
    %c0_8 = arith.constant 0 : index
    %c0_9 = arith.constant 0 : index
    %11 = vector.load %arg5[%c0_7, %c0_8, %c0_9] : memref<1x128x128xbf16, #tpu.memory_space<vmem>>, vector<1x128x128xbf16>
    %12 = vector.shape_cast %11 : vector<1x128x128xbf16> to vector<128x128xbf16>
    %13 = vector.shape_cast %10 : vector<128x128xbf16> to vector<1x128x128xbf16>
    tpu.vector_store %arg5[%c0_7, %c0_8, %c0_9], %13 {strides = array<i32>} : memref<1x128x128xbf16, #tpu.memory_space<vmem>>, vector<1x128x128xbf16>,
    return
  }
  func.func @transform_0(%arg0: i32, %arg1: i32, %arg2: i32) -> (i32, i32, i32) {
    %c0_i32 = arith.constant 0 : i32
    %c0_i32_0 = arith.constant 0 : i32
    return %arg0, %arg2, %c0_i32 : i32, i32, i32
  }
  func.func @transform_1(%arg0: i32, %arg1: i32, %arg2: i32) -> (i32, i32, i32) {
    %c0_i32 = arith.constant 0 : i32
    %c0_i32_0 = arith.constant 0 : i32
    return %arg0, %c0_i32, %arg1 : i32, i32, i32
  }
  func.func @transform_2(%arg0: i32, %arg1: i32, %arg2: i32) -> (i32, i32, i32) {
    %c0_i32 = arith.constant 0 : i32
    return %arg0, %arg2, %arg1 : i32, i32, i32
  }
}

module attributes {stable_mosaic.version = 11 : i64} {
  func.func @_matmul_leaky_proj_tanh_kernel(%arg0: i32, %arg1: i32, %arg2: i32, %arg3: memref<1x512x512xbf16, #tpu.memory_space<vmem>>, %arg4: memref<1x512x128xbf16, #tpu.memory_space<vmem>>, %arg5: memref<1x128x128xbf16, #tpu.memory_space<vmem>>, %arg6: memref<1x512x128xf32, #tpu.memory_space<vmem>>) attributes {dimension_semantics = [#tpu.dimension_semantics<parallel>, #tpu.dimension_semantics<parallel>, #tpu.dimension_semantics<arbitrary>], iteration_bounds = array<i64: 4, 1, 1>, scalar_prefetch = 0 : i64, scratch_operands = 0 : i64, tpu.core_type = #tpu.core_type<tc>, window_params = [{transform_indices = @transform_0, window_bounds = array<i64: 1, 512, 512>}, {transform_indices = @transform_1, window_bounds = array<i64: 1, 512, 128>}, {pipeline_mode = #tpu.pipeline_mode<synchronous>, transform_indices = @transform_2, window_bounds = array<i64: 1, 128, 128>}, {transform_indices = @transform_3, window_bounds = array<i64: 1, 512, 128>}]} {
    %c0 = arith.constant 0 : index
    %c0_0 = arith.constant 0 : index
    %c0_1 = arith.constant 0 : index
    %0 = vector.load %arg3[%c0, %c0_0, %c0_1] : memref<1x512x512xbf16, #tpu.memory_space<vmem>>, vector<1x512x512xbf16>
    %1 = vector.shape_cast %0 : vector<1x512x512xbf16> to vector<512x512xbf16>
    %c0_2 = arith.constant 0 : index
    %c0_3 = arith.constant 0 : index
    %c0_4 = arith.constant 0 : index
    %2 = vector.load %arg4[%c0_2, %c0_3, %c0_4] : memref<1x512x128xbf16, #tpu.memory_space<vmem>>, vector<1x512x128xbf16>
    %3 = vector.shape_cast %2 : vector<1x512x128xbf16> to vector<512x128xbf16>
    %cst = arith.constant dense<0.000000e+00> : vector<512x128xf32>
    %4 = tpu.matmul %1, %3, %cst {dimension_numbers = #tpu.dot_dimension_numbers<[1], [0], [0], [1], [0, 0, 1, 1], [], []>} : vector<512x512xbf16>, vector<512x128xbf16>, vector<512x128xf32> -> vector<512x128xf32>
    %cst_5 = arith.constant 0.000000e+00 : f32
    %5 = vector.broadcast %cst_5 : f32 to vector<512x128xf32>
    %6 = arith.cmpf oge, %4, %5 : vector<512x128xf32>
    %cst_6 = arith.constant 3.000000e-01 : f32
    %7 = vector.broadcast %cst_6 : f32 to vector<512x128xf32>
    %8 = arith.mulf %7, %4 : vector<512x128xf32>
    %9 = arith.select %6, %4, %8 : vector<512x128xi1>, vector<512x128xf32>
    %10 = arith.truncf %9 : vector<512x128xf32> to vector<512x128xbf16>
    %c0_7 = arith.constant 0 : index
    %c0_8 = arith.constant 0 : index
    %c0_9 = arith.constant 0 : index
    %11 = vector.load %arg5[%c0_7, %c0_8, %c0_9] : memref<1x128x128xbf16, #tpu.memory_space<vmem>>, vector<1x128x128xbf16>
    %12 = vector.shape_cast %11 : vector<1x128x128xbf16> to vector<128x128xbf16>
    %cst_10 = arith.constant dense<0.000000e+00> : vector<512x128xf32>
    %13 = tpu.matmul %10, %12, %cst_10 {dimension_numbers = #tpu.dot_dimension_numbers<[1], [0], [0], [1], [0, 0, 1, 1], [], []>} : vector<512x128xbf16>, vector<128x128xbf16>, vector<512x128xf32> -> vector<512x128xf32>
    %14 = math.tanh %13 : vector<512x128xf32>
    %c0_11 = arith.constant 0 : index
    %c0_12 = arith.constant 0 : index
    %c0_13 = arith.constant 0 : index
    %15 = vector.load %arg6[%c0_11, %c0_12, %c0_13] : memref<1x512x128xf32, #tpu.memory_space<vmem>>, vector<1x512x128xf32>
    %16 = vector.shape_cast %15 : vector<1x512x128xf32> to vector<512x128xf32>
    %17 = vector.shape_cast %14 : vector<512x128xf32> to vector<1x512x128xf32>
    tpu.vector_store %arg6[%c0_11, %c0_12, %c0_13], %17 {strides = array<i32>} : memref<1x512x128xf32, #tpu.memory_space<vmem>>, vector<1x512x128xf32>,
    return
  }
  func.func @transform_0(%arg0: i32, %arg1: i32, %arg2: i32) -> (i32, i32, i32) {
    %c0_i32 = arith.constant 0 : i32
    %c0_i32_0 = arith.constant 0 : i32
    return %arg0, %arg2, %c0_i32 : i32, i32, i32
  }
  func.func @transform_1(%arg0: i32, %arg1: i32, %arg2: i32) -> (i32, i32, i32) {
    %c0_i32 = arith.constant 0 : i32
    %c0_i32_0 = arith.constant 0 : i32
    return %arg0, %c0_i32, %arg1 : i32, i32, i32
  }
  func.func @transform_2(%arg0: i32, %arg1: i32, %arg2: i32) -> (i32, i32, i32) {
    %c0_i32 = arith.constant 0 : i32
    %c0_i32_0 = arith.constant 0 : i32
    %c0_i32_1 = arith.constant 0 : i32
    %c0_i32_2 = arith.constant 0 : i32
    return %c0_i32, %c0_i32_0, %c0_i32_1 : i32, i32, i32
  }
  func.func @transform_3(%arg0: i32, %arg1: i32, %arg2: i32) -> (i32, i32, i32) {
    %c0_i32 = arith.constant 0 : i32
    return %arg0, %arg2, %arg1 : i32, i32, i32
  }
}

</mosaic_0001>

<bundles_post_ra>
// kernel: squeeze.1
= control target key start
LH: loop header
LB: loop body
LE: loop exit
PB: predicated region body
PF: predicated region fallthrough
CT: control target
= control target key end

     0   :  { %s3890_s0 = inlined_call_operand.vmem [shape: bf16[1,2,16384], index: 0, kind: input, shape index: {}]   ;;  %s3891_s1 = inlined_call_operand.vmem [shape: bf16[2,8,8,256], index: 1, kind: output, shape index: {}]  }
   0x1   :  { %v3195_v0 = vld [vmem:[%s3890_s0 + $0x7f] sm:$0x1]  ;;  %v3196_v1 = vld [vmem:[%s3890_s0 + $0x7e] sm:$0x1]  ;;  %v3197_v2 = vld [vmem:[%s3890_s0 + $0x7d] sm:$0x1] }
   0x2   :  { %v17_v3 = vunpack.c.l.bf16 %v3195_v0  ;;  %v33_v4 = vunpack.c.l.bf16 %v3196_v1  ;;  %v49_v5 = vunpack.c.l.bf16 %v3197_v2  ;;  %v3198_v6 = vld [vmem:[%s3890_s0 + $0x7c] sm:$0x1]  ;;  %v3199_v7 = vld [vmem:[%s3890_s0 + $0x7b] sm:$0x1]  ;;  %v3200_v8 = vld [vmem:[%s3890_s0 + $0x7a] sm:$0x1] }
   0x3   :  { %v65_v9 = vunpack.c.l.bf16 %v3198_v6  ;;  %v81_v10 = vunpack.c.l.bf16 %v3199_v7  ;;  %v97_v11 = vunpack.c.l.bf16 %v3200_v8  ;;  %v3201_v12 = vld [vmem:[%s3890_s0 + $0x79] sm:$0x1]  ;;  %v3202_v13 = vld [vmem:[%s3890_s0 + $0x78] sm:$0x1]  ;;  %v3203_v14 = vld [vmem:[%s3890_s0 + $0x77] sm:$0x1] }
   0x4   :  { %20 = vst [vmem:[#allocation1 + $0x3f8] sm:$0x3] %v17_v3  ;;  %36 = vst [vmem:[#allocation1 + $0x3f0] sm:$0x3] %v33_v4  ;;  %v113_v15 = vunpack.c.l.bf16 %v3201_v12  ;;  %v129_v16 = vunpack.c.l.bf16 %v3202_v13  ;;  %v145_v17 = vunpack.c.l.bf16 %v3203_v14  ;;  %v3204_v18 = vld [vmem:[%s3890_s0 + $0x76] sm:$0x1] }
   0x5   :  { %52 = vst [vmem:[#allocation1 + $0x3e8] sm:$0x3] %v49_v5  ;;  %v3205_v19 = vld [vmem:[%s3890_s0 + $0x75] sm:$0x1]  ;;  %v3206_v20 = vld [vmem:[%s3890_s0 + $0x74] sm:$0x1]  ;;  %v161_v21 = vunpack.c.l.bf16 %v3204_v18 }
   0x6   :  { %68 = vst [vmem:[#allocation1 + $0x3e0] sm:$0x3] %v65_v9  ;;  %84 = vst [vmem:[#allocation1 + $0x3d8] sm:$0x3] %v81_v10  ;;  %v177_v22 = vunpack.c.l.bf16 %v3205_v19  ;;  %v193_v23 = vunpack.c.l.bf16 %v3206_v20  ;;  %v3207_v24 = vld [vmem:[%s3890_s0 + $0x73] sm:$0x1] }
   0x7   :  { %100 = vst [vmem:[#allocation1 + $0x3d0] sm:$0x3] %v97_v11  ;;  %v3208_v25 = vld [vmem:[%s3890_s0 + $0x72] sm:$0x1]  ;;  %v3209_v26 = vld [vmem:[%s3890_s0 + $0x71] sm:$0x1]  ;;  %v209_v27 = vunpack.c.l.bf16 %v3207_v24 }
   0x8   :  { %116 = vst [vmem:[#allocation1 + $0x3c8] sm:$0x3] %v113_v15  ;;  %132 = vst [vmem:[#allocation1 + $0x3c0] sm:$0x3] %v129_v16  ;;  %v225_v28 = vunpack.c.l.bf16 %v3208_v25  ;;  %v241_v29 = vunpack.c.l.bf16 %v3209_v26  ;;  %v3210_v30 = vld [vmem:[%s3890_s0 + $0x70] sm:$0x1] }
   0x9   :  { %148 = vst [vmem:[#allocation1 + $0x3b8] sm:$0x3] %v145_v17  ;;  %v3211_v31 = vld [vmem:[%s3890_s0 + $0x6f] sm:$0x1]  ;;  %v3212_v32 = vld [vmem:[%s3890_s0 + $0x6e] sm:$0x1]  ;;  %v257_v33 = vunpack.c.l.bf16 %v3210_v30 }
   0xa   :  { %164 = vst [vmem:[#allocation1 + $0x3b0] sm:$0x3] %v161_v21  ;;  %180 = vst [vmem:[#allocation1 + $0x3a8] sm:$0x3] %v177_v22  ;;  %v273_v34 = vunpack.c.l.bf16 %v3211_v31  ;;  %v289_v35 = vunpack.c.l.bf16 %v3212_v32  ;;  %v3213_v36 = vld [vmem:[%s3890_s0 + $0x6d] sm:$0x1] }
   0xb   :  { %196 = vst [vmem:[#allocation1 + $0x3a0] sm:$0x3] %v193_v23  ;;  %v3214_v37 = vld [vmem:[%s3890_s0 + $0x6c] sm:$0x1]  ;;  %v3215_v38 = vld [vmem:[%s3890_s0 + $0x6b] sm:$0x1]  ;;  %v305_v39 = vunpack.c.l.bf16 %v3213_v36 }
   0xc   :  { %212 = vst [vmem:[#allocation1 + $0x398] sm:$0x3] %v209_v27  ;;  %228 = vst [vmem:[#allocation1 + $0x390] sm:$0x3] %v225_v28  ;;  %v321_v40 = vunpack.c.l.bf16 %v3214_v37  ;;  %v337_v41 = vunpack.c.l.bf16 %v3215_v38  ;;  %v3216_v42 = vld [vmem:[%s3890_s0 + $0x6a] sm:$0x1] }
   0xd   :  { %244 = vst [vmem:[#allocation1 + $0x388] sm:$0x3] %v241_v29  ;;  %v3217_v43 = vld [vmem:[%s3890_s0 + $0x69] sm:$0x1]  ;;  %v3218_v44 = vld [vmem:[%s3890_s0 + $0x68] sm:$0x1]  ;;  %v353_v45 = vunpack.c.l.bf16 %v3216_v42 }
   0xe   :  { %260 = vst [vmem:[#allocation1 + $0x380] sm:$0x3] %v257_v33  ;;  %276 = vst [vmem:[#allocation1 + $0x378] sm:$0x3] %v273_v34  ;;  %v369_v46 = vunpack.c.l.bf16 %v3217_v43  ;;  %v385_v47 = vunpack.c.l.bf16 %v3218_v44  ;;  %v3219_v48 = vld [vmem:[%s3890_s0 + $0x67] sm:$0x1] }
   0xf   :  { %292 = vst [vmem:[#allocation1 + $0x370] sm:$0x3] %v289_v35  ;;  %v3220_v49 = vld [vmem:[%s3890_s0 + $0x66] sm:$0x1]  ;;  %v3221_v50 = vld [vmem:[%s3890_s0 + $0x65] sm:$0x1]  ;;  %v401_v51 = vunpack.c.l.bf16 %v3219_v48 }
  0x10   :  { %308 = vst [vmem:[#allocation1 + $0x368] sm:$0x3] %v305_v39  ;;  %324 = vst [vmem:[#allocation1 + $0x360] sm:$0x3] %v321_v40  ;;  %v417_v52 = vunpack.c.l.bf16 %v3220_v49  ;;  %v433_v53 = vunpack.c.l.bf16 %v3221_v50  ;;  %v3222_v54 = vld [vmem:[%s3890_s0 + $0x64] sm:$0x1] }
  0x11   :  { %340 = vst [vmem:[#allocation1 + $0x358] sm:$0x3] %v337_v41  ;;  %v3223_v55 = vld [vmem:[%s3890_s0 + $0x63] sm:$0x1]  ;;  %v3224_v56 = vld [vmem:[%s3890_s0 + $0x62] sm:$0x1]  ;;  %v449_v57 = vunpack.c.l.bf16 %v3222_v54 }
  0x12   :  { %356 = vst [vmem:[#allocation1 + $0x350] sm:$0x3] %v353_v45  ;;  %372 = vst [vmem:[#allocation1 + $0x348] sm:$0x3] %v369_v46  ;;  %v465_v58 = vunpack.c.l.bf16 %v3223_v55  ;;  %v481_v59 = vunpack.c.l.bf16 %v3224_v56  ;;  %v3225_v60 = vld [vmem:[%s3890_s0 + $0x61] sm:$0x1] }
  0x13   :  { %388 = vst [vmem:[#allocation1 + $0x340] sm:$0x3] %v385_v47  ;;  %v3226_v61 = vld [vmem:[%s3890_s0 + $0x60] sm:$0x1]  ;;  %v3227_v62 = vld [vmem:[%s3890_s0 + $0x5f] sm:$0x1]  ;;  %v497_v63 = vunpack.c.l.bf16 %v3225_v60 }
  0x14   :  { %404 = vst [vmem:[#allocation1 + $0x338] sm:$0x3] %v401_v51  ;;  %420 = vst [vmem:[#allocation1 + $0x330] sm:$0x3] %v417_v52  ;;  %v513_v0 = vunpack.c.l.bf16 %v3226_v61  ;;  %v529_v1 = vunpack.c.l.bf16 %v3227_v62  ;;  %v3228_v2 = vld [vmem:[%s3890_s0 + $0x5e] sm:$0x1] }
  0x15   :  { %436 = vst [vmem:[#allocation1 + $0x328] sm:$0x3] %v433_v53  ;;  %v3229_v3 = vld [vmem:[%s3890_s0 + $0x5d] sm:$0x1]  ;;  %v3230_v4 = vld [vmem:[%s3890_s0 + $0x5c] sm:$0x1]  ;;  %v545_v5 = vunpack.c.l.bf16 %v3228_v2 }
  0x16   :  { %452 = vst [vmem:[#allocation1 + $0x320] sm:$0x3] %v449_v57  ;;  %468 = vst [vmem:[#allocation1 + $0x318] sm:$0x3] %v465_v58  ;;  %v561_v6 = vunpack.c.l.bf16 %v3229_v3  ;;  %v577_v7 = vunpack.c.l.bf16 %v3230_v4  ;;  %v3231_v8 = vld [vmem:[%s3890_s0 + $0x5b] sm:$0x1] }
  0x17   :  { %484 = vst [vmem:[#allocation1 + $0x310] sm:$0x3] %v481_v59  ;;  %v3232_v9 = vld [vmem:[%s3890_s0 + $0x5a] sm:$0x1]  ;;  %v3233_v10 = vld [vmem:[%s3890_s0 + $0x59] sm:$0x1]  ;;  %v593_v11 = vunpack.c.l.bf16 %v3231_v8 }
  0x18   :  { %500 = vst [vmem:[#allocation1 + $0x308] sm:$0x3] %v497_v63  ;;  %516 = vst [vmem:[#allocation1 + $0x300] sm:$0x3] %v513_v0  ;;  %v609_v12 = vunpack.c.l.bf16 %v3232_v9  ;;  %v625_v13 = vunpack.c.l.bf16 %v3233_v10  ;;  %v3234_v14 = vld [vmem:[%s3890_s0 + $0x58] sm:$0x1] }
  0x19   :  { %532 = vst [vmem:[#allocation1 + $0x2f8] sm:$0x3] %v529_v1  ;;  %v3235_v15 = vld [vmem:[%s3890_s0 + $0x57] sm:$0x1]  ;;  %v3236_v16 = vld [vmem:[%s3890_s0 + $0x56] sm:$0x1]  ;;  %v641_v17 = vunpack.c.l.bf16 %v3234_v14 }
  0x1a   :  { %548 = vst [vmem:[#allocation1 + $0x2f0] sm:$0x3] %v545_v5  ;;  %564 = vst [vmem:[#allocation1 + $0x2e8] sm:$0x3] %v561_v6  ;;  %v657_v18 = vunpack.c.l.bf16 %v3235_v15  ;;  %v673_v19 = vunpack.c.l.bf16 %v3236_v16  ;;  %v3237_v20 = vld [vmem:[%s3890_s0 + $0x55] sm:$0x1] }
  0x1b   :  { %580 = vst [vmem:[#allocation1 + $0x2e0] sm:$0x3] %v577_v7  ;;  %v3238_v21 = vld [vmem:[%s3890_s0 + $0x54] sm:$0x1]  ;;  %v3239_v22 = vld [vmem:[%s3890_s0 + $0x53] sm:$0x1]  ;;  %v689_v23 = vunpack.c.l.bf16 %v3237_v20 }
  0x1c   :  { %596 = vst [vmem:[#allocation1 + $0x2d8] sm:$0x3] %v593_v11  ;;  %612 = vst [vmem:[#allocation1 + $0x2d0] sm:$0x3] %v609_v12  ;;  %v705_v24 = vunpack.c.l.bf16 %v3238_v21  ;;  %v721_v25 = vunpack.c.l.bf16 %v3239_v22  ;;  %v3240_v26 = vld [vmem:[%s3890_s0 + $0x52] sm:$0x1] }
  0x1d   :  { %628 = vst [vmem:[#allocation1 + $0x2c8] sm:$0x3] %v625_v13  ;;  %v3241_v27 = vld [vmem:[%s3890_s0 + $0x51] sm:$0x1]  ;;  %v3242_v28 = vld [vmem:[%s3890_s0 + $0x50] sm:$0x1]  ;;  %v737_v29 = vunpack.c.l.bf16 %v3240_v26 }
  0x1e   :  { %644 = vst [vmem:[#allocation1 + $0x2c0] sm:$0x3] %v641_v17  ;;  %660 = vst [vmem:[#allocation1 + $0x2b8] sm:$0x3] %v657_v18  ;;  %v753_v30 = vunpack.c.l.bf16 %v3241_v27  ;;  %v769_v31 = vunpack.c.l.bf16 %v3242_v28  ;;  %v3243_v32 = vld [vmem:[%s3890_s0 + $0x4f] sm:$0x1] }
  0x1f   :  { %676 = vst [vmem:[#allocation1 + $0x2b0] sm:$0x3] %v673_v19  ;;  %v3244_v33 = vld [vmem:[%s3890_s0 + $0x4e] sm:$0x1]  ;;  %v3245_v34 = vld [vmem:[%s3890_s0 + $0x4d] sm:$0x1]  ;;  %v785_v35 = vunpack.c.l.bf16 %v3243_v32 }
  0x20   :  { %692 = vst [vmem:[#allocation1 + $0x2a8] sm:$0x3] %v689_v23  ;;  %708 = vst [vmem:[#allocation1 + $0x2a0] sm:$0x3] %v705_v24  ;;  %v801_v36 = vunpack.c.l.bf16 %v3244_v33  ;;  %v817_v37 = vunpack.c.l.bf16 %v3245_v34  ;;  %v3246_v38 = vld [vmem:[%s3890_s0 + $0x4c] sm:$0x1] }
  0x21   :  { %724 = vst [vmem:[#allocation1 + $0x298] sm:$0x3] %v721_v25  ;;  %v3247_v39 = vld [vmem:[%s3890_s0 + $0x4b] sm:$0x1]  ;;  %v3248_v40 = vld [vmem:[%s3890_s0 + $0x4a] sm:$0x1]  ;;  %v833_v41 = vunpack.c.l.bf16 %v3246_v38 }
  0x22   :  { %740 = vst [vmem:[#allocation1 + $0x290] sm:$0x3] %v737_v29  ;;  %756 = vst [vmem:[#allocation1 + $0x288] sm:$0x3] %v753_v30  ;;  %v849_v42 = vunpack.c.l.bf16 %v3247_v39  ;;  %v865_v43 = vunpack.c.l.bf16 %v3248_v40  ;;  %v3249_v44 = vld [vmem:[%s3890_s0 + $0x49] sm:$0x1] }
  0x23   :  { %772 = vst [vmem:[#allocation1 + $0x280] sm:$0x3] %v769_v31  ;;  %v3250_v45 = vld [vmem:[%s3890_s0 + $0x48] sm:$0x1]  ;;  %v3251_v46 = vld [vmem:[%s3890_s0 + $0x47] sm:$0x1]  ;;  %v881_v47 = vunpack.c.l.bf16 %v3249_v44 }
  0x24   :  { %788 = vst [vmem:[#allocation1 + $0x278] sm:$0x3] %v785_v35  ;;  %804 = vst [vmem:[#allocation1 + $0x270] sm:$0x3] %v801_v36  ;;  %v897_v48 = vunpack.c.l.bf16 %v3250_v45  ;;  %v913_v49 = vunpack.c.l.bf16 %v3251_v46  ;;  %v3252_v50 = vld [vmem:[%s3890_s0 + $0x46] sm:$0x1] }
  0x25   :  { %820 = vst [vmem:[#allocation1 + $0x268] sm:$0x3] %v817_v37  ;;  %v3253_v51 = vld [vmem:[%s3890_s0 + $0x45] sm:$0x1]  ;;  %v3254_v52 = vld [vmem:[%s3890_s0 + $0x44] sm:$0x1]  ;;  %v929_v53 = vunpack.c.l.bf16 %v3252_v50 }
  0x26   :  { %836 = vst [vmem:[#allocation1 + $0x260] sm:$0x3] %v833_v41  ;;  %852 = vst [vmem:[#allocation1 + $0x258] sm:$0x3] %v849_v42  ;;  %v945_v54 = vunpack.c.l.bf16 %v3253_v51  ;;  %v961_v55 = vunpack.c.l.bf16 %v3254_v52  ;;  %v3255_v56 = vld [vmem:[%s3890_s0 + $0x43] sm:$0x1] }
  0x27   :  { %868 = vst [vmem:[#allocation1 + $0x250] sm:$0x3] %v865_v43  ;;  %v3256_v57 = vld [vmem:[%s3890_s0 + $0x42] sm:$0x1]  ;;  %v3257_v58 = vld [vmem:[%s3890_s0 + $0x41] sm:$0x1]  ;;  %v977_v59 = vunpack.c.l.bf16 %v3255_v56 }
  0x28   :  { %884 = vst [vmem:[#allocation1 + $0x248] sm:$0x3] %v881_v47  ;;  %900 = vst [vmem:[#allocation1 + $0x240] sm:$0x3] %v897_v48  ;;  %v993_v60 = vunpack.c.l.bf16 %v3256_v57  ;;  %v1009_v61 = vunpack.c.l.bf16 %v3257_v58  ;;  %v3258_v62 = vld [vmem:[%s3890_s0 + $0x40] sm:$0x1] }
  0x29   :  { %916 = vst [vmem:[#allocation1 + $0x238] sm:$0x3] %v913_v49  ;;  %v3259_v63 = vld [vmem:[%s3890_s0 + $0x3f] sm:$0x1]  ;;  %v3260_v0 = vld [vmem:[%s3890_s0 + $0x3e] sm:$0x1]  ;;  %v1025_v1 = vunpack.c.l.bf16 %v3258_v62 }
  0x2a   :  { %932 = vst [vmem:[#allocation1 + $0x230] sm:$0x3] %v929_v53  ;;  %948 = vst [vmem:[#allocation1 + $0x228] sm:$0x3] %v945_v54  ;;  %v1041_v2 = vunpack.c.l.bf16 %v3259_v63  ;;  %v1057_v3 = vunpack.c.l.bf16 %v3260_v0  ;;  %v3261_v4 = vld [vmem:[%s3890_s0 + $0x3d] sm:$0x1] }
  0x2b   :  { %964 = vst [vmem:[#allocation1 + $0x220] sm:$0x3] %v961_v55  ;;  %v3262_v5 = vld [vmem:[%s3890_s0 + $0x3c] sm:$0x1]  ;;  %v3263_v6 = vld [vmem:[%s3890_s0 + $0x3b] sm:$0x1]  ;;  %v1073_v7 = vunpack.c.l.bf16 %v3261_v4 }
  0x2c   :  { %980 = vst [vmem:[#allocation1 + $0x218] sm:$0x3] %v977_v59  ;;  %996 = vst [vmem:[#allocation1 + $0x210] sm:$0x3] %v993_v60  ;;  %v1089_v8 = vunpack.c.l.bf16 %v3262_v5  ;;  %v1105_v9 = vunpack.c.l.bf16 %v3263_v6  ;;  %v3264_v10 = vld [vmem:[%s3890_s0 + $0x3a] sm:$0x1] }
  0x2d   :  { %1012 = vst [vmem:[#allocation1 + $0x208] sm:$0x3] %v1009_v61  ;;  %v3265_v11 = vld [vmem:[%s3890_s0 + $0x39] sm:$0x1]  ;;  %v3266_v12 = vld [vmem:[%s3890_s0 + $0x38] sm:$0x1]  ;;  %v1121_v13 = vunpack.c.l.bf16 %v3264_v10 }
  0x2e   :  { %1028 = vst [vmem:[#allocation1 + $0x200] sm:$0x3] %v1025_v1  ;;  %1044 = vst [vmem:[#allocation1 + $0x1f8] sm:$0x3] %v1041_v2  ;;  %v1137_v14 = vunpack.c.l.bf16 %v3265_v11  ;;  %v1153_v15 = vunpack.c.l.bf16 %v3266_v12  ;;  %v3267_v16 = vld [vmem:[%s3890_s0 + $0x37] sm:$0x1] }
  0x2f   :  { %1060 = vst [vmem:[#allocation1 + $0x1f0] sm:$0x3] %v1057_v3  ;;  %v3268_v17 = vld [vmem:[%s3890_s0 + $0x36] sm:$0x1]  ;;  %v3269_v18 = vld [vmem:[%s3890_s0 + $0x35] sm:$0x1]  ;;  %v1169_v19 = vunpack.c.l.bf16 %v3267_v16 }
  0x30   :  { %1076 = vst [vmem:[#allocation1 + $0x1e8] sm:$0x3] %v1073_v7  ;;  %1092 = vst [vmem:[#allocation1 + $0x1e0] sm:$0x3] %v1089_v8  ;;  %v1185_v20 = vunpack.c.l.bf16 %v3268_v17  ;;  %v1201_v21 = vunpack.c.l.bf16 %v3269_v18  ;;  %v3270_v22 = vld [vmem:[%s3890_s0 + $0x34] sm:$0x1] }
  0x31   :  { %1108 = vst [vmem:[#allocation1 + $0x1d8] sm:$0x3] %v1105_v9  ;;  %v3271_v23 = vld [vmem:[%s3890_s0 + $0x33] sm:$0x1]  ;;  %v3272_v24 = vld [vmem:[%s3890_s0 + $0x32] sm:$0x1]  ;;  %v1217_v25 = vunpack.c.l.bf16 %v3270_v22 }
  0x32   :  { %1124 = vst [vmem:[#allocation1 + $0x1d0] sm:$0x3] %v1121_v13  ;;  %1140 = vst [vmem:[#allocation1 + $0x1c8] sm:$0x3] %v1137_v14  ;;  %v1233_v26 = vunpack.c.l.bf16 %v3271_v23  ;;  %v1249_v27 = vunpack.c.l.bf16 %v3272_v24  ;;  %v3273_v28 = vld [vmem:[%s3890_s0 + $0x31] sm:$0x1] }
  0x33   :  { %1156 = vst [vmem:[#allocation1 + $0x1c0] sm:$0x3] %v1153_v15  ;;  %v3274_v29 = vld [vmem:[%s3890_s0 + $0x30] sm:$0x1]  ;;  %v3275_v30 = vld [vmem:[%s3890_s0 + $0x2f] sm:$0x1]  ;;  %v1265_v31 = vunpack.c.l.bf16 %v3273_v28 }
  0x34   :  { %1172 = vst [vmem:[#allocation1 + $0x1b8] sm:$0x3] %v1169_v19  ;;  %1188 = vst [vmem:[#allocation1 + $0x1b0] sm:$0x3] %v1185_v20  ;;  %v1281_v32 = vunpack.c.l.bf16 %v3274_v29  ;;  %v1297_v33 = vunpack.c.l.bf16 %v3275_v30  ;;  %v3276_v34 = vld [vmem:[%s3890_s0 + $0x2e] sm:$0x1] }
  0x35   :  { %1204 = vst [vmem:[#allocation1 + $0x1a8] sm:$0x3] %v1201_v21  ;;  %v3277_v35 = vld [vmem:[%s3890_s0 + $0x2d] sm:$0x1]  ;;  %v3278_v36 = vld [vmem:[%s3890_s0 + $0x2c] sm:$0x1]  ;;  %v1313_v37 = vunpack.c.l.bf16 %v3276_v34 }
  0x36   :  { %1220 = vst [vmem:[#allocation1 + $0x1a0] sm:$0x3] %v1217_v25  ;;  %1236 = vst [vmem:[#allocation1 + $0x198] sm:$0x3] %v1233_v26  ;;  %v1329_v38 = vunpack.c.l.bf16 %v3277_v35  ;;  %v1345_v39 = vunpack.c.l.bf16 %v3278_v36  ;;  %v3279_v40 = vld [vmem:[%s3890_s0 + $0x2b] sm:$0x1] }
  0x37   :  { %1252 = vst [vmem:[#allocation1 + $0x190] sm:$0x3] %v1249_v27  ;;  %v3280_v41 = vld [vmem:[%s3890_s0 + $0x2a] sm:$0x1]  ;;  %v3281_v42 = vld [vmem:[%s3890_s0 + $0x29] sm:$0x1]  ;;  %v1361_v43 = vunpack.c.l.bf16 %v3279_v40 }
  0x38   :  { %1268 = vst [vmem:[#allocation1 + $0x188] sm:$0x3] %v1265_v31  ;;  %1284 = vst [vmem:[#allocation1 + $0x180] sm:$0x3] %v1281_v32  ;;  %v1377_v44 = vunpack.c.l.bf16 %v3280_v41  ;;  %v1393_v45 = vunpack.c.l.bf16 %v3281_v42  ;;  %v3282_v46 = vld [vmem:[%s3890_s0 + $0x28] sm:$0x1] }
  0x39   :  { %1300 = vst [vmem:[#allocation1 + $0x178] sm:$0x3] %v1297_v33  ;;  %v3283_v47 = vld [vmem:[%s3890_s0 + $0x27] sm:$0x1]  ;;  %v3284_v48 = vld [vmem:[%s3890_s0 + $0x26] sm:$0x1]  ;;  %v1409_v49 = vunpack.c.l.bf16 %v3282_v46 }
  0x3a   :  { %1316 = vst [vmem:[#allocation1 + $0x170] sm:$0x3] %v1313_v37  ;;  %1332 = vst [vmem:[#allocation1 + $0x168] sm:$0x3] %v1329_v38  ;;  %v1425_v50 = vunpack.c.l.bf16 %v3283_v47  ;;  %v1441_v51 = vunpack.c.l.bf16 %v3284_v48  ;;  %v3285_v52 = vld [vmem:[%s3890_s0 + $0x25] sm:$0x1] }
  0x3b   :  { %1348 = vst [vmem:[#allocation1 + $0x160] sm:$0x3] %v1345_v39  ;;  %v3286_v53 = vld [vmem:[%s3890_s0 + $0x24] sm:$0x1]  ;;  %v3287_v54 = vld [vmem:[%s3890_s0 + $0x23] sm:$0x1]  ;;  %v1457_v55 = vunpack.c.l.bf16 %v3285_v52 }
  0x3c   :  { %1364 = vst [vmem:[#allocation1 + $0x158] sm:$0x3] %v1361_v43  ;;  %1380 = vst [vmem:[#allocation1 + $0x150] sm:$0x3] %v1377_v44  ;;  %v1473_v56 = vunpack.c.l.bf16 %v3286_v53  ;;  %v1489_v57 = vunpack.c.l.bf16 %v3287_v54  ;;  %v3288_v58 = vld [vmem:[%s3890_s0 + $0x22] sm:$0x1] }
  0x3d   :  { %1396 = vst [vmem:[#allocation1 + $0x148] sm:$0x3] %v1393_v45  ;;  %v3289_v59 = vld [vmem:[%s3890_s0 + $0x21] sm:$0x1]  ;;  %v3290_v60 = vld [vmem:[%s3890_s0 + $0x20] sm:$0x1]  ;;  %v1505_v61 = vunpack.c.l.bf16 %v3288_v58 }
  0x3e   :  { %1412 = vst [vmem:[#allocation1 + $0x140] sm:$0x3] %v1409_v49  ;;  %1428 = vst [vmem:[#allocation1 + $0x138] sm:$0x3] %v1425_v50  ;;  %v1521_v62 = vunpack.c.l.bf16 %v3289_v59  ;;  %v1537_v63 = vunpack.c.l.bf16 %v3290_v60  ;;  %v3291_v0 = vld [vmem:[%s3890_s0 + $0x1f] sm:$0x1] }
  0x3f   :  { %1444 = vst [vmem:[#allocation1 + $0x130] sm:$0x3] %v1441_v51  ;;  %v3292_v1 = vld [vmem:[%s3890_s0 + $0x1e] sm:$0x1]  ;;  %v3293_v2 = vld [vmem:[%s3890_s0 + $0x1d] sm:$0x1]  ;;  %v1553_v3 = vunpack.c.l.bf16 %v3291_v0 }
  0x40   :  { %1460 = vst [vmem:[#allocation1 + $0x128] sm:$0x3] %v1457_v55  ;;  %1476 = vst [vmem:[#allocation1 + $0x120] sm:$0x3] %v1473_v56  ;;  %v1569_v4 = vunpack.c.l.bf16 %v3292_v1  ;;  %v1585_v5 = vunpack.c.l.bf16 %v3293_v2  ;;  %v3294_v6 = vld [vmem:[%s3890_s0 + $0x1c] sm:$0x1] }
  0x41   :  { %1492 = vst [vmem:[#allocation1 + $0x118] sm:$0x3] %v1489_v57  ;;  %v3295_v7 = vld [vmem:[%s3890_s0 + $0x1b] sm:$0x1]  ;;  %v3296_v8 = vld [vmem:[%s3890_s0 + $0x1a] sm:$0x1]  ;;  %v1601_v9 = vunpack.c.l.bf16 %v3294_v6 }
  0x42   :  { %1508 = vst [vmem:[#allocation1 + $0x110] sm:$0x3] %v1505_v61  ;;  %1524 = vst [vmem:[#allocation1 + $0x108] sm:$0x3] %v1521_v62  ;;  %v1617_v10 = vunpack.c.l.bf16 %v3295_v7  ;;  %v1633_v11 = vunpack.c.l.bf16 %v3296_v8  ;;  %v3297_v12 = vld [vmem:[%s3890_s0 + $0x19] sm:$0x1] }
  0x43   :  { %1540 = vst [vmem:[#allocation1 + $0x100] sm:$0x3] %v1537_v63  ;;  %v3298_v13 = vld [vmem:[%s3890_s0 + $0x18] sm:$0x1]  ;;  %v3299_v14 = vld [vmem:[%s3890_s0 + $0x17] sm:$0x1]  ;;  %v1649_v15 = vunpack.c.l.bf16 %v3297_v12 }
  0x44   :  { %1556 = vst [vmem:[#allocation1 + $0xf8] sm:$0x3] %v1553_v3  ;;  %1572 = vst [vmem:[#allocation1 + $0xf0] sm:$0x3] %v1569_v4  ;;  %v1665_v16 = vunpack.c.l.bf16 %v3298_v13  ;;  %v1681_v17 = vunpack.c.l.bf16 %v3299_v14  ;;  %v3300_v18 = vld [vmem:[%s3890_s0 + $0x16] sm:$0x1] }
  0x45   :  { %1588 = vst [vmem:[#allocation1 + $0xe8] sm:$0x3] %v1585_v5  ;;  %v3301_v19 = vld [vmem:[%s3890_s0 + $0x15] sm:$0x1]  ;;  %v3302_v20 = vld [vmem:[%s3890_s0 + $0x14] sm:$0x1]  ;;  %v1697_v21 = vunpack.c.l.bf16 %v3300_v18 }
  0x46   :  { %1604 = vst [vmem:[#allocation1 + $0xe0] sm:$0x3] %v1601_v9  ;;  %1620 = vst [vmem:[#allocation1 + $0xd8] sm:$0x3] %v1617_v10  ;;  %v1713_v22 = vunpack.c.l.bf16 %v3301_v19  ;;  %v1729_v23 = vunpack.c.l.bf16 %v3302_v20  ;;  %v3303_v24 = vld [vmem:[%s3890_s0 + $0x13] sm:$0x1] }
  0x47   :  { %1636 = vst [vmem:[#allocation1 + $0xd0] sm:$0x3] %v1633_v11  ;;  %v3304_v25 = vld [vmem:[%s3890_s0 + $0x12] sm:$0x1]  ;;  %v3305_v26 = vld [vmem:[%s3890_s0 + $0x11] sm:$0x1]  ;;  %v1745_v27 = vunpack.c.l.bf16 %v3303_v24 }
  0x48   :  { %1652 = vst [vmem:[#allocation1 + $0xc8] sm:$0x3] %v1649_v15  ;;  %1668 = vst [vmem:[#allocation1 + $0xc0] sm:$0x3] %v1665_v16  ;;  %v1761_v28 = vunpack.c.l.bf16 %v3304_v25  ;;  %v1777_v29 = vunpack.c.l.bf16 %v3305_v26  ;;  %v3306_v30 = vld [vmem:[%s3890_s0 + $0x10] sm:$0x1] }
  0x49   :  { %1684 = vst [vmem:[#allocation1 + $0xb8] sm:$0x3] %v1681_v17  ;;  %v3307_v31 = vld [vmem:[%s3890_s0 + $0xf] sm:$0x1]  ;;  %v3308_v32 = vld [vmem:[%s3890_s0 + $0xe] sm:$0x1]  ;;  %v1793_v33 = vunpack.c.l.bf16 %v3306_v30 }
  0x4a   :  { %1700 = vst [vmem:[#allocation1 + $0xb0] sm:$0x3] %v1697_v21  ;;  %1716 = vst [vmem:[#allocation1 + $0xa8] sm:$0x3] %v1713_v22  ;;  %v1809_v34 = vunpack.c.l.bf16 %v3307_v31  ;;  %v1825_v35 = vunpack.c.l.bf16 %v3308_v32  ;;  %v3309_v36 = vld [vmem:[%s3890_s0 + $0xd] sm:$0x1] }
  0x4b   :  { %1732 = vst [vmem:[#allocation1 + $0xa0] sm:$0x3] %v1729_v23  ;;  %v3310_v37 = vld [vmem:[%s3890_s0 + $0xc] sm:$0x1]  ;;  %v3311_v38 = vld [vmem:[%s3890_s0 + $0xb] sm:$0x1]  ;;  %v1841_v39 = vunpack.c.l.bf16 %v3309_v36 }
  0x4c   :  { %1748 = vst [vmem:[#allocation1 + $0x98] sm:$0x3] %v1745_v27  ;;  %1764 = vst [vmem:[#allocation1 + $0x90] sm:$0x3] %v1761_v28  ;;  %v1857_v40 = vunpack.c.l.bf16 %v3310_v37  ;;  %v1873_v41 = vunpack.c.l.bf16 %v3311_v38  ;;  %v3312_v42 = vld [vmem:[%s3890_s0 + $0xa] sm:$0x1] }
  0x4d   :  { %1780 = vst [vmem:[#allocation1 + $0x88] sm:$0x3] %v1777_v29  ;;  %v3313_v43 = vld [vmem:[%s3890_s0 + $0x9] sm:$0x1]  ;;  %v3314_v44 = vld [vmem:[%s3890_s0 + $0x8] sm:$0x1]  ;;  %v1889_v45 = vunpack.c.l.bf16 %v3312_v42 }
  0x4e   :  { %1796 = vst [vmem:[#allocation1 + $0x80] sm:$0x3] %v1793_v33  ;;  %1812 = vst [vmem:[#allocation1 + $0x78] sm:$0x3] %v1809_v34  ;;  %v1905_v46 = vunpack.c.l.bf16 %v3313_v43  ;;  %v1921_v47 = vunpack.c.l.bf16 %v3314_v44  ;;  %v3315_v48 = vld [vmem:[%s3890_s0 + $0x7] sm:$0x1] }
  0x4f   :  { %1828 = vst [vmem:[#allocation1 + $0x70] sm:$0x3] %v1825_v35  ;;  %v3316_v49 = vld [vmem:[%s3890_s0 + $0x6] sm:$0x1]  ;;  %v3317_v50 = vld [vmem:[%s3890_s0 + $0x5] sm:$0x1]  ;;  %v1937_v51 = vunpack.c.l.bf16 %v3315_v48 }
  0x50   :  { %1844 = vst [vmem:[#allocation1 + $0x68] sm:$0x3] %v1841_v39  ;;  %1860 = vst [vmem:[#allocation1 + $0x60] sm:$0x3] %v1857_v40  ;;  %v1953_v52 = vunpack.c.l.bf16 %v3316_v49  ;;  %v1969_v53 = vunpack.c.l.bf16 %v3317_v50  ;;  %v3318_v54 = vld [vmem:[%s3890_s0 + $0x4] sm:$0x1] }
  0x51   :  { %1876 = vst [vmem:[#allocation1 + $0x58] sm:$0x3] %v1873_v41  ;;  %v3319_v55 = vld [vmem:[%s3890_s0 + $0x3] sm:$0x1]  ;;  %v3320_v56 = vld [vmem:[%s3890_s0 + $0x2] sm:$0x1]  ;;  %v1985_v57 = vunpack.c.l.bf16 %v3318_v54 }
  0x52   :  { %1892 = vst [vmem:[#allocation1 + $0x50] sm:$0x3] %v1889_v45  ;;  %1908 = vst [vmem:[#allocation1 + $0x48] sm:$0x3] %v1905_v46  ;;  %v2001_v58 = vunpack.c.l.bf16 %v3319_v55  ;;  %v2017_v59 = vunpack.c.l.bf16 %v3320_v56  ;;  %v3321_v60 = vld [vmem:[%s3890_s0 + $0x1] sm:$0x1] }
  0x53   :  { %1924 = vst [vmem:[#allocation1 + $0x40] sm:$0x3] %v1921_v47  ;;  %v2045_v61 = vld [vmem:[%s3890_s0] sm:$0x1]  ;;  %v2222_v62 = vld [vmem:[#allocation1 + $0xe8] sm:$0x3]   ;;  %v2032_v63 = vunpack.c.l.bf16 %v3321_v60 }
  0x54   :  { %1940 = vst [vmem:[#allocation1 + $0x38] sm:$0x3] %v1937_v51  ;;  %1956 = vst [vmem:[#allocation1 + $0x30] sm:$0x3] %v1953_v52  ;;  %v2046_v0 = vunpack.c.l.bf16 %v2045_v61  ;;  %v2204_v1 = vld [vmem:[#allocation1 + $0xd0] sm:$0x3]  }
  0x55   :  { %1972 = vst [vmem:[#allocation1 + $0x28] sm:$0x3] %v1969_v53  ;;  %v2210_v2 = vld [vmem:[#allocation1 + $0xd8] sm:$0x3]   ;;  %v2216_v3 = vld [vmem:[#allocation1 + $0xe0] sm:$0x3]  }
  0x56   :  { %2224 = vst [vmem:[#allocation0 + $0x1e] sm:$0x1] %v2222_v62   ;;  %2226 = vst [vmem:[#allocation0 + $0x9d] sm:$0x2] %v2222_v62   ;;  %v2186_v4 = vld [vmem:[#allocation1 + $0xb8] sm:$0x3]  }
  0x57   :  { %1988 = vst [vmem:[#allocation1 + $0x20] sm:$0x3] %v1985_v57  ;;  %2004 = vst [vmem:[#allocation1 + $0x18] sm:$0x3] %v2001_v58  ;;  %v2192_v5 = vld [vmem:[#allocation1 + $0xc0] sm:$0x3]  }
  0x58   :  { %2020 = vst [vmem:[#allocation1 + $0x10] sm:$0x3] %v2017_v59  ;;  %v2198_v6 = vld [vmem:[#allocation1 + $0xc8] sm:$0x3]   ;;  %2206 = vst [vmem:[#allocation0 + $0x15] sm:$0x1] %v2204_v1  }
  0x59   :  { %2208 = vst [vmem:[#allocation0 + $0x94] sm:$0x2] %v2204_v1   ;;  %2212 = vst [vmem:[#allocation0 + $0x1d] sm:$0x1] %v2210_v2   ;;  %v2168_v7 = vld [vmem:[#allocation1 + $0xa0] sm:$0x3]  }
  0x5a   :  { %2214 = vst [vmem:[#allocation0 + $0x9c] sm:$0x2] %v2210_v2   ;;  %2218 = vst [vmem:[#allocation0 + $0x16] sm:$0x1] %v2216_v3   ;;  %v2174_v8 = vld [vmem:[#allocation1 + $0xa8] sm:$0x3]  }
  0x5b   :  { %2220 = vst [vmem:[#allocation0 + $0x95] sm:$0x2] %v2216_v3   ;;  %2035 = vst [vmem:[#allocation1 + $0x8] sm:$0x3] %v2032_v63  ;;  %v2180_v9 = vld [vmem:[#allocation1 + $0xb0] sm:$0x3]  }
  0x5c   :  { %2048 = vst [vmem:[#allocation1] sm:$0x3] %v2046_v0  ;;  %2188 = vst [vmem:[#allocation0 + $0x1b] sm:$0x1] %v2186_v4   ;;  %v2150_v10 = vld [vmem:[#allocation1 + $0x88] sm:$0x3]  }
  0x5d   :  { %2190 = vst [vmem:[#allocation0 + $0x9a] sm:$0x2] %v2186_v4   ;;  %2194 = vst [vmem:[#allocation0 + $0x14] sm:$0x1] %v2192_v5   ;;  %v2156_v11 = vld [vmem:[#allocation1 + $0x90] sm:$0x3]  }
  0x5e   :  { %2196 = vst [vmem:[#allocation0 + $0x93] sm:$0x2] %v2192_v5   ;;  %2200 = vst [vmem:[#allocation0 + $0x1c] sm:$0x1] %v2198_v6   ;;  %v2162_v12 = vld [vmem:[#allocation1 + $0x98] sm:$0x3]  }
  0x5f   :  { %2202 = vst [vmem:[#allocation0 + $0x9b] sm:$0x2] %v2198_v6   ;;  %2170 = vst [vmem:[#allocation0 + $0x12] sm:$0x1] %v2168_v7   ;;  %v2132_v13 = vld [vmem:[#allocation1 + $0x70] sm:$0x3]  }
  0x60   :  { %2172 = vst [vmem:[#allocation0 + $0x91] sm:$0x2] %v2168_v7   ;;  %2176 = vst [vmem:[#allocation0 + $0x1a] sm:$0x1] %v2174_v8   ;;  %v2138_v14 = vld [vmem:[#allocation1 + $0x78] sm:$0x3]  }
  0x61   :  { %2178 = vst [vmem:[#allocation0 + $0x99] sm:$0x2] %v2174_v8   ;;  %2182 = vst [vmem:[#allocation0 + $0x13] sm:$0x1] %v2180_v9   ;;  %v2144_v15 = vld [vmem:[#allocation1 + $0x80] sm:$0x3]  }
  0x62   :  { %2184 = vst [vmem:[#allocation0 + $0x92] sm:$0x2] %v2180_v9   ;;  %2152 = vst [vmem:[#allocation0 + $0x18] sm:$0x1] %v2150_v10   ;;  %v2114_v16 = vld [vmem:[#allocation1 + $0x58] sm:$0x3]  }
  0x63   :  { %2154 = vst [vmem:[#allocation0 + $0x97] sm:$0x2] %v2150_v10   ;;  %2158 = vst [vmem:[#allocation0 + $0x11] sm:$0x1] %v2156_v11   ;;  %v2120_v17 = vld [vmem:[#allocation1 + $0x60] sm:$0x3]  }
  0x64   :  { %2160 = vst [vmem:[#allocation0 + $0x90] sm:$0x2] %v2156_v11   ;;  %2164 = vst [vmem:[#allocation0 + $0x19] sm:$0x1] %v2162_v12   ;;  %v2126_v18 = vld [vmem:[#allocation1 + $0x68] sm:$0x3]  }
  0x65   :  { %2166 = vst [vmem:[#allocation0 + $0x98] sm:$0x2] %v2162_v12   ;;  %2134 = vst [vmem:[#allocation0 + $0x7] sm:$0x1] %v2132_v13   ;;  %v2096_v19 = vld [vmem:[#allocation1 + $0x40] sm:$0x3]  }
  0x66   :  { %2136 = vst [vmem:[#allocation0 + $0x86] sm:$0x2] %v2132_v13   ;;  %2140 = vst [vmem:[#allocation0 + $0xf] sm:$0x1] %v2138_v14   ;;  %v2102_v20 = vld [vmem:[#allocation1 + $0x48] sm:$0x3]  }
  0x67   :  { %2142 = vst [vmem:[#allocation0 + $0x8e] sm:$0x2] %v2138_v14   ;;  %2146 = vst [vmem:[#allocation0 + $0x10] sm:$0x1] %v2144_v15   ;;  %v2108_v21 = vld [vmem:[#allocation1 + $0x50] sm:$0x3]  }
  0x68   :  { %2148 = vst [vmem:[#allocation0 + $0x8f] sm:$0x2] %v2144_v15   ;;  %2116 = vst [vmem:[#allocation0 + $0xd] sm:$0x1] %v2114_v16   ;;  %v2078_v22 = vld [vmem:[#allocation1 + $0x28] sm:$0x3]  }
  0x69   :  { %2118 = vst [vmem:[#allocation0 + $0x8c] sm:$0x2] %v2114_v16   ;;  %2122 = vst [vmem:[#allocation0 + $0x6] sm:$0x1] %v2120_v17   ;;  %v2084_v23 = vld [vmem:[#allocation1 + $0x30] sm:$0x3]  }
  0x6a   :  { %2124 = vst [vmem:[#allocation0 + $0x85] sm:$0x2] %v2120_v17   ;;  %2128 = vst [vmem:[#allocation0 + $0xe] sm:$0x1] %v2126_v18   ;;  %v2090_v24 = vld [vmem:[#allocation1 + $0x38] sm:$0x3]  }
  0x6b   :  { %2130 = vst [vmem:[#allocation0 + $0x8d] sm:$0x2] %v2126_v18   ;;  %2098 = vst [vmem:[#allocation0 + $0x4] sm:$0x1] %v2096_v19   ;;  %v2060_v25 = vld [vmem:[#allocation1 + $0x10] sm:$0x3]  }
  0x6c   :  { %2100 = vst [vmem:[#allocation0 + $0x83] sm:$0x2] %v2096_v19   ;;  %2104 = vst [vmem:[#allocation0 + $0xc] sm:$0x1] %v2102_v20   ;;  %v2066_v26 = vld [vmem:[#allocation1 + $0x18] sm:$0x3]  }
  0x6d   :  { %2106 = vst [vmem:[#allocation0 + $0x8b] sm:$0x2] %v2102_v20   ;;  %2110 = vst [vmem:[#allocation0 + $0x5] sm:$0x1] %v2108_v21   ;;  %v2072_v27 = vld [vmem:[#allocation1 + $0x20] sm:$0x3]  }
  0x6e   :  { %2112 = vst [vmem:[#allocation0 + $0x84] sm:$0x2] %v2108_v21   ;;  %2080 = vst [vmem:[#allocation0 + $0xa] sm:$0x1] %v2078_v22   ;;  %v2049_v28 = vld [vmem:[#allocation1] sm:$0x3]  }
  0x6f   :  { %2082 = vst [vmem:[#allocation0 + $0x89] sm:$0x2] %v2078_v22   ;;  %2086 = vst [vmem:[#allocation0 + $0x3] sm:$0x1] %v2084_v23   ;;  %v2054_v29 = vld [vmem:[#allocation1 + $0x8] sm:$0x3]  }
  0x70   :  { %2088 = vst [vmem:[#allocation0 + $0x82] sm:$0x2] %v2084_v23   ;;  %2092 = vst [vmem:[#allocation0 + $0xb] sm:$0x1] %v2090_v24   ;;  %v2228_v30 = vld [vmem:[#allocation1 + $0xf0] sm:$0x3]  }
  0x71   :  { %2094 = vst [vmem:[#allocation0 + $0x8a] sm:$0x2] %v2090_v24   ;;  %2062 = vst [vmem:[#allocation0 + $0x1] sm:$0x1] %v2060_v25   ;;  %v2234_v31 = vld [vmem:[#allocation1 + $0xf8] sm:$0x3]  }
  0x72   :  { %2064 = vst [vmem:[#allocation0 + $0x80] sm:$0x2] %v2060_v25   ;;  %2068 = vst [vmem:[#allocation0 + $0x9] sm:$0x1] %v2066_v26   ;;  %v2240_v32 = vld [vmem:[#allocation1 + $0x100] sm:$0x3]  }
  0x73   :  { %2070 = vst [vmem:[#allocation0 + $0x88] sm:$0x2] %v2066_v26   ;;  %2074 = vst [vmem:[#allocation0 + $0x2] sm:$0x1] %v2072_v27   ;;  %v2246_v33 = vld [vmem:[#allocation1 + $0x108] sm:$0x3]  }
  0x74   :  { %2076 = vst [vmem:[#allocation0 + $0x81] sm:$0x2] %v2072_v27   ;;  %2050 = vst [vmem:[#allocation0] sm:$0x1] %v2049_v28   ;;  %v2252_v34 = vld [vmem:[#allocation1 + $0x110] sm:$0x3]  }
  0x75   :  { %2052 = vst [vmem:[#allocation0 + $0x7f] sm:$0x2] %v2049_v28   ;;  %2056 = vst [vmem:[#allocation0 + $0x8] sm:$0x1] %v2054_v29   ;;  %v2258_v35 = vld [vmem:[#allocation1 + $0x118] sm:$0x3]  }
  0x76   :  { %2058 = vst [vmem:[#allocation0 + $0x87] sm:$0x2] %v2054_v29   ;;  %2230 = vst [vmem:[#allocation0 + $0x17] sm:$0x1] %v2228_v30   ;;  %v2264_v36 = vld [vmem:[#allocation1 + $0x120] sm:$0x3]  }
  0x77   :  { %2232 = vst [vmem:[#allocation0 + $0x96] sm:$0x2] %v2228_v30   ;;  %2236 = vst [vmem:[#allocation0 + $0x1f] sm:$0x1] %v2234_v31   ;;  %v2270_v37 = vld [vmem:[#allocation1 + $0x128] sm:$0x3]  }
  0x78   :  { %2238 = vst [vmem:[#allocation0 + $0x9e] sm:$0x2] %v2234_v31   ;;  %2242 = vst [vmem:[#allocation0 + $0x20] sm:$0x1] %v2240_v32   ;;  %v2276_v38 = vld [vmem:[#allocation1 + $0x130] sm:$0x3]  }
  0x79   :  { %2244 = vst [vmem:[#allocation0 + $0x9f] sm:$0x2] %v2240_v32   ;;  %2248 = vst [vmem:[#allocation0 + $0x28] sm:$0x1] %v2246_v33   ;;  %v2282_v39 = vld [vmem:[#allocation1 + $0x138] sm:$0x3]  }
  0x7a   :  { %2250 = vst [vmem:[#allocation0 + $0xa7] sm:$0x2] %v2246_v33   ;;  %2254 = vst [vmem:[#allocation0 + $0x21] sm:$0x1] %v2252_v34   ;;  %v2288_v40 = vld [vmem:[#allocation1 + $0x140] sm:$0x3]  }
  0x7b   :  { %2256 = vst [vmem:[#allocation0 + $0xa0] sm:$0x2] %v2252_v34   ;;  %2260 = vst [vmem:[#allocation0 + $0x29] sm:$0x1] %v2258_v35   ;;  %v2294_v41 = vld [vmem:[#allocation1 + $0x148] sm:$0x3]  }
  0x7c   :  { %2262 = vst [vmem:[#allocation0 + $0xa8] sm:$0x2] %v2258_v35   ;;  %2266 = vst [vmem:[#allocation0 + $0x22] sm:$0x1] %v2264_v36   ;;  %v2300_v42 = vld [vmem:[#allocation1 + $0x150] sm:$0x3]  }
  0x7d   :  { %2268 = vst [vmem:[#allocation0 + $0xa1] sm:$0x2] %v2264_v36   ;;  %2272 = vst [vmem:[#allocation0 + $0x2a] sm:$0x1] %v2270_v37   ;;  %v2306_v43 = vld [vmem:[#allocation1 + $0x158] sm:$0x3]  }
  0x7e   :  { %2274 = vst [vmem:[#allocation0 + $0xa9] sm:$0x2] %v2270_v37   ;;  %2278 = vst [vmem:[#allocation0 + $0x23] sm:$0x1] %v2276_v38   ;;  %v2312_v44 = vld [vmem:[#allocation1 + $0x160] sm:$0x3]  }
  0x7f   :  { %2280 = vst [vmem:[#allocation0 + $0xa2] sm:$0x2] %v2276_v38   ;;  %2284 = vst [vmem:[#allocation0 + $0x2b] sm:$0x1] %v2282_v39   ;;  %v2318_v45 = vld [vmem:[#allocation1 + $0x168] sm:$0x3]  }
  0x80   :  { %2286 = vst [vmem:[#allocation0 + $0xaa] sm:$0x2] %v2282_v39   ;;  %2290 = vst [vmem:[#allocation0 + $0x24] sm:$0x1] %v2288_v40   ;;  %v2324_v46 = vld [vmem:[#allocation1 + $0x170] sm:$0x3]  }
  0x81   :  { %2292 = vst [vmem:[#allocation0 + $0xa3] sm:$0x2] %v2288_v40   ;;  %2296 = vst [vmem:[#allocation0 + $0x2c] sm:$0x1] %v2294_v41   ;;  %v2330_v47 = vld [vmem:[#allocation1 + $0x178] sm:$0x3]  }
  0x82   :  { %2298 = vst [vmem:[#allocation0 + $0xab] sm:$0x2] %v2294_v41   ;;  %2302 = vst [vmem:[#allocation0 + $0x25] sm:$0x1] %v2300_v42   ;;  %v2336_v48 = vld [vmem:[#allocation1 + $0x180] sm:$0x3]  }
  0x83   :  { %2304 = vst [vmem:[#allocation0 + $0xa4] sm:$0x2] %v2300_v42   ;;  %2308 = vst [vmem:[#allocation0 + $0x2d] sm:$0x1] %v2306_v43   ;;  %v2342_v49 = vld [vmem:[#allocation1 + $0x188] sm:$0x3]  }
  0x84   :  { %2310 = vst [vmem:[#allocation0 + $0xac] sm:$0x2] %v2306_v43   ;;  %2314 = vst [vmem:[#allocation0 + $0x26] sm:$0x1] %v2312_v44   ;;  %v2348_v50 = vld [vmem:[#allocation1 + $0x190] sm:$0x3]  }
  0x85   :  { %2316 = vst [vmem:[#allocation0 + $0xa5] sm:$0x2] %v2312_v44   ;;  %2320 = vst [vmem:[#allocation0 + $0x2e] sm:$0x1] %v2318_v45   ;;  %v2354_v51 = vld [vmem:[#allocation1 + $0x198] sm:$0x3]  }
  0x86   :  { %2322 = vst [vmem:[#allocation0 + $0xad] sm:$0x2] %v2318_v45   ;;  %2326 = vst [vmem:[#allocation0 + $0x27] sm:$0x1] %v2324_v46   ;;  %v2360_v52 = vld [vmem:[#allocation1 + $0x1a0] sm:$0x3]  }
  0x87   :  { %2328 = vst [vmem:[#allocation0 + $0xa6] sm:$0x2] %v2324_v46   ;;  %2332 = vst [vmem:[#allocation0 + $0x2f] sm:$0x1] %v2330_v47   ;;  %v2366_v53 = vld [vmem:[#allocation1 + $0x1a8] sm:$0x3]  }
  0x88   :  { %2334 = vst [vmem:[#allocation0 + $0xae] sm:$0x2] %v2330_v47   ;;  %2338 = vst [vmem:[#allocation0 + $0x30] sm:$0x1] %v2336_v48   ;;  %v2372_v54 = vld [vmem:[#allocation1 + $0x1b0] sm:$0x3]  }
  0x89   :  { %2340 = vst [vmem:[#allocation0 + $0xaf] sm:$0x2] %v2336_v48   ;;  %2344 = vst [vmem:[#allocation0 + $0x38] sm:$0x1] %v2342_v49   ;;  %v2378_v55 = vld [vmem:[#allocation1 + $0x1b8] sm:$0x3]  }
  0x8a   :  { %2346 = vst [vmem:[#allocation0 + $0xb7] sm:$0x2] %v2342_v49   ;;  %2350 = vst [vmem:[#allocation0 + $0x31] sm:$0x1] %v2348_v50   ;;  %v2384_v56 = vld [vmem:[#allocation1 + $0x1c0] sm:$0x3]  }
  0x8b   :  { %2352 = vst [vmem:[#allocation0 + $0xb0] sm:$0x2] %v2348_v50   ;;  %2356 = vst [vmem:[#allocation0 + $0x39] sm:$0x1] %v2354_v51   ;;  %v2390_v57 = vld [vmem:[#allocation1 + $0x1c8] sm:$0x3]  }
  0x8c   :  { %2358 = vst [vmem:[#allocation0 + $0xb8] sm:$0x2] %v2354_v51   ;;  %2362 = vst [vmem:[#allocation0 + $0x32] sm:$0x1] %v2360_v52   ;;  %v2396_v58 = vld [vmem:[#allocation1 + $0x1d0] sm:$0x3]  }
  0x8d   :  { %2364 = vst [vmem:[#allocation0 + $0xb1] sm:$0x2] %v2360_v52   ;;  %2368 = vst [vmem:[#allocation0 + $0x3a] sm:$0x1] %v2366_v53   ;;  %v2402_v59 = vld [vmem:[#allocation1 + $0x1d8] sm:$0x3]  }
  0x8e   :  { %2370 = vst [vmem:[#allocation0 + $0xb9] sm:$0x2] %v2366_v53   ;;  %2374 = vst [vmem:[#allocation0 + $0x33] sm:$0x1] %v2372_v54   ;;  %v2408_v60 = vld [vmem:[#allocation1 + $0x1e0] sm:$0x3]  }
  0x8f   :  { %2376 = vst [vmem:[#allocation0 + $0xb2] sm:$0x2] %v2372_v54   ;;  %2380 = vst [vmem:[#allocation0 + $0x3b] sm:$0x1] %v2378_v55   ;;  %v2414_v61 = vld [vmem:[#allocation1 + $0x1e8] sm:$0x3]  }
  0x90   :  { %2382 = vst [vmem:[#allocation0 + $0xba] sm:$0x2] %v2378_v55   ;;  %2386 = vst [vmem:[#allocation0 + $0x34] sm:$0x1] %v2384_v56   ;;  %v2420_v62 = vld [vmem:[#allocation1 + $0x1f0] sm:$0x3]  }
  0x91   :  { %2388 = vst [vmem:[#allocation0 + $0xb3] sm:$0x2] %v2384_v56   ;;  %2392 = vst [vmem:[#allocation0 + $0x3c] sm:$0x1] %v2390_v57   ;;  %v2426_v63 = vld [vmem:[#allocation1 + $0x1f8] sm:$0x3]  }
  0x92   :  { %2394 = vst [vmem:[#allocation0 + $0xbb] sm:$0x2] %v2390_v57   ;;  %2398 = vst [vmem:[#allocation0 + $0x35] sm:$0x1] %v2396_v58   ;;  %v2432_v0 = vld [vmem:[#allocation1 + $0x200] sm:$0x3]  }
  0x93   :  { %2400 = vst [vmem:[#allocation0 + $0xb4] sm:$0x2] %v2396_v58   ;;  %2404 = vst [vmem:[#allocation0 + $0x3d] sm:$0x1] %v2402_v59   ;;  %v2438_v1 = vld [vmem:[#allocation1 + $0x208] sm:$0x3]  }
  0x94   :  { %2406 = vst [vmem:[#allocation0 + $0xbc] sm:$0x2] %v2402_v59   ;;  %2410 = vst [vmem:[#allocation0 + $0x36] sm:$0x1] %v2408_v60   ;;  %v2444_v2 = vld [vmem:[#allocation1 + $0x210] sm:$0x3]  }
  0x95   :  { %2412 = vst [vmem:[#allocation0 + $0xb5] sm:$0x2] %v2408_v60   ;;  %2416 = vst [vmem:[#allocation0 + $0x3e] sm:$0x1] %v2414_v61   ;;  %v2450_v3 = vld [vmem:[#allocation1 + $0x218] sm:$0x3]  }
  0x96   :  { %2418 = vst [vmem:[#allocation0 + $0xbd] sm:$0x2] %v2414_v61   ;;  %2422 = vst [vmem:[#allocation0 + $0x37] sm:$0x1] %v2420_v62   ;;  %v2456_v4 = vld [vmem:[#allocation1 + $0x220] sm:$0x3]  }
  0x97   :  { %2424 = vst [vmem:[#allocation0 + $0xb6] sm:$0x2] %v2420_v62   ;;  %2428 = vst [vmem:[#allocation0 + $0x3f] sm:$0x1] %v2426_v63   ;;  %v2462_v5 = vld [vmem:[#allocation1 + $0x228] sm:$0x3]  }
  0x98   :  { %2430 = vst [vmem:[#allocation0 + $0xbe] sm:$0x2] %v2426_v63   ;;  %2434 = vst [vmem:[#allocation0 + $0x40] sm:$0x1] %v2432_v0   ;;  %v2468_v6 = vld [vmem:[#allocation1 + $0x230] sm:$0x3]  }
  0x99   :  { %2436 = vst [vmem:[#allocation0 + $0xbf] sm:$0x2] %v2432_v0   ;;  %2440 = vst [vmem:[#allocation0 + $0x48] sm:$0x1] %v2438_v1   ;;  %v2474_v7 = vld [vmem:[#allocation1 + $0x238] sm:$0x3]  }
  0x9a   :  { %2442 = vst [vmem:[#allocation0 + $0xc7] sm:$0x2] %v2438_v1   ;;  %2446 = vst [vmem:[#allocation0 + $0x41] sm:$0x1] %v2444_v2   ;;  %v2480_v8 = vld [vmem:[#allocation1 + $0x240] sm:$0x3]  }
  0x9b   :  { %2448 = vst [vmem:[#allocation0 + $0xc0] sm:$0x2] %v2444_v2   ;;  %2452 = vst [vmem:[#allocation0 + $0x49] sm:$0x1] %v2450_v3   ;;  %v2486_v9 = vld [vmem:[#allocation1 + $0x248] sm:$0x3]  }
  0x9c   :  { %2454 = vst [vmem:[#allocation0 + $0xc8] sm:$0x2] %v2450_v3   ;;  %2458 = vst [vmem:[#allocation0 + $0x42] sm:$0x1] %v2456_v4   ;;  %v2492_v10 = vld [vmem:[#allocation1 + $0x250] sm:$0x3]  }
  0x9d   :  { %2460 = vst [vmem:[#allocation0 + $0xc1] sm:$0x2] %v2456_v4   ;;  %2464 = vst [vmem:[#allocation0 + $0x4a] sm:$0x1] %v2462_v5   ;;  %v2498_v11 = vld [vmem:[#allocation1 + $0x258] sm:$0x3]  }
  0x9e   :  { %2466 = vst [vmem:[#allocation0 + $0xc9] sm:$0x2] %v2462_v5   ;;  %2470 = vst [vmem:[#allocation0 + $0x43] sm:$0x1] %v2468_v6   ;;  %v2504_v12 = vld [vmem:[#allocation1 + $0x260] sm:$0x3]  }
  0x9f   :  { %2472 = vst [vmem:[#allocation0 + $0xc2] sm:$0x2] %v2468_v6   ;;  %2476 = vst [vmem:[#allocation0 + $0x4b] sm:$0x1] %v2474_v7   ;;  %v2510_v13 = vld [vmem:[#allocation1 + $0x268] sm:$0x3]  }
  0xa0   :  { %2478 = vst [vmem:[#allocation0 + $0xca] sm:$0x2] %v2474_v7   ;;  %2482 = vst [vmem:[#allocation0 + $0x44] sm:$0x1] %v2480_v8   ;;  %v2516_v14 = vld [vmem:[#allocation1 + $0x270] sm:$0x3]  }
  0xa1   :  { %2484 = vst [vmem:[#allocation0 + $0xc3] sm:$0x2] %v2480_v8   ;;  %2488 = vst [vmem:[#allocation0 + $0x4c] sm:$0x1] %v2486_v9   ;;  %v2522_v15 = vld [vmem:[#allocation1 + $0x278] sm:$0x3]  }
  0xa2   :  { %2490 = vst [vmem:[#allocation0 + $0xcb] sm:$0x2] %v2486_v9   ;;  %2494 = vst [vmem:[#allocation0 + $0x45] sm:$0x1] %v2492_v10   ;;  %v2528_v16 = vld [vmem:[#allocation1 + $0x280] sm:$0x3]  }
  0xa3   :  { %2496 = vst [vmem:[#allocation0 + $0xc4] sm:$0x2] %v2492_v10   ;;  %2500 = vst [vmem:[#allocation0 + $0x4d] sm:$0x1] %v2498_v11   ;;  %v2534_v17 = vld [vmem:[#allocation1 + $0x288] sm:$0x3]  }
  0xa4   :  { %2502 = vst [vmem:[#allocation0 + $0xcc] sm:$0x2] %v2498_v11   ;;  %2506 = vst [vmem:[#allocation0 + $0x46] sm:$0x1] %v2504_v12   ;;  %v2540_v18 = vld [vmem:[#allocation1 + $0x290] sm:$0x3]  }
  0xa5   :  { %2508 = vst [vmem:[#allocation0 + $0xc5] sm:$0x2] %v2504_v12   ;;  %2512 = vst [vmem:[#allocation0 + $0x4e] sm:$0x1] %v2510_v13   ;;  %v2546_v19 = vld [vmem:[#allocation1 + $0x298] sm:$0x3]  }
  0xa6   :  { %2514 = vst [vmem:[#allocation0 + $0xcd] sm:$0x2] %v2510_v13   ;;  %2518 = vst [vmem:[#allocation0 + $0x47] sm:$0x1] %v2516_v14   ;;  %v2552_v20 = vld [vmem:[#allocation1 + $0x2a0] sm:$0x3]  }
  0xa7   :  { %2520 = vst [vmem:[#allocation0 + $0xc6] sm:$0x2] %v2516_v14   ;;  %2524 = vst [vmem:[#allocation0 + $0x4f] sm:$0x1] %v2522_v15   ;;  %v2558_v21 = vld [vmem:[#allocation1 + $0x2a8] sm:$0x3]  }
  0xa8   :  { %2526 = vst [vmem:[#allocation0 + $0xce] sm:$0x2] %v2522_v15   ;;  %2530 = vst [vmem:[#allocation0 + $0x50] sm:$0x1] %v2528_v16   ;;  %v2564_v22 = vld [vmem:[#allocation1 + $0x2b0] sm:$0x3]  }
  0xa9   :  { %2532 = vst [vmem:[#allocation0 + $0xcf] sm:$0x2] %v2528_v16   ;;  %2536 = vst [vmem:[#allocation0 + $0x58] sm:$0x1] %v2534_v17   ;;  %v2570_v23 = vld [vmem:[#allocation1 + $0x2b8] sm:$0x3]  }
  0xaa   :  { %2538 = vst [vmem:[#allocation0 + $0xd7] sm:$0x2] %v2534_v17   ;;  %2542 = vst [vmem:[#allocation0 + $0x51] sm:$0x1] %v2540_v18   ;;  %v2576_v24 = vld [vmem:[#allocation1 + $0x2c0] sm:$0x3]  }
  0xab   :  { %2544 = vst [vmem:[#allocation0 + $0xd0] sm:$0x2] %v2540_v18   ;;  %2548 = vst [vmem:[#allocation0 + $0x59] sm:$0x1] %v2546_v19   ;;  %v2582_v25 = vld [vmem:[#allocation1 + $0x2c8] sm:$0x3]  }
  0xac   :  { %2550 = vst [vmem:[#allocation0 + $0xd8] sm:$0x2] %v2546_v19   ;;  %2554 = vst [vmem:[#allocation0 + $0x52] sm:$0x1] %v2552_v20   ;;  %v2588_v26 = vld [vmem:[#allocation1 + $0x2d0] sm:$0x3]  }
  0xad   :  { %2556 = vst [vmem:[#allocation0 + $0xd1] sm:$0x2] %v2552_v20   ;;  %2560 = vst [vmem:[#allocation0 + $0x5a] sm:$0x1] %v2558_v21   ;;  %v2594_v27 = vld [vmem:[#allocation1 + $0x2d8] sm:$0x3]  }
  0xae   :  { %2562 = vst [vmem:[#allocation0 + $0xd9] sm:$0x2] %v2558_v21   ;;  %2566 = vst [vmem:[#allocation0 + $0x53] sm:$0x1] %v2564_v22   ;;  %v2600_v28 = vld [vmem:[#allocation1 + $0x2e0] sm:$0x3]  }
  0xaf   :  { %2568 = vst [vmem:[#allocation0 + $0xd2] sm:$0x2] %v2564_v22   ;;  %2572 = vst [vmem:[#allocation0 + $0x5b] sm:$0x1] %v2570_v23   ;;  %v2606_v29 = vld [vmem:[#allocation1 + $0x2e8] sm:$0x3]  }
  0xb0   :  { %2574 = vst [vmem:[#allocation0 + $0xda] sm:$0x2] %v2570_v23   ;;  %2578 = vst [vmem:[#allocation0 + $0x54] sm:$0x1] %v2576_v24   ;;  %v2612_v30 = vld [vmem:[#allocation1 + $0x2f0] sm:$0x3]  }
  0xb1   :  { %2580 = vst [vmem:[#allocation0 + $0xd3] sm:$0x2] %v2576_v24   ;;  %2584 = vst [vmem:[#allocation0 + $0x5c] sm:$0x1] %v2582_v25   ;;  %v2618_v31 = vld [vmem:[#allocation1 + $0x2f8] sm:$0x3]  }
  0xb2   :  { %2586 = vst [vmem:[#allocation0 + $0xdb] sm:$0x2] %v2582_v25   ;;  %2590 = vst [vmem:[#allocation0 + $0x55] sm:$0x1] %v2588_v26   ;;  %v2624_v32 = vld [vmem:[#allocation1 + $0x300] sm:$0x3]  }
  0xb3   :  { %2592 = vst [vmem:[#allocation0 + $0xd4] sm:$0x2] %v2588_v26   ;;  %2596 = vst [vmem:[#allocation0 + $0x5d] sm:$0x1] %v2594_v27   ;;  %v2630_v33 = vld [vmem:[#allocation1 + $0x308] sm:$0x3]  }
  0xb4   :  { %2598 = vst [vmem:[#allocation0 + $0xdc] sm:$0x2] %v2594_v27   ;;  %2602 = vst [vmem:[#allocation0 + $0x56] sm:$0x1] %v2600_v28   ;;  %v2636_v34 = vld [vmem:[#allocation1 + $0x310] sm:$0x3]  }
  0xb5   :  { %2604 = vst [vmem:[#allocation0 + $0xd5] sm:$0x2] %v2600_v28   ;;  %2608 = vst [vmem:[#allocation0 + $0x5e] sm:$0x1] %v2606_v29   ;;  %v2642_v35 = vld [vmem:[#allocation1 + $0x318] sm:$0x3]  }
  0xb6   :  { %2610 = vst [vmem:[#allocation0 + $0xdd] sm:$0x2] %v2606_v29   ;;  %2614 = vst [vmem:[#allocation0 + $0x57] sm:$0x1] %v2612_v30   ;;  %v2648_v36 = vld [vmem:[#allocation1 + $0x320] sm:$0x3]  }
  0xb7   :  { %2616 = vst [vmem:[#allocation0 + $0xd6] sm:$0x2] %v2612_v30   ;;  %2620 = vst [vmem:[#allocation0 + $0x5f] sm:$0x1] %v2618_v31   ;;  %v2654_v37 = vld [vmem:[#allocation1 + $0x328] sm:$0x3]  }
  0xb8   :  { %2622 = vst [vmem:[#allocation0 + $0xde] sm:$0x2] %v2618_v31   ;;  %2626 = vst [vmem:[#allocation0 + $0x60] sm:$0x1] %v2624_v32   ;;  %v2660_v38 = vld [vmem:[#allocation1 + $0x330] sm:$0x3]  }
  0xb9   :  { %2628 = vst [vmem:[#allocation0 + $0xdf] sm:$0x2] %v2624_v32   ;;  %2632 = vst [vmem:[#allocation0 + $0x68] sm:$0x1] %v2630_v33   ;;  %v2666_v39 = vld [vmem:[#allocation1 + $0x338] sm:$0x3]  }
  0xba   :  { %2634 = vst [vmem:[#allocation0 + $0xe7] sm:$0x2] %v2630_v33   ;;  %2638 = vst [vmem:[#allocation0 + $0x61] sm:$0x1] %v2636_v34   ;;  %v2672_v40 = vld [vmem:[#allocation1 + $0x340] sm:$0x3]  }
  0xbb   :  { %2640 = vst [vmem:[#allocation0 + $0xe0] sm:$0x2] %v2636_v34   ;;  %2644 = vst [vmem:[#allocation0 + $0x69] sm:$0x1] %v2642_v35   ;;  %v2678_v41 = vld [vmem:[#allocation1 + $0x348] sm:$0x3]  }
  0xbc   :  { %2646 = vst [vmem:[#allocation0 + $0xe8] sm:$0x2] %v2642_v35   ;;  %2650 = vst [vmem:[#allocation0 + $0x62] sm:$0x1] %v2648_v36   ;;  %v2684_v42 = vld [vmem:[#allocation1 + $0x350] sm:$0x3]  }
  0xbd   :  { %2652 = vst [vmem:[#allocation0 + $0xe1] sm:$0x2] %v2648_v36   ;;  %2656 = vst [vmem:[#allocation0 + $0x6a] sm:$0x1] %v2654_v37   ;;  %v2690_v43 = vld [vmem:[#allocation1 + $0x358] sm:$0x3]  }
  0xbe   :  { %2658 = vst [vmem:[#allocation0 + $0xe9] sm:$0x2] %v2654_v37   ;;  %2662 = vst [vmem:[#allocation0 + $0x63] sm:$0x1] %v2660_v38   ;;  %v2696_v44 = vld [vmem:[#allocation1 + $0x360] sm:$0x3]  }
  0xbf   :  { %2664 = vst [vmem:[#allocation0 + $0xe2] sm:$0x2] %v2660_v38   ;;  %2668 = vst [vmem:[#allocation0 + $0x6b] sm:$0x1] %v2666_v39   ;;  %v2702_v45 = vld [vmem:[#allocation1 + $0x368] sm:$0x3]  }
  0xc0   :  { %2670 = vst [vmem:[#allocation0 + $0xea] sm:$0x2] %v2666_v39   ;;  %2674 = vst [vmem:[#allocation0 + $0x64] sm:$0x1] %v2672_v40   ;;  %v2708_v46 = vld [vmem:[#allocation1 + $0x370] sm:$0x3]  }
  0xc1   :  { %2676 = vst [vmem:[#allocation0 + $0xe3] sm:$0x2] %v2672_v40   ;;  %2680 = vst [vmem:[#allocation0 + $0x6c] sm:$0x1] %v2678_v41   ;;  %v2714_v47 = vld [vmem:[#allocation1 + $0x378] sm:$0x3]  }
  0xc2   :  { %2682 = vst [vmem:[#allocation0 + $0xeb] sm:$0x2] %v2678_v41   ;;  %2686 = vst [vmem:[#allocation0 + $0x65] sm:$0x1] %v2684_v42   ;;  %v2720_v48 = vld [vmem:[#allocation1 + $0x380] sm:$0x3]  }
  0xc3   :  { %2688 = vst [vmem:[#allocation0 + $0xe4] sm:$0x2] %v2684_v42   ;;  %2692 = vst [vmem:[#allocation0 + $0x6d] sm:$0x1] %v2690_v43   ;;  %v2726_v49 = vld [vmem:[#allocation1 + $0x388] sm:$0x3]  }
  0xc4   :  { %2694 = vst [vmem:[#allocation0 + $0xec] sm:$0x2] %v2690_v43   ;;  %2698 = vst [vmem:[#allocation0 + $0x66] sm:$0x1] %v2696_v44   ;;  %v2732_v50 = vld [vmem:[#allocation1 + $0x390] sm:$0x3]  }
  0xc5   :  { %2700 = vst [vmem:[#allocation0 + $0xe5] sm:$0x2] %v2696_v44   ;;  %2704 = vst [vmem:[#allocation0 + $0x6e] sm:$0x1] %v2702_v45   ;;  %v2738_v51 = vld [vmem:[#allocation1 + $0x398] sm:$0x3]  }
  0xc6   :  { %2706 = vst [vmem:[#allocation0 + $0xed] sm:$0x2] %v2702_v45   ;;  %2710 = vst [vmem:[#allocation0 + $0x67] sm:$0x1] %v2708_v46   ;;  %v2744_v52 = vld [vmem:[#allocation1 + $0x3a0] sm:$0x3]  }
  0xc7   :  { %2712 = vst [vmem:[#allocation0 + $0xe6] sm:$0x2] %v2708_v46   ;;  %2716 = vst [vmem:[#allocation0 + $0x6f] sm:$0x1] %v2714_v47   ;;  %v2750_v53 = vld [vmem:[#allocation1 + $0x3a8] sm:$0x3]  }
  0xc8   :  { %2718 = vst [vmem:[#allocation0 + $0xee] sm:$0x2] %v2714_v47   ;;  %2722 = vst [vmem:[#allocation0 + $0x70] sm:$0x1] %v2720_v48   ;;  %v2756_v54 = vld [vmem:[#allocation1 + $0x3b0] sm:$0x3]  }
  0xc9   :  { %2724 = vst [vmem:[#allocation0 + $0xef] sm:$0x2] %v2720_v48   ;;  %2728 = vst [vmem:[#allocation0 + $0x78] sm:$0x1] %v2726_v49   ;;  %v2762_v55 = vld [vmem:[#allocation1 + $0x3b8] sm:$0x3]  }
  0xca   :  { %2730 = vst [vmem:[#allocation0 + $0xf7] sm:$0x2] %v2726_v49   ;;  %2734 = vst [vmem:[#allocation0 + $0x71] sm:$0x1] %v2732_v50   ;;  %v2768_v56 = vld [vmem:[#allocation1 + $0x3c0] sm:$0x3]  }
  0xcb   :  { %2736 = vst [vmem:[#allocation0 + $0xf0] sm:$0x2] %v2732_v50   ;;  %2740 = vst [vmem:[#allocation0 + $0x79] sm:$0x1] %v2738_v51   ;;  %v2774_v57 = vld [vmem:[#allocation1 + $0x3c8] sm:$0x3]  }
  0xcc   :  { %2742 = vst [vmem:[#allocation0 + $0xf8] sm:$0x2] %v2738_v51   ;;  %2746 = vst [vmem:[#allocation0 + $0x72] sm:$0x1] %v2744_v52   ;;  %v2780_v58 = vld [vmem:[#allocation1 + $0x3d0] sm:$0x3]  }
  0xcd   :  { %2748 = vst [vmem:[#allocation0 + $0xf1] sm:$0x2] %v2744_v52   ;;  %2752 = vst [vmem:[#allocation0 + $0x7a] sm:$0x1] %v2750_v53   ;;  %v2786_v59 = vld [vmem:[#allocation1 + $0x3d8] sm:$0x3]  }
  0xce   :  { %2754 = vst [vmem:[#allocation0 + $0xf9] sm:$0x2] %v2750_v53   ;;  %2758 = vst [vmem:[#allocation0 + $0x73] sm:$0x1] %v2756_v54   ;;  %v2792_v60 = vld [vmem:[#allocation1 + $0x3e0] sm:$0x3]  }
  0xcf   :  { %2760 = vst [vmem:[#allocation0 + $0xf2] sm:$0x2] %v2756_v54   ;;  %2764 = vst [vmem:[#allocation0 + $0x7b] sm:$0x1] %v2762_v55   ;;  %v2798_v61 = vld [vmem:[#allocation1 + $0x3e8] sm:$0x3]  }
  0xd0   :  { %2766 = vst [vmem:[#allocation0 + $0xfa] sm:$0x2] %v2762_v55   ;;  %2770 = vst [vmem:[#allocation0 + $0x74] sm:$0x1] %v2768_v56   ;;  %v2804_v62 = vld [vmem:[#allocation1 + $0x3f0] sm:$0x3]  }
  0xd1   :  { %2772 = vst [vmem:[#allocation0 + $0xf3] sm:$0x2] %v2768_v56   ;;  %2776 = vst [vmem:[#allocation0 + $0x7c] sm:$0x1] %v2774_v57   ;;  %v2810_v63 = vld [vmem:[#allocation1 + $0x3f8] sm:$0x3]  }
  0xd2   :  { %2778 = vst [vmem:[#allocation0 + $0xfb] sm:$0x2] %v2774_v57   ;;  %2782 = vst [vmem:[#allocation0 + $0x75] sm:$0x1] %v2780_v58   ;;  %v2819_v0 = vld [vmem:[#allocation0] sm:$0xff]  ;;  %v2824_v1 = vld [vmem:[#allocation0 + $0x8] sm:$0xff] }
  0xd3   :  { %2784 = vst [vmem:[#allocation0 + $0xf4] sm:$0x2] %v2780_v58   ;;  %2788 = vst [vmem:[#allocation0 + $0x7d] sm:$0x1] %v2786_v59   ;;  %v3356_v2 = vpack.c.bf16 %v2824_v1, %v2819_v0  ;;  %v2830_v3 = vld [vmem:[#allocation0 + $0x10] sm:$0xff]  ;;  %v2837_v4 = vld [vmem:[#allocation0 + $0x18] sm:$0xff] }
  0xd4   :  { %2790 = vst [vmem:[#allocation0 + $0xfc] sm:$0x2] %v2786_v59   ;;  %2794 = vst [vmem:[#allocation0 + $0x76] sm:$0x1] %v2792_v60   ;;  %v2844_v5 = vld [vmem:[#allocation0 + $0x20] sm:$0xff]  ;;  %v3361_v6 = vpack.c.bf16 %v2837_v4, %v2830_v3  ;;  %v2851_v7 = vld [vmem:[#allocation0 + $0x28] sm:$0xff] }
  0xd5   :  { %2796 = vst [vmem:[#allocation0 + $0xf5] sm:$0x2] %v2792_v60   ;;  %2800 = vst [vmem:[#allocation0 + $0x7e] sm:$0x1] %v2798_v61   ;;  %v2858_v8 = vld [vmem:[#allocation0 + $0x30] sm:$0xff]  ;;  %v2865_v9 = vld [vmem:[#allocation0 + $0x38] sm:$0xff]  ;;  %v3366_v10 = vpack.c.bf16 %v2851_v7, %v2844_v5 }
  0xd6   :  { %2802 = vst [vmem:[#allocation0 + $0xfd] sm:$0x2] %v2798_v61   ;;  %2806 = vst [vmem:[#allocation0 + $0x77] sm:$0x1] %v2804_v62   ;;  %v3371_v11 = vpack.c.bf16 %v2865_v9, %v2858_v8  ;;  %v2872_v12 = vld [vmem:[#allocation0 + $0x40] sm:$0xff]  ;;  %v2879_v13 = vld [vmem:[#allocation0 + $0x48] sm:$0xff] }
  0xd7   :  { %2808 = vst [vmem:[#allocation0 + $0xf6] sm:$0x2] %v2804_v62   ;;  %2812 = vst [vmem:[#allocation0 + $0x7f] sm:$0x1] %v2810_v63   ;;  %v2886_v14 = vld [vmem:[#allocation0 + $0x50] sm:$0xff]  ;;  %v3376_v15 = vpack.c.bf16 %v2879_v13, %v2872_v12  ;;  %v2893_v16 = vld [vmem:[#allocation0 + $0x58] sm:$0xff] }
  0xd8   :  { %2814 = vst [vmem:[#allocation0 + $0xfe] sm:$0x2] %v2810_v63   ;;  %3357 = vst [vmem:[%s3891_s1] sm:$0xff] %v3356_v2   ;;  %v2900_v17 = vld [vmem:[#allocation0 + $0x60] sm:$0xff]  ;;  %v2907_v18 = vld [vmem:[#allocation0 + $0x68] sm:$0xff]  ;;  %v3381_v19 = vpack.c.bf16 %v2893_v16, %v2886_v14 }
  0xd9   :  { %3433 = vst [vmem:[%s3891_s1 + $0x8] sm:$0xff] %v3361_v6   ;;  %3434 = vst [vmem:[%s3891_s1 + $0x10] sm:$0xff] %v3366_v10   ;;  %v3386_v20 = vpack.c.bf16 %v2907_v18, %v2900_v17  ;;  %v2928_v21 = vld [vmem:[#allocation0 + $0x80] sm:$0xff]  ;;  %v2935_v22 = vld [vmem:[#allocation0 + $0x88] sm:$0xff] }
  0xda   :  { %3435 = vst [vmem:[%s3891_s1 + $0x18] sm:$0xff] %v3371_v11   ;;  %v2942_v23 = vld [vmem:[#allocation0 + $0x90] sm:$0xff]  ;;  %3436 = vst [vmem:[%s3891_s1 + $0x20] sm:$0xff] %v3376_v15   ;;  %v3396_v24 = vpack.c.bf16 %v2935_v22, %v2928_v21  ;;  %v2949_v25 = vld [vmem:[#allocation0 + $0x98] sm:$0xff] }
  0xdb   :  { %v2956_v26 = vld [vmem:[#allocation0 + $0xa0] sm:$0xff]  ;;  %v2963_v27 = vld [vmem:[#allocation0 + $0xa8] sm:$0xff]  ;;  %3437 = vst [vmem:[%s3891_s1 + $0x28] sm:$0xff] %v3381_v19   ;;  %3438 = vst [vmem:[%s3891_s1 + $0x30] sm:$0xff] %v3386_v20   ;;  %v3401_v29 = vpack.c.bf16 %v2949_v25, %v2942_v23 }
  0xdc   :  { %v3406_v30 = vpack.c.bf16 %v2963_v27, %v2956_v26  ;;  %v2970_v31 = vld [vmem:[#allocation0 + $0xb0] sm:$0xff]  ;;  %v2977_v32 = vld [vmem:[#allocation0 + $0xb8] sm:$0xff]  ;;  %3440 = vst [vmem:[%s3891_s1 + $0x40] sm:$0xff] %v3396_v24   ;;  %v2984_v35 = vld [vmem:[#allocation0 + $0xc0] sm:$0xff] }
  0xdd   :  { %v2914_v28 = vld [vmem:[#allocation0 + $0x70] sm:$0xff]  ;;  %v3411_v34 = vpack.c.bf16 %v2977_v32, %v2970_v31  ;;  %v2991_v36 = vld [vmem:[#allocation0 + $0xc8] sm:$0xff]  ;;  %3441 = vst [vmem:[%s3891_s1 + $0x48] sm:$0xff] %v3401_v29   ;;  %v3005_v40 = vld [vmem:[#allocation0 + $0xd8] sm:$0xff] }
  0xde   :  { %v2921_v33 = vld [vmem:[#allocation0 + $0x78] sm:$0xff]  ;;  %3442 = vst [vmem:[%s3891_s1 + $0x50] sm:$0xff] %v3406_v30   ;;  %v3416_v38 = vpack.c.bf16 %v2991_v36, %v2984_v35  ;;  %v2998_v39 = vld [vmem:[#allocation0 + $0xd0] sm:$0xff]  ;;  %v3012_v41 = vld [vmem:[#allocation0 + $0xe0] sm:$0xff] }
  0xdf   :  { %v3391_v37 = vpack.c.bf16 %v2921_v33, %v2914_v28  ;;  %3443 = vst [vmem:[%s3891_s1 + $0x58] sm:$0xff] %v3411_v34   ;;  %v3421_v42 = vpack.c.bf16 %v3005_v40, %v2998_v39  ;;  %v3019_v43 = vld [vmem:[#allocation0 + $0xe8] sm:$0xff]  ;;  %v3026_v44 = vld [vmem:[#allocation0 + $0xf0] sm:$0xff]  ;;  %v3033_v45 = vld [vmem:[#allocation0 + $0xf8] sm:$0xff] }
  0xe0   :  { %3444 = vst [vmem:[%s3891_s1 + $0x60] sm:$0xff] %v3416_v38   ;;  %v3426_v46 = vpack.c.bf16 %v3019_v43, %v3012_v41  ;;  %v3431_v47 = vpack.c.bf16 %v3033_v45, %v3026_v44 }
  0xe1   :  { %3439 = vst [vmem:[%s3891_s1 + $0x38] sm:$0xff] %v3391_v37   ;;  %3445 = vst [vmem:[%s3891_s1 + $0x68] sm:$0xff] %v3421_v42  }
  0xe2   :  { %3446 = vst [vmem:[%s3891_s1 + $0x70] sm:$0xff] %v3426_v46   ;;  %3447 = vst [vmem:[%s3891_s1 + $0x78] sm:$0xff] %v3431_v47  }

// kernel: generator_forward.3
= control target key start
LH: loop header
LB: loop body
LE: loop exit
PB: predicated region body
PF: predicated region fallthrough
CT: control target
= control target key end

     0   :  { %7 = vsyncpa [#allocation3], 0  ;;  %s2193_s0 = inlined_call_operand.vmem [shape: bf16[1,8,128], index: 0, kind: input, shape index: {}]   ;;  %s2194_s1 = inlined_call_operand.hbm [shape: bf16[1,128,16384], index: 1, kind: input, shape index: {}]   ;;  %s2195_s2 = inlined_call_operand.vmem [shape: bf16[1,8,16384], index: 2, kind: output, shape index: {}]  }
   0x1   :  { %9 = vsyncpa [#allocation3 + $0x1], 0  ;;  %s1907_s9 = smov 0   ;;  %s1909_s10 = smov 0  }
   0x2   :  { %s1911_s11 = smov 0   ;;  %s1913_s12 = smov 0  }
   0x3   :  { %s1915_s13 = smov 0   ;;  %s1917_s14 = smov 0  }
   0x4 LB: > { %s1587_s15 = sadd.s32 4294967295, %s1885_s14   ;;  %s30_s16 = sadd.s32 1, %s1881_s13  ;;  %s1885_s14 = sphi %s1917_s14, %s15_s14   ;;  %s1881_s13 = sphi %s1915_s13, %s2204_s13   ;;  %s1877_s12 = sphi %s1913_s12, %s2203_s12   ;;  %s1873_s11 = sphi %s1911_s11, %s2202_s11   ;;  %s1869_s10 = sphi %s1909_s10, %s2201_s10   ;;  %s1865_s9 = sphi %s1907_s9, %s2200_s9  }
   0x5   : > { %p32_p0 = scmp.ge.s32.totalorder %s30_s16, 8  ;;  %s71_s17 = sadd.s32 1, %s1873_s11 }
   0x6   : > { %p78_p1 = scmp.ne.s32.totalorder %s1873_s11, %s1869_s10  ;;  %p79_p2 = scmp.eq.s32.totalorder %s1885_s14, 0 }
   0x7   : > { %s2206_s16 = smov (%p32_p0, %s30_s16), 0  ;;  %p84_p4 = scmp.ne.s32.totalorder %s1869_s10, %s1865_s9 }
   0x8   : > { %p1943_p3 = por %p79_p2, %p78_p1  ;;  %s67_s19 = ssub.s32 %s1881_s13, %s2206_s16 }
   0x9   : > { %p85_p5 = scmp.eq.s32.totalorder %s1587_s15, 0  ;;  %p69_p6 = scmp.eq.s32.totalorder %s67_s19, 0 }
   0xa   : > { %p1752_p8 = scmp.lt.s32.totalorder %s1885_s14, 8  ;;  %s148_s22 = sand.u32 1, %s1873_s11  }
   0xb   : > { %p1950_p7 = por %p85_p5, %p84_p4  ;;  %s1737_s23 = sshll.u32 %s1881_s13, 10 }
   0xc   : > { %s1956_s21 = scalar_select %p69_p6, %s1873_s11, %s71_s17  }
   0xd   : > { %s1592_s24 = sshll.u32 %s148_s22, 10  ;;  %s1963_s27 = scalar_lea.hbm %s2194_s1, %s1737_s23 }
   0xe   : > { %s152_s28 = scalar_lea.vmem [#allocation2], %s1592_s24  ;;  %p1967_p9 = pnand %p1752_p8, %p1943_p3 }
   0xf   : > { %s161_s29 = sshll.u32 %s152_s28, 4  ;;  %s1974_s3 = scalar_lea.sflag [#allocation3], %s148_s22  ;;  %s1971_s29 = int_to_ptr.vmem [resolvable:$true] %s161_s29 }
  0x10   : > { %s1805_s4 = scalar_lea.hbm %s1963_s27, 16384  ;;  %p1807_p12 = pneg %p1967_p9 }
  0x11   : > { %p1806_p11 = scmp.ne.s32.totalorder %s1963_s27, %s1805_s4  ;;  %s1810_s7 = scalar_lea.hbm %s2194_s1, 131072 }
  0x12   : > { %p1811_p1 = scmp.lt.u32.totalorder %s1963_s27, %s2194_s1  ;;  %p1812_p2 = scmp.lt.u32.totalorder %s1810_s7, %s1805_s4 }
  0x13   : > { %p1808_p13 = pnand %p1807_p12, %p1806_p11  ;;  %p1814_p4 = scmp.lt.u32.totalorder %s1805_s4, %s1963_s27 }
  0x14   : > { %p1813_p3 = por %p1812_p2, %p1811_p1 }
  0x15   : > { %p1809_p0 = pneg %p1808_p13 }
  0x16   : > { %p1815_p5 = por %p1814_p4, %p1813_p3 }
  0x18   : > { %p1816_p6 = pnand %p1815_p5, %p1809_p0 }
  0x1a   : > { %1819 = shalt.err (!%p1816_p6)
}
  0x1b   : > { %s1820_s15 = scalar_lea.vmem %s1971_s29, 16384  ;;  %s1887_s17 = smov [#allocation2]  }
  0x1c   : > { %p1821_p8 = scmp.ne.s32.totalorder %s1971_s29, %s1820_s15  ;;  %s1825_s18 = sshll.u32 %s1887_s17, 4  ;;  %s1826_s18 = int_to_ptr.vmem [resolvable:$false] %s1825_s18 }
  0x1d   : > { %s1827_s19 = scalar_lea.vmem %s1826_s18, 32768  ;;  %p1828_p10 = scmp.lt.s32.totalorder %s1971_s29, %s1826_s18 }
  0x1e   : > { %p1823_p11 = pnand %p1821_p8, %p1807_p12  ;;  %p1829_p1 = scmp.lt.s32.totalorder %s1827_s19, %s1820_s15 }
  0x20   : > { %p1824_p13 = pneg %p1823_p11  ;;  %p1830_p2 = por %p1829_p1, %p1828_p10 }
  0x22   : > { %p1831_p3 = pnand %p1830_p2, %p1824_p13 }
  0x24   : > { %1834 = shalt.err (!%p1831_p3)
}
  0x25   : > { %s1888_s22 = smov 8192   ;;  %s1889_s23 = smov 1024  }
  0x26   : > { %s1890_s24 = smov 64   ;;  %p169_p12 = scmp.lt.s32.totalorder %s1885_s14, 9 }
  0x27   : > { %1751 = dma.hbm_to_vmem [thread:$0]  (!%p1967_p9), %s1963_s27, 16384, %s1971_s29, %s1974_s3, %s1888_s22, %s1889_s23, %s1890_s24  }
  0x28   : > { %p2199_p0 = scmp.ge.s32.totalorder %s1885_s14, 1 }
  0x2a   : > { %p170_p4 = pnand %p2199_p0, %p169_p12 }
  0x2b   : > { %s175_s25 = sand.u32 (!%p170_p4), 1, %s1869_s10  }
  0x2c   : > { %173 = sbr.rel (%p170_p4) target bundleno = 404 (0x194), region = 28  ;;  %s1596_s26 = sshll.u32 (!%p170_p4), %s175_s25, 10 }
  0x2d   : > { %s176_s28 = scalar_lea.sflag (!%p170_p4), [#allocation3], %s175_s25  ;;  %s2006_s4 = scalar_lea.vmem (!%p170_p4), [#allocation2], %s1596_s26 }
  0x33   : > { %1860 = dma.done.wait (%p1950_p7), %s176_s28, 16384  }
  0x34   : > { %1862 = vsyncadd (%p1950_p7), %s176_s28, 4294950912  ;;  %v1891_v0 = vmov 0   ;;  %v239_v1 = vld [vmem:[%s2006_s4] sm:$0xff]  ;;  %v240_v3 = vld [vmem:[%s2006_s4 + $0x8] sm:$0xff]  ;;  %s1597_s29 = sshll.u32 %s1877_s12, 4 }
  0x35   : > { %1039 = vmatprep.mubr.bf16.mxu0 %v1891_v0  ;;  %1080 = vmatprep.mubr.bf16.mxu1 %v1891_v0  ;;  %v247_v2 = vld [vmem:[%s2006_s4 + $0x40] sm:$0xff]  ;;  %v248_v5 = vld [vmem:[%s2006_s4 + $0x48] sm:$0xff]  ;;  %v241_v63 = vld [vmem:[%s2006_s4 + $0x10] sm:$0xff]  ;;  %p228_p7 = scmp.lt.s32.totalorder %s1597_s29, 127 }
  0x36   : > { %v1600_v4 = vcombine.high %v239_v1, %v247_v2  ;;  %v1599_v6 = vcombine.low %v239_v1, %v247_v2  ;;  %v255_v7 = vld [vmem:[%s2006_s4 + $0x80] sm:$0xff]  ;;  %v1602_v9 = vcombine.high %v240_v3, %v248_v5  ;;  %v1601_v10 = vcombine.low %v240_v3, %v248_v5  ;;  %v256_v12 = vld [vmem:[%s2006_s4 + $0x88] sm:$0xff]  ;;  %v249_v1 = vld [vmem:[%s2006_s4 + $0x50] sm:$0xff] }
  0x37   : > { %v263_v8 = vld [vmem:[%s2006_s4 + $0xc0] sm:$0xff]  ;;  %v264_v13 = vld [vmem:[%s2006_s4 + $0xc8] sm:$0xff]  ;;  %v242_v2 = vld [vmem:[%s2006_s4 + $0x18] sm:$0xff]  ;;  %s2208_s29 = smov (!%p228_p7, %s1597_s29), 127 }
  0x38   : > { %v1616_v11 = vcombine.high %v255_v7, %v263_v8  ;;  %v271_v14 = vld [vmem:[%s2006_s4 + $0x100] sm:$0xff]  ;;  %1007 = vmatprep.subr.bf16.mxu0 %v1600_v4  ;;  %v1618_v15 = vcombine.high %v256_v12, %v264_v13  ;;  %v272_v17 = vld [vmem:[%s2006_s4 + $0x108] sm:$0xff]  ;;  %1048 = vmatprep.subr.bf16.mxu1 %v1602_v9  ;;  %v1615_v19 = vcombine.low %v255_v7, %v263_v8  ;;  %v250_v3 = vld [vmem:[%s2006_s4 + $0x58] sm:$0xff]  ;;  %s1598_s30 = sshll.u32 %s2208_s29, 2 }
  0x39   : > { %v279_v16 = vld [vmem:[%s2006_s4 + $0x140] sm:$0xff]  ;;  %v280_v18 = vld [vmem:[%s2006_s4 + $0x148] sm:$0xff]  ;;  %1008 = vmatpush1.bf16.msra.mxu0 %v1599_v6  ;;  %1049 = vmatpush1.bf16.msra.mxu1 %v1601_v10  ;;  %v1617_v20 = vcombine.low %v256_v12, %v264_v13  ;;  %v1604_v6 = vcombine.high %v241_v63, %v249_v1  ;;  %v1606_v7 = vcombine.high %v242_v2, %v250_v3  ;;  %v257_v8 = vld [vmem:[%s2006_s4 + $0x90] sm:$0xff]  ;;  %s2165_s12 = scalar_lea.vmem %s2195_s2, %s1598_s30 }
  0x3a   : > { %1009 = vmatprep.subr.bf16.mxu0 %v1616_v11  ;;  %v1632_v21 = vcombine.high %v271_v14, %v279_v16  ;;  %1050 = vmatprep.subr.bf16.mxu1 %v1618_v15  ;;  %v1634_v22 = vcombine.high %v272_v17, %v280_v18  ;;  %v287_v23 = vld [vmem:[%s2006_s4 + $0x180] sm:$0xff]  ;;  %v288_v25 = vld [vmem:[%s2006_s4 + $0x188] sm:$0xff]  ;;  %v1631_v27 = vcombine.low %v271_v14, %v279_v16  ;;  %v265_v9 = vld [vmem:[%s2006_s4 + $0xd0] sm:$0xff] }
  0x3b   : > { %v295_v24 = vld [vmem:[%s2006_s4 + $0x1c0] sm:$0xff]  ;;  %v296_v26 = vld [vmem:[%s2006_s4 + $0x1c8] sm:$0xff]  ;;  %v1633_v28 = vcombine.low %v272_v17, %v280_v18  ;;  %v258_v10 = vld [vmem:[%s2006_s4 + $0x98] sm:$0xff]  ;;  %v1603_v13 = vcombine.low %v241_v63, %v249_v1  ;;  %v1605_v14 = vcombine.low %v242_v2, %v250_v3  ;;  %v1620_v15 = vcombine.high %v257_v8, %v265_v9 }
  0x3c   : > { %v1648_v29 = vcombine.high %v287_v23, %v295_v24  ;;  %v1650_v30 = vcombine.high %v288_v25, %v296_v26  ;;  %v303_v31 = vld [vmem:[%s2006_s4 + $0x200] sm:$0xff]  ;;  %v304_v33 = vld [vmem:[%s2006_s4 + $0x208] sm:$0xff]  ;;  %v1647_v35 = vcombine.low %v287_v23, %v295_v24  ;;  %v1649_v36 = vcombine.low %v288_v25, %v296_v26  ;;  %v266_v11 = vld [vmem:[%s2006_s4 + $0xd8] sm:$0xff] }
  0x3d   : > { %1010 = vmatpush1.bf16.msra.mxu0 %v1615_v19  ;;  %1051 = vmatpush1.bf16.msra.mxu1 %v1617_v20  ;;  %v311_v32 = vld [vmem:[%s2006_s4 + $0x240] sm:$0xff]  ;;  %v312_v34 = vld [vmem:[%s2006_s4 + $0x248] sm:$0xff]  ;;  %v1622_v16 = vcombine.high %v258_v10, %v266_v11  ;;  %v273_v17 = vld [vmem:[%s2006_s4 + $0x110] sm:$0xff] }
  0x3e   : > { %1011 = vmatprep.subr.bf16.mxu0 %v1632_v21  ;;  %1052 = vmatprep.subr.bf16.mxu1 %v1634_v22  ;;  %v1664_v37 = vcombine.high %v303_v31, %v311_v32  ;;  %v1666_v38 = vcombine.high %v304_v33, %v312_v34  ;;  %v319_v39 = vld [vmem:[%s2006_s4 + $0x280] sm:$0xff]  ;;  %v320_v41 = vld [vmem:[%s2006_s4 + $0x288] sm:$0xff]  ;;  %v1663_v43 = vcombine.low %v303_v31, %v311_v32  ;;  %v281_v18 = vld [vmem:[%s2006_s4 + $0x150] sm:$0xff] }
  0x3f   : > { %v327_v40 = vld [vmem:[%s2006_s4 + $0x2c0] sm:$0xff]  ;;  %v328_v42 = vld [vmem:[%s2006_s4 + $0x2c8] sm:$0xff]  ;;  %v1665_v44 = vcombine.low %v304_v33, %v312_v34  ;;  %v274_v19 = vld [vmem:[%s2006_s4 + $0x118] sm:$0xff]  ;;  %v1619_v21 = vcombine.low %v257_v8, %v265_v9  ;;  %v1621_v22 = vcombine.low %v258_v10, %v266_v11  ;;  %v1636_v23 = vcombine.high %v273_v17, %v281_v18 }
  0x40   : > { %v1680_v45 = vcombine.high %v319_v39, %v327_v40  ;;  %v1682_v46 = vcombine.high %v320_v41, %v328_v42  ;;  %v335_v47 = vld [vmem:[%s2006_s4 + $0x300] sm:$0xff]  ;;  %v336_v49 = vld [vmem:[%s2006_s4 + $0x308] sm:$0xff]  ;;  %v1679_v51 = vcombine.low %v319_v39, %v327_v40  ;;  %v1681_v52 = vcombine.low %v320_v41, %v328_v42  ;;  %v282_v20 = vld [vmem:[%s2006_s4 + $0x158] sm:$0xff] }
  0x41   : > { %1012 = vmatpush1.bf16.msra.mxu0 %v1631_v27  ;;  %1053 = vmatpush1.bf16.msra.mxu1 %v1633_v28  ;;  %v343_v48 = vld [vmem:[%s2006_s4 + $0x340] sm:$0xff]  ;;  %v344_v50 = vld [vmem:[%s2006_s4 + $0x348] sm:$0xff]  ;;  %v1638_v24 = vcombine.high %v274_v19, %v282_v20  ;;  %v289_v25 = vld [vmem:[%s2006_s4 + $0x190] sm:$0xff] }
  0x42   : > { %1013 = vmatprep.subr.bf16.mxu0 %v1648_v29  ;;  %1054 = vmatprep.subr.bf16.mxu1 %v1650_v30  ;;  %v1696_v53 = vcombine.high %v335_v47, %v343_v48  ;;  %v1698_v54 = vcombine.high %v336_v49, %v344_v50  ;;  %v351_v55 = vld [vmem:[%s2006_s4 + $0x380] sm:$0xff]  ;;  %v352_v57 = vld [vmem:[%s2006_s4 + $0x388] sm:$0xff]  ;;  %v1695_v59 = vcombine.low %v335_v47, %v343_v48  ;;  %v297_v26 = vld [vmem:[%s2006_s4 + $0x1d0] sm:$0xff] }
  0x43   : > { %v359_v56 = vld [vmem:[%s2006_s4 + $0x3c0] sm:$0xff]  ;;  %v360_v58 = vld [vmem:[%s2006_s4 + $0x3c8] sm:$0xff]  ;;  %v1697_v60 = vcombine.low %v336_v49, %v344_v50  ;;  %v290_v27 = vld [vmem:[%s2006_s4 + $0x198] sm:$0xff]  ;;  %v1635_v29 = vcombine.low %v273_v17, %v281_v18  ;;  %v1637_v30 = vcombine.low %v274_v19, %v282_v20  ;;  %v1652_v31 = vcombine.high %v289_v25, %v297_v26 }
  0x44   : > { %v1712_v61 = vcombine.high %v351_v55, %v359_v56  ;;  %v1714_v62 = vcombine.high %v352_v57, %v360_v58  ;;  %v1711_v4 = vcombine.low %v351_v55, %v359_v56  ;;  %v1713_v5 = vcombine.low %v352_v57, %v360_v58  ;;  %v2057_v12 = vld [vmem:[%s2193_s0] sm:$0xf]  ;;  %v298_v28 = vld [vmem:[%s2006_s4 + $0x1d8] sm:$0xff]  ;;  %v305_v33 = vld [vmem:[%s2006_s4 + $0x210] sm:$0xff] }
  0x45   : > { %1014 = vmatpush1.bf16.msra.mxu0 %v1647_v35  ;;  %1055 = vmatpush1.bf16.msra.mxu1 %v1649_v36  ;;  %v1654_v32 = vcombine.high %v290_v27, %v298_v28  ;;  %v313_v34 = vld [vmem:[%s2006_s4 + $0x250] sm:$0xff]  ;;  %v306_v35 = vld [vmem:[%s2006_s4 + $0x218] sm:$0xff]  ;;  %v243_v2 = vld [vmem:[%s2006_s4 + $0x20] sm:$0xff] }
  0x46   : > { %1015 = vmatprep.subr.bf16.mxu0 %v1664_v37  ;;  %1056 = vmatprep.subr.bf16.mxu1 %v1666_v38  ;;  %v314_v36 = vld [vmem:[%s2006_s4 + $0x258] sm:$0xff]  ;;  %v1651_v37 = vcombine.low %v289_v25, %v297_v26  ;;  %v1653_v38 = vcombine.low %v290_v27, %v298_v28  ;;  %v1668_v39 = vcombine.high %v305_v33, %v313_v34  ;;  %v321_v41 = vld [vmem:[%s2006_s4 + $0x290] sm:$0xff]  ;;  %v251_v3 = vld [vmem:[%s2006_s4 + $0x60] sm:$0xff] }
  0x47   : > { %v1670_v40 = vcombine.high %v306_v35, %v314_v36  ;;  %v329_v42 = vld [vmem:[%s2006_s4 + $0x2d0] sm:$0xff]  ;;  %v1608_v8 = vcombine.high %v243_v2, %v251_v3  ;;  %v259_v10 = vld [vmem:[%s2006_s4 + $0xa0] sm:$0xff] }
  0x48   : > { %v1684_v47 = vcombine.high %v321_v41, %v329_v42  ;;  %v337_v49 = vld [vmem:[%s2006_s4 + $0x310] sm:$0xff]  ;;  %v267_v11 = vld [vmem:[%s2006_s4 + $0xe0] sm:$0xff] }
  0x49   : > { %1016 = vmatpush1.bf16.msra.mxu0 %v1663_v43  ;;  %1057 = vmatpush1.bf16.msra.mxu1 %v1665_v44  ;;  %v322_v43 = vld [vmem:[%s2006_s4 + $0x298] sm:$0xff]  ;;  %v345_v50 = vld [vmem:[%s2006_s4 + $0x350] sm:$0xff]  ;;  %v1624_v17 = vcombine.high %v259_v10, %v267_v11  ;;  %v275_v19 = vld [vmem:[%s2006_s4 + $0x120] sm:$0xff] }
  0x4a   : > { %1017 = vmatprep.subr.bf16.mxu0 %v1680_v45  ;;  %1058 = vmatprep.subr.bf16.mxu1 %v1682_v46  ;;  %v330_v44 = vld [vmem:[%s2006_s4 + $0x2d8] sm:$0xff]  ;;  %v1667_v45 = vcombine.low %v305_v33, %v313_v34  ;;  %v1669_v46 = vcombine.low %v306_v35, %v314_v36  ;;  %v1700_v55 = vcombine.high %v337_v49, %v345_v50  ;;  %v353_v57 = vld [vmem:[%s2006_s4 + $0x390] sm:$0xff]  ;;  %v283_v20 = vld [vmem:[%s2006_s4 + $0x160] sm:$0xff] }
  0x4b   : > { %v1686_v48 = vcombine.high %v322_v43, %v330_v44  ;;  %v361_v58 = vld [vmem:[%s2006_s4 + $0x3d0] sm:$0xff]  ;;  %v1640_v25 = vcombine.high %v275_v19, %v283_v20  ;;  %v291_v27 = vld [vmem:[%s2006_s4 + $0x1a0] sm:$0xff] }
  0x4c   : > { %v1716_v63 = vcombine.high %v353_v57, %v361_v58  ;;  %v299_v28 = vld [vmem:[%s2006_s4 + $0x1e0] sm:$0xff] }
  0x4d   : > { %1018 = vmatpush1.bf16.msra.mxu0 %v1679_v51  ;;  %1059 = vmatpush1.bf16.msra.mxu1 %v1681_v52  ;;  %v338_v51 = vld [vmem:[%s2006_s4 + $0x318] sm:$0xff]  ;;  %v1656_v33 = vcombine.high %v291_v27, %v299_v28  ;;  %v307_v35 = vld [vmem:[%s2006_s4 + $0x220] sm:$0xff] }
  0x4e   : > { %1019 = vmatprep.subr.bf16.mxu0 %v1696_v53  ;;  %1060 = vmatprep.subr.bf16.mxu1 %v1698_v54  ;;  %v346_v52 = vld [vmem:[%s2006_s4 + $0x358] sm:$0xff]  ;;  %v1683_v53 = vcombine.low %v321_v41, %v329_v42  ;;  %v1685_v54 = vcombine.low %v322_v43, %v330_v44  ;;  %v315_v36 = vld [vmem:[%s2006_s4 + $0x260] sm:$0xff] }
  0x4f   : > { %v1702_v56 = vcombine.high %v338_v51, %v346_v52  ;;  %v1672_v41 = vcombine.high %v307_v35, %v315_v36  ;;  %v323_v43 = vld [vmem:[%s2006_s4 + $0x2a0] sm:$0xff] }
  0x50   : > { %v331_v44 = vld [vmem:[%s2006_s4 + $0x2e0] sm:$0xff] }
  0x51   : > { %1020 = vmatpush1.bf16.msra.mxu0 %v1695_v59  ;;  %1061 = vmatpush1.bf16.msra.mxu1 %v1697_v60  ;;  %v354_v59 = vld [vmem:[%s2006_s4 + $0x398] sm:$0xff] }
  0x52   : > { %1021 = vmatprep.subr.bf16.mxu0 %v1712_v61  ;;  %1062 = vmatprep.subr.bf16.mxu1 %v1714_v62  ;;  %v362_v60 = vld [vmem:[%s2006_s4 + $0x3d8] sm:$0xff]  ;;  %v1699_v61 = vcombine.low %v337_v49, %v345_v50  ;;  %v1701_v62 = vcombine.low %v338_v51, %v346_v52  ;;  %v1688_v49 = vcombine.high %v323_v43, %v331_v44  ;;  %v339_v51 = vld [vmem:[%s2006_s4 + $0x320] sm:$0xff] }
  0x53   : > { %v1718_v1 = vcombine.high %v354_v59, %v362_v60  ;;  %v347_v52 = vld [vmem:[%s2006_s4 + $0x360] sm:$0xff] }
  0x55   : > { %1022 = vmatpush1.bf16.msra.mxu0 %v1711_v4  ;;  %1063 = vmatpush1.bf16.msra.mxu1 %v1713_v5  ;;  %v244_v4 = vld [vmem:[%s2006_s4 + $0x28] sm:$0xff] }
  0x56   : > { %1089 = vmatprep.subr.bf16.mxu0 %v1604_v6  ;;  %1130 = vmatprep.subr.bf16.mxu1 %v1606_v7  ;;  %v252_v5 = vld [vmem:[%s2006_s4 + $0x68] sm:$0xff]  ;;  %v1715_v6 = vcombine.low %v353_v57, %v361_v58  ;;  %v1717_v7 = vcombine.low %v354_v59, %v362_v60  ;;  %v1704_v57 = vcombine.high %v339_v51, %v347_v52  ;;  %v355_v59 = vld [vmem:[%s2006_s4 + $0x3a0] sm:$0xff] }
  0x57   : > { %v1610_v9 = vcombine.high %v244_v4, %v252_v5  ;;  %v363_v60 = vld [vmem:[%s2006_s4 + $0x3e0] sm:$0xff] }
  0x58   : > { %1040 = vmatmul.mubr.bf16.vlgmr.msra.gmra.mrb[0].mxu0 %v2057_v12  ;;  %1081 = vmatmul.mubr.bf16.vlgmr.msra.gmra.mrb[0].mxu1 %v2057_v12 }
  0x59   : > { %1090 = vmatpush1.bf16.msra.mxu0 %v1603_v13  ;;  %1131 = vmatpush1.bf16.msra.mxu1 %v1605_v14  ;;  %v260_v13 = vld [vmem:[%s2006_s4 + $0xa8] sm:$0xff] }
  0x5a   : > { %1091 = vmatprep.subr.bf16.mxu0 %v1620_v15  ;;  %1132 = vmatprep.subr.bf16.mxu1 %v1622_v16  ;;  %v268_v14 = vld [vmem:[%s2006_s4 + $0xe8] sm:$0xff]  ;;  %v1607_v15 = vcombine.low %v243_v2, %v251_v3  ;;  %v1609_v16 = vcombine.low %v244_v4, %v252_v5  ;;  %v1720_v2 = vcombine.high %v355_v59, %v363_v60  ;;  %v245_v4 = vld [vmem:[%s2006_s4 + $0x30] sm:$0xff] }
  0x5b   : > { %1121 = vmatprep.mubr.bf16.mxu0 %v1891_v0  ;;  %1162 = vmatprep.mubr.bf16.mxu1 %v1891_v0  ;;  %v1626_v18 = vcombine.high %v260_v13, %v268_v14  ;;  %v253_v5 = vld [vmem:[%s2006_s4 + $0x70] sm:$0xff] }
  0x5d   : > { %1092 = vmatpush1.bf16.msra.mxu0 %v1619_v21  ;;  %1133 = vmatpush1.bf16.msra.mxu1 %v1621_v22  ;;  %v276_v21 = vld [vmem:[%s2006_s4 + $0x128] sm:$0xff] }
  0x5e   : > { %1093 = vmatprep.subr.bf16.mxu0 %v1636_v23  ;;  %1134 = vmatprep.subr.bf16.mxu1 %v1638_v24  ;;  %v284_v22 = vld [vmem:[%s2006_s4 + $0x168] sm:$0xff]  ;;  %v1623_v23 = vcombine.low %v259_v10, %v267_v11  ;;  %v1625_v24 = vcombine.low %v260_v13, %v268_v14  ;;  %v1612_v10 = vcombine.high %v245_v4, %v253_v5  ;;  %v261_v13 = vld [vmem:[%s2006_s4 + $0xb0] sm:$0xff] }
  0x5f   : > { %v1642_v26 = vcombine.high %v276_v21, %v284_v22  ;;  %v269_v14 = vld [vmem:[%s2006_s4 + $0xf0] sm:$0xff] }
  0x61   : > { %1094 = vmatpush1.bf16.msra.mxu0 %v1635_v29  ;;  %1135 = vmatpush1.bf16.msra.mxu1 %v1637_v30  ;;  %v292_v29 = vld [vmem:[%s2006_s4 + $0x1a8] sm:$0xff] }
  0x62   : > { %1095 = vmatprep.subr.bf16.mxu0 %v1652_v31  ;;  %1136 = vmatprep.subr.bf16.mxu1 %v1654_v32  ;;  %v300_v30 = vld [vmem:[%s2006_s4 + $0x1e8] sm:$0xff]  ;;  %v1639_v31 = vcombine.low %v275_v19, %v283_v20  ;;  %v1641_v32 = vcombine.low %v276_v21, %v284_v22  ;;  %v1628_v19 = vcombine.high %v261_v13, %v269_v14  ;;  %v277_v21 = vld [vmem:[%s2006_s4 + $0x130] sm:$0xff] }
  0x63   : > { %v1658_v34 = vcombine.high %v292_v29, %v300_v30  ;;  %v285_v22 = vld [vmem:[%s2006_s4 + $0x170] sm:$0xff] }
  0x65   : > { %1096 = vmatpush1.bf16.msra.mxu0 %v1651_v37  ;;  %1137 = vmatpush1.bf16.msra.mxu1 %v1653_v38  ;;  %v308_v37 = vld [vmem:[%s2006_s4 + $0x228] sm:$0xff] }
  0x66   : > { %1097 = vmatprep.subr.bf16.mxu0 %v1668_v39  ;;  %1138 = vmatprep.subr.bf16.mxu1 %v1670_v40  ;;  %v316_v38 = vld [vmem:[%s2006_s4 + $0x268] sm:$0xff]  ;;  %v1655_v39 = vcombine.low %v291_v27, %v299_v28  ;;  %v1657_v40 = vcombine.low %v292_v29, %v300_v30  ;;  %v1644_v27 = vcombine.high %v277_v21, %v285_v22  ;;  %v293_v29 = vld [vmem:[%s2006_s4 + $0x1b0] sm:$0xff] }
  0x67   : > { %v1674_v42 = vcombine.high %v308_v37, %v316_v38  ;;  %v301_v30 = vld [vmem:[%s2006_s4 + $0x1f0] sm:$0xff] }
  0x69   : > { %1098 = vmatpush1.bf16.msra.mxu0 %v1667_v45  ;;  %1139 = vmatpush1.bf16.msra.mxu1 %v1669_v46  ;;  %v324_v45 = vld [vmem:[%s2006_s4 + $0x2a8] sm:$0xff] }
  0x6a   : > { %1099 = vmatprep.subr.bf16.mxu0 %v1684_v47  ;;  %1140 = vmatprep.subr.bf16.mxu1 %v1686_v48  ;;  %v332_v46 = vld [vmem:[%s2006_s4 + $0x2e8] sm:$0xff]  ;;  %v1671_v47 = vcombine.low %v307_v35, %v315_v36  ;;  %v1673_v48 = vcombine.low %v308_v37, %v316_v38  ;;  %v1660_v35 = vcombine.high %v293_v29, %v301_v30  ;;  %v309_v37 = vld [vmem:[%s2006_s4 + $0x230] sm:$0xff] }
  0x6b   : > { %v1690_v50 = vcombine.high %v324_v45, %v332_v46  ;;  %v317_v38 = vld [vmem:[%s2006_s4 + $0x270] sm:$0xff] }
  0x6d   : > { %1100 = vmatpush1.bf16.msra.mxu0 %v1683_v53  ;;  %1141 = vmatpush1.bf16.msra.mxu1 %v1685_v54  ;;  %v340_v53 = vld [vmem:[%s2006_s4 + $0x328] sm:$0xff] }
  0x6e   : > { %1101 = vmatprep.subr.bf16.mxu0 %v1700_v55  ;;  %1142 = vmatprep.subr.bf16.mxu1 %v1702_v56  ;;  %v348_v54 = vld [vmem:[%s2006_s4 + $0x368] sm:$0xff]  ;;  %v1687_v55 = vcombine.low %v323_v43, %v331_v44  ;;  %v1689_v56 = vcombine.low %v324_v45, %v332_v46  ;;  %v325_v44 = vld [vmem:[%s2006_s4 + $0x2b0] sm:$0xff]  ;;  %v326_v46 = vld [vmem:[%s2006_s4 + $0x2b8] sm:$0xff] }
  0x6f   : > { %v1706_v58 = vcombine.high %v340_v53, %v348_v54  ;;  %v333_v45 = vld [vmem:[%s2006_s4 + $0x2f0] sm:$0xff] }
  0x71   : > { %1102 = vmatpush1.bf16.msra.mxu0 %v1699_v61  ;;  %1143 = vmatpush1.bf16.msra.mxu1 %v1701_v62  ;;  %v356_v61 = vld [vmem:[%s2006_s4 + $0x3a8] sm:$0xff] }
  0x72   : > { %1103 = vmatprep.subr.bf16.mxu0 %v1716_v63  ;;  %1144 = vmatprep.subr.bf16.mxu1 %v1718_v1  ;;  %v364_v62 = vld [vmem:[%s2006_s4 + $0x3e8] sm:$0xff]  ;;  %v1703_v63 = vcombine.low %v339_v51, %v347_v52  ;;  %v1705_v1 = vcombine.low %v340_v53, %v348_v54  ;;  %v341_v52 = vld [vmem:[%s2006_s4 + $0x330] sm:$0xff]  ;;  %v342_v54 = vld [vmem:[%s2006_s4 + $0x338] sm:$0xff] }
  0x73   : > { %v1722_v3 = vcombine.high %v356_v61, %v364_v62  ;;  %v349_v53 = vld [vmem:[%s2006_s4 + $0x370] sm:$0xff] }
  0x75   : > { %1104 = vmatpush1.bf16.msra.mxu0 %v1715_v6  ;;  %1145 = vmatpush1.bf16.msra.mxu1 %v1717_v7  ;;  %v246_v6 = vld [vmem:[%s2006_s4 + $0x38] sm:$0xff] }
  0x76   : > { %1171 = vmatprep.subr.bf16.mxu0 %v1608_v8  ;;  %1212 = vmatprep.subr.bf16.mxu1 %v1610_v9  ;;  %v254_v7 = vld [vmem:[%s2006_s4 + $0x78] sm:$0xff]  ;;  %v1719_v8 = vcombine.low %v355_v59, %v363_v60  ;;  %v1721_v9 = vcombine.low %v356_v61, %v364_v62  ;;  %v357_v60 = vld [vmem:[%s2006_s4 + $0x3b0] sm:$0xff] }
  0x77   : > { %v1614_v11 = vcombine.high %v246_v6, %v254_v7  ;;  %v365_v61 = vld [vmem:[%s2006_s4 + $0x3f0] sm:$0xff]  ;;  %v358_v62 = vld [vmem:[%s2006_s4 + $0x3b8] sm:$0xff] }
  0x78   : > { %1122 = vmatmul.mubr.bf16.vlgmr.msra.gmra.mrb[4].mxu0 %v2057_v12  ;;  %1163 = vmatmul.mubr.bf16.vlgmr.msra.gmra.mrb[4].mxu1 %v2057_v12 }
  0x79   : > { %1172 = vmatpush1.bf16.msra.mxu0 %v1607_v15  ;;  %1213 = vmatpush1.bf16.msra.mxu1 %v1609_v16  ;;  %v262_v15 = vld [vmem:[%s2006_s4 + $0xb8] sm:$0xff] }
  0x7a   : > { %1173 = vmatprep.subr.bf16.mxu0 %v1624_v17  ;;  %1214 = vmatprep.subr.bf16.mxu1 %v1626_v18  ;;  %v270_v16 = vld [vmem:[%s2006_s4 + $0xf8] sm:$0xff]  ;;  %v1611_v17 = vcombine.low %v245_v4, %v253_v5  ;;  %v1613_v18 = vcombine.low %v246_v6, %v254_v7  ;;  %v1723_v5 = vcombine.low %v357_v60, %v365_v61 }
  0x7b   : > { %1203 = vmatprep.mubr.bf16.mxu0 %v1891_v0  ;;  %1244 = vmatprep.mubr.bf16.mxu1 %v1891_v0  ;;  %v1630_v20 = vcombine.high %v262_v15, %v270_v16 }
  0x7d   : > { %1174 = vmatpush1.bf16.msra.mxu0 %v1623_v23  ;;  %1215 = vmatpush1.bf16.msra.mxu1 %v1625_v24  ;;  %v278_v23 = vld [vmem:[%s2006_s4 + $0x138] sm:$0xff] }
  0x7e   : > { %1175 = vmatprep.subr.bf16.mxu0 %v1640_v25  ;;  %1216 = vmatprep.subr.bf16.mxu1 %v1642_v26  ;;  %v286_v24 = vld [vmem:[%s2006_s4 + $0x178] sm:$0xff]  ;;  %v1627_v25 = vcombine.low %v261_v13, %v269_v14  ;;  %v1629_v26 = vcombine.low %v262_v15, %v270_v16 }
  0x7f   : > { %v1646_v28 = vcombine.high %v278_v23, %v286_v24 }
  0x81   : > { %1176 = vmatpush1.bf16.msra.mxu0 %v1639_v31  ;;  %1217 = vmatpush1.bf16.msra.mxu1 %v1641_v32  ;;  %v294_v31 = vld [vmem:[%s2006_s4 + $0x1b8] sm:$0xff] }
  0x82   : > { %1177 = vmatprep.subr.bf16.mxu0 %v1656_v33  ;;  %1218 = vmatprep.subr.bf16.mxu1 %v1658_v34  ;;  %v302_v32 = vld [vmem:[%s2006_s4 + $0x1f8] sm:$0xff]  ;;  %v1643_v33 = vcombine.low %v277_v21, %v285_v22  ;;  %v1645_v34 = vcombine.low %v278_v23, %v286_v24 }
  0x83   : > { %v1662_v36 = vcombine.high %v294_v31, %v302_v32 }
  0x85   : > { %1178 = vmatpush1.bf16.msra.mxu0 %v1655_v39  ;;  %1219 = vmatpush1.bf16.msra.mxu1 %v1657_v40  ;;  %v310_v39 = vld [vmem:[%s2006_s4 + $0x238] sm:$0xff] }
  0x86   : > { %1179 = vmatprep.subr.bf16.mxu0 %v1672_v41  ;;  %1220 = vmatprep.subr.bf16.mxu1 %v1674_v42  ;;  %v318_v40 = vld [vmem:[%s2006_s4 + $0x278] sm:$0xff]  ;;  %v1659_v41 = vcombine.low %v293_v29, %v301_v30  ;;  %v1676_v42 = vcombine.high %v309_v37, %v317_v38 }
  0x87   : > { %v1678_v43 = vcombine.high %v310_v39, %v318_v40 }
  0x89   : > { %1180 = vmatpush1.bf16.msra.mxu0 %v1671_v47  ;;  %1221 = vmatpush1.bf16.msra.mxu1 %v1673_v48  ;;  %v334_v47 = vld [vmem:[%s2006_s4 + $0x2f8] sm:$0xff]  ;;  %v1675_v48 = vcombine.low %v309_v37, %v317_v38 }
  0x8a   : > { %1181 = vmatprep.subr.bf16.mxu0 %v1688_v49  ;;  %1222 = vmatprep.subr.bf16.mxu1 %v1690_v50  ;;  %v1677_v49 = vcombine.low %v310_v39, %v318_v40  ;;  %v1692_v50 = vcombine.high %v325_v44, %v333_v45  ;;  %v1694_v51 = vcombine.high %v326_v46, %v334_v47 }
  0x8d   : > { %1182 = vmatpush1.bf16.msra.mxu0 %v1687_v55  ;;  %1223 = vmatpush1.bf16.msra.mxu1 %v1689_v56  ;;  %v350_v55 = vld [vmem:[%s2006_s4 + $0x378] sm:$0xff]  ;;  %v1691_v56 = vcombine.low %v325_v44, %v333_v45 }
  0x8e   : > { %1183 = vmatprep.subr.bf16.mxu0 %v1704_v57  ;;  %1224 = vmatprep.subr.bf16.mxu1 %v1706_v58  ;;  %v1693_v57 = vcombine.low %v326_v46, %v334_v47  ;;  %v1708_v58 = vcombine.high %v341_v52, %v349_v53  ;;  %v1710_v59 = vcombine.high %v342_v54, %v350_v55 }
  0x91   : > { %1184 = vmatpush1.bf16.msra.mxu0 %v1703_v63  ;;  %1225 = vmatpush1.bf16.msra.mxu1 %v1705_v1  ;;  %v366_v63 = vld [vmem:[%s2006_s4 + $0x3f8] sm:$0xff]  ;;  %v1707_v1 = vcombine.low %v341_v52, %v349_v53 }
  0x92   : > { %1185 = vmatprep.subr.bf16.mxu0 %v1720_v2  ;;  %1226 = vmatprep.subr.bf16.mxu1 %v1722_v3  ;;  %v1709_v2 = vcombine.low %v342_v54, %v350_v55  ;;  %v1724_v3 = vcombine.high %v357_v60, %v365_v61  ;;  %v1726_v4 = vcombine.high %v358_v62, %v366_v63 }
  0x93   : > { %v1725_v6 = vcombine.low %v358_v62, %v366_v63 }
  0x95   : > { %1186 = vmatpush1.bf16.msra.mxu0 %v1719_v8  ;;  %1227 = vmatpush1.bf16.msra.mxu1 %v1721_v9 }
  0x96   : > { %1253 = vmatprep.subr.bf16.mxu0 %v1612_v10  ;;  %1294 = vmatprep.subr.bf16.mxu1 %v1614_v11 }
  0x98   : > { %1204 = vmatmul.mubr.bf16.vlgmr.msra.gmra.mrb[8].mxu0 %v2057_v12  ;;  %1245 = vmatmul.mubr.bf16.vlgmr.msra.gmra.mrb[8].mxu1 %v2057_v12 }
  0x99   : > { %1254 = vmatpush1.bf16.msra.mxu0 %v1611_v17  ;;  %1295 = vmatpush1.bf16.msra.mxu1 %v1613_v18 }
  0x9a   : > { %1255 = vmatprep.subr.bf16.mxu0 %v1628_v19  ;;  %1296 = vmatprep.subr.bf16.mxu1 %v1630_v20 }
  0x9b   : > { %1285 = vmatprep.mubr.bf16.mxu0 %v1891_v0  ;;  %1326 = vmatprep.mubr.bf16.mxu1 %v1891_v0  ;;  %v1661_v0 = vcombine.low %v294_v31, %v302_v32 }
  0x9d   : > { %1256 = vmatpush1.bf16.msra.mxu0 %v1627_v25  ;;  %1297 = vmatpush1.bf16.msra.mxu1 %v1629_v26 }
  0x9e   : > { %1257 = vmatprep.subr.bf16.mxu0 %v1644_v27  ;;  %1298 = vmatprep.subr.bf16.mxu1 %v1646_v28 }
  0xa1   : > { %1258 = vmatpush1.bf16.msra.mxu0 %v1643_v33  ;;  %1299 = vmatpush1.bf16.msra.mxu1 %v1645_v34 }
  0xa2   : > { %1259 = vmatprep.subr.bf16.mxu0 %v1660_v35  ;;  %1300 = vmatprep.subr.bf16.mxu1 %v1662_v36 }
  0xa5   : > { %1260 = vmatpush1.bf16.msra.mxu0 %v1659_v41  ;;  %1301 = vmatpush1.bf16.msra.mxu1 %v1661_v0 }
  0xa6   : > { %1261 = vmatprep.subr.bf16.mxu0 %v1676_v42  ;;  %1302 = vmatprep.subr.bf16.mxu1 %v1678_v43 }
  0xa9   : > { %1262 = vmatpush1.bf16.msra.mxu0 %v1675_v48  ;;  %1303 = vmatpush1.bf16.msra.mxu1 %v1677_v49 }
  0xaa   : > { %1263 = vmatprep.subr.bf16.mxu0 %v1692_v50  ;;  %1304 = vmatprep.subr.bf16.mxu1 %v1694_v51 }
  0xad   : > { %1264 = vmatpush1.bf16.msra.mxu0 %v1691_v56  ;;  %1305 = vmatpush1.bf16.msra.mxu1 %v1693_v57 }
  0xae   : > { %1265 = vmatprep.subr.bf16.mxu0 %v1708_v58  ;;  %1306 = vmatprep.subr.bf16.mxu1 %v1710_v59 }
  0xb1   : > { %1266 = vmatpush1.bf16.msra.mxu0 %v1707_v1  ;;  %1307 = vmatpush1.bf16.msra.mxu1 %v1709_v2 }
  0xb2   : > { %1267 = vmatprep.subr.bf16.mxu0 %v1724_v3  ;;  %1308 = vmatprep.subr.bf16.mxu1 %v1726_v4 }
  0xb5   : > { %1268 = vmatpush1.bf16.msra.mxu0 %v1723_v5  ;;  %1309 = vmatpush1.bf16.msra.mxu1 %v1725_v6 }
  0xb8   : > { %1286 = vmatmul.mubr.bf16.vlgmr.msra.gmra.mrb[12].mxu0 %v2057_v12  ;;  %1327 = vmatmul.mubr.bf16.vlgmr.msra.gmra.mrb[12].mxu1 %v2057_v12 }
 0x12b   : > { %v1041_v7 = vpop.f32.mrb[0].mxu0  ;;  %v1082_v9 = vpop.f32.mrb[0].mxu1 }
 0x12c   : > { %vm1335_vm0 = vcmp.ge.f32.partialorder %v1041_v7, 0.0  ;;  %v1351_v8 = vmul.f32 0.3, %v1041_v7  ;;  %v1043_v10 = vpop.f32.mrb[1].mxu0  ;;  %vm1337_vm1 = vcmp.ge.f32.partialorder %v1082_v9, 0.0  ;;  %v1084_v15 = vpop.f32.mrb[1].mxu1 }
 0x12d   : > { %v1353_v11 = vmul.f32 0.3, %v1082_v9  ;;  %vm1336_vm2 = vcmp.ge.f32.partialorder %v1043_v10, 0.0  ;;  %v1352_v13 = vmul.f32 0.3, %v1043_v10  ;;  %v1045_v16 = vpop.f32.mrb[2].mxu0 }
 0x12e   : > { %v1367_v14 = vsel %vm1335_vm0, %v1041_v7, %v1351_v8  ;;  %vm1338_vm3 = vcmp.ge.f32.partialorder %v1084_v15, 0.0  ;;  %v1354_v18 = vmul.f32 0.3, %v1084_v15  ;;  %v1086_v19 = vpop.f32.mrb[2].mxu1  ;;  %v1046_v20 = vpop.f32.mrb[3].mxu0 }
 0x12f   : > { %v1369_v17 = vsel %vm1337_vm1, %v1082_v9, %v1353_v11  ;;  %v1368_v12 = vsel %vm1336_vm2, %v1043_v10, %v1352_v13  ;;  %v1087_v22 = vpop.f32.mrb[3].mxu1 }
 0x130   : > { %v1738_v21 = vpack.c.bf16 %v1368_v12, %v1367_v14  ;;  %v1370_v23 = vsel %vm1338_vm3, %v1084_v15, %v1354_v18 }
 0x131   : > { %v1739_v24 = vpack.c.bf16 %v1370_v23, %v1369_v17 }
 0x132   : > { %1447 = vst [vmem:[%s2165_s12] sm:$0xff] %v1738_v21 }
 0x133   : > { %1448 = vst [vmem:[%s2165_s12 + $0x8] sm:$0xff] %v1739_v24 }
 0x14b   : > { %v1123_v25 = vpop.f32.mrb[4].mxu0  ;;  %v1164_v27 = vpop.f32.mrb[4].mxu1 }
 0x14c   : > { %vm1339_vm4 = vcmp.ge.f32.partialorder %v1123_v25, 0.0  ;;  %v1355_v26 = vmul.f32 0.3, %v1123_v25  ;;  %v1125_v28 = vpop.f32.mrb[5].mxu0  ;;  %vm1341_vm5 = vcmp.ge.f32.partialorder %v1164_v27, 0.0  ;;  %v1166_v32 = vpop.f32.mrb[5].mxu1 }
 0x14d   : > { %v1357_v29 = vmul.f32 0.3, %v1164_v27  ;;  %vm1340_vm6 = vcmp.ge.f32.partialorder %v1125_v28, 0.0  ;;  %v1356_v30 = vmul.f32 0.3, %v1125_v28  ;;  %v1127_v33 = vpop.f32.mrb[6].mxu0 }
 0x14e   : > { %v1371_v31 = vsel %vm1339_vm4, %v1123_v25, %v1355_v26  ;;  %vm1342_vm7 = vcmp.ge.f32.partialorder %v1166_v32, 0.0  ;;  %v1358_v36 = vmul.f32 0.3, %v1166_v32  ;;  %v1168_v37 = vpop.f32.mrb[6].mxu1  ;;  %v1128_v38 = vpop.f32.mrb[7].mxu0 }
 0x14f   : > { %v1373_v34 = vsel %vm1341_vm5, %v1164_v27, %v1357_v29  ;;  %v1372_v35 = vsel %vm1340_vm6, %v1125_v28, %v1356_v30  ;;  %v1169_v40 = vpop.f32.mrb[7].mxu1 }
 0x150   : > { %v1740_v39 = vpack.c.bf16 %v1372_v35, %v1371_v31  ;;  %v1374_v41 = vsel %vm1342_vm7, %v1166_v32, %v1358_v36 }
 0x151   : > { %v1741_v0 = vpack.c.bf16 %v1374_v41, %v1373_v34 }
 0x152   : > { %1449 = vst [vmem:[%s2165_s12 + $0x10] sm:$0xff] %v1740_v39 }
 0x153   : > { %1450 = vst [vmem:[%s2165_s12 + $0x18] sm:$0xff] %v1741_v0 }
 0x16b   : > { %v1205_v42 = vpop.f32.mrb[8].mxu0  ;;  %v1246_v44 = vpop.f32.mrb[8].mxu1 }
 0x16c   : > { %vm1343_vm8 = vcmp.ge.f32.partialorder %v1205_v42, 0.0  ;;  %v1359_v43 = vmul.f32 0.3, %v1205_v42  ;;  %v1207_v45 = vpop.f32.mrb[9].mxu0  ;;  %vm1345_vm9 = vcmp.ge.f32.partialorder %v1246_v44, 0.0  ;;  %v1248_v49 = vpop.f32.mrb[9].mxu1 }
 0x16d   : > { %v1361_v46 = vmul.f32 0.3, %v1246_v44  ;;  %vm1344_vm10 = vcmp.ge.f32.partialorder %v1207_v45, 0.0  ;;  %v1360_v47 = vmul.f32 0.3, %v1207_v45  ;;  %v1209_v50 = vpop.f32.mrb[10].mxu0 }
 0x16e   : > { %v1375_v48 = vsel %vm1343_vm8, %v1205_v42, %v1359_v43  ;;  %vm1346_vm11 = vcmp.ge.f32.partialorder %v1248_v49, 0.0  ;;  %v1362_v53 = vmul.f32 0.3, %v1248_v49  ;;  %v1250_v54 = vpop.f32.mrb[10].mxu1  ;;  %v1210_v55 = vpop.f32.mrb[11].mxu0 }
 0x16f   : > { %v1377_v51 = vsel %vm1345_vm9, %v1246_v44, %v1361_v46  ;;  %v1376_v52 = vsel %vm1344_vm10, %v1207_v45, %v1360_v47  ;;  %v1251_v57 = vpop.f32.mrb[11].mxu1 }
 0x170   : > { %v1742_v56 = vpack.c.bf16 %v1376_v52, %v1375_v48  ;;  %v1378_v58 = vsel %vm1346_vm11, %v1248_v49, %v1362_v53 }
 0x171   : > { %v1743_v59 = vpack.c.bf16 %v1378_v58, %v1377_v51 }
 0x172   : > { %1451 = vst [vmem:[%s2165_s12 + $0x20] sm:$0xff] %v1742_v56 }
 0x173   : > { %1452 = vst [vmem:[%s2165_s12 + $0x28] sm:$0xff] %v1743_v59 }
 0x18b   : > { %v1287_v60 = vpop.f32.mrb[12].mxu0  ;;  %v1328_v62 = vpop.f32.mrb[12].mxu1 }
 0x18c   : > { %vm1347_vm12 = vcmp.ge.f32.partialorder %v1287_v60, 0.0  ;;  %v1363_v61 = vmul.f32 0.3, %v1287_v60  ;;  %v1289_v63 = vpop.f32.mrb[13].mxu0  ;;  %vm1349_vm13 = vcmp.ge.f32.partialorder %v1328_v62, 0.0  ;;  %v1330_v4 = vpop.f32.mrb[13].mxu1 }
 0x18d   : > { %v1365_v1 = vmul.f32 0.3, %v1328_v62  ;;  %vm1348_vm14 = vcmp.ge.f32.partialorder %v1289_v63, 0.0  ;;  %v1364_v2 = vmul.f32 0.3, %v1289_v63  ;;  %v1291_v5 = vpop.f32.mrb[14].mxu0 }
 0x18e   : > { %v1379_v3 = vsel %vm1347_vm12, %v1287_v60, %v1363_v61  ;;  %vm1350_vm15 = vcmp.ge.f32.partialorder %v1330_v4, 0.0  ;;  %v1366_v8 = vmul.f32 0.3, %v1330_v4  ;;  %v1332_v9 = vpop.f32.mrb[14].mxu1  ;;  %v1292_v10 = vpop.f32.mrb[15].mxu0 }
 0x18f   : > { %v1381_v6 = vsel %vm1349_vm13, %v1328_v62, %v1365_v1  ;;  %v1380_v7 = vsel %vm1348_vm14, %v1289_v63, %v1364_v2  ;;  %v1333_v13 = vpop.f32.mrb[15].mxu1 }
 0x190   : > { %v1744_v11 = vpack.c.bf16 %v1380_v7, %v1379_v3  ;;  %v1382_v14 = vsel %vm1350_vm15, %v1330_v4, %v1366_v8 }
 0x191   : > { %v1745_v15 = vpack.c.bf16 %v1382_v14, %v1381_v6 }
 0x192   : > { %1453 = vst [vmem:[%s2165_s12 + $0x30] sm:$0xff] %v1744_v11 }
 0x193   : > { %1454 = vst [vmem:[%s2165_s12 + $0x38] sm:$0xff] %v1745_v15 }
 0x194 PF: > { %s15_s14 = sadd.s32 1, %s1885_s14   ;;  %s2200_s9 = smov %s1869_s10 }
 0x195   : > { %p12_p9 = scmp.ge.s32.totalorder %s15_s14, 10   ;;  %s2201_s10 = smov %s1873_s11 }
 0x196   : > { %s2202_s11 = smov %s1956_s21  ;;  %s2203_s12 = smov %s1881_s13 }
 0x197   : > { %s2204_s13 = smov %s2206_s16  ;;  %14 = sbr.rel (!%p12_p9) target bundleno = 4 (0x4), region = 71 }
 0x19e   :  { %1493 = vsyncpa [#allocation3], 1 }
 0x19f   :  { %1495 = vsyncpa [#allocation3 + $0x1], 1 }

// kernel: generator_forward.4
= control target key start
LH: loop header
LB: loop body
LE: loop exit
PB: predicated region body
PF: predicated region fallthrough
CT: control target
= control target key end

     0   :  { %s2372_s9 = smov 0   ;;  %s2374_s10 = smov 0   ;;  %s2606_s0 = inlined_call_operand.vmem [shape: bf16[4,128,1024], index: 0, kind: input, shape index: {}]   ;;  %s2607_s1 = inlined_call_operand.vmem [shape: bf16[4,1024,128], index: 1, kind: input, shape index: {}]   ;;  %s2608_s2 = inlined_call_operand.vmem [shape: bf16[4,128,128], index: 2, kind: output, shape index: {}]  }
   0x1   :  { %s2376_s11 = smov 0  }
   0x2 LB: > { %s31_s12 = sadd.s32 1, %s2351_s10  ;;  %p1770_p0 = scmp.ge.s32.totalorder %s2355_s11, 1  ;;  %s2355_s11 = sphi %s2376_s11, %s12_s11   ;;  %s2351_s10 = sphi %s2374_s10, %s2610_s10   ;;  %s2347_s9 = sphi %s2372_s9, %s2609_s9  }
   0x3   : > { %p33_p1 = scmp.ge.s32.totalorder %s31_s12, 4  ;;  %p158_p2 = scmp.lt.s32.totalorder %s2355_s11, 5 }
   0x5   : > { %s2612_s12 = smov (%p33_p1, %s31_s12), 0  ;;  %p159_p3 = pnand %p1770_p0, %p158_p2 }
   0x6   : > { %p201_p4 = scmp.lt.s32.totalorder (!%p159_p3), %s2347_s9, 3 }
   0x7   : > { %162 = sbr.rel (%p159_p3) target bundleno = 398 (0x18e), region = 28 }
   0xe   : > { %s2614_s9 = smov (!%p201_p4, %s2347_s9), 3 }
   0xf   : > { %s1923_s13 = sshll.u32 %s2614_s9, 9  ;;  %s1925_s20 = sshll.u32 %s2614_s9, 6 }
  0x10   : > { %s2398_s16 = scalar_lea.vmem %s2607_s1, %s1923_s13  ;;  %s2435_s19 = scalar_lea.vmem %s2606_s0, %s1923_s13 }
  0x11   : > { %v2269_v0 = vld [vmem:[%s2398_s16 + $0x40] sm:$0xff]   ;;  %v2273_v4 = vld [vmem:[%s2398_s16 + $0x48] sm:$0xff]   ;;  %v2277_v8 = vld [vmem:[%s2398_s16 + $0x50] sm:$0xff]   ;;  %s2573_s23 = scalar_lea.vmem %s2608_s2, %s1925_s20 }
  0x12   : > { %v2270_v1 = vld [vmem:[%s2398_s16 + $0xc0] sm:$0xff]   ;;  %1989 = vmatprep.subr.bf16.mxu0 %v2269_v0  ;;  %v2274_v5 = vld [vmem:[%s2398_s16 + $0xc8] sm:$0xff]   ;;  %v2278_v9 = vld [vmem:[%s2398_s16 + $0xd0] sm:$0xff]  }
  0x13   : > { %v2271_v2 = vld [vmem:[%s2398_s16] sm:$0xff]   ;;  %2053 = vmatprep.subr.bf16.mxu1 %v2270_v1  ;;  %v2275_v6 = vld [vmem:[%s2398_s16 + $0x8] sm:$0xff]   ;;  %v2279_v10 = vld [vmem:[%s2398_s16 + $0x10] sm:$0xff]  }
  0x14   : > { %v2272_v3 = vld [vmem:[%s2398_s16 + $0x80] sm:$0xff]   ;;  %1990 = vmatpush3.bf16.msra.mxu0 %v2271_v2  ;;  %v2276_v7 = vld [vmem:[%s2398_s16 + $0x88] sm:$0xff]   ;;  %v2280_v11 = vld [vmem:[%s2398_s16 + $0x90] sm:$0xff]  }
  0x15   : > { %2054 = vmatpush3.bf16.msra.mxu1 %v2272_v3  ;;  %1991 = vmatprep.subr.bf16.mxu0 %v2273_v4  ;;  %v2281_v12 = vld [vmem:[%s2398_s16 + $0x58] sm:$0xff]   ;;  %v2285_v16 = vld [vmem:[%s2398_s16 + $0x60] sm:$0xff]   ;;  %v2289_v20 = vld [vmem:[%s2398_s16 + $0x68] sm:$0xff]  }
  0x16   : > { %2055 = vmatprep.subr.bf16.mxu1 %v2274_v5  ;;  %v2282_v13 = vld [vmem:[%s2398_s16 + $0xd8] sm:$0xff]   ;;  %v2286_v17 = vld [vmem:[%s2398_s16 + $0xe0] sm:$0xff]   ;;  %v2290_v21 = vld [vmem:[%s2398_s16 + $0xe8] sm:$0xff]  }
  0x17   : > { %v2283_v14 = vld [vmem:[%s2398_s16 + $0x18] sm:$0xff]   ;;  %v2287_v18 = vld [vmem:[%s2398_s16 + $0x20] sm:$0xff]   ;;  %v2291_v22 = vld [vmem:[%s2398_s16 + $0x28] sm:$0xff]  }
  0x18   : > { %1992 = vmatpush3.bf16.msra.mxu0 %v2275_v6  ;;  %v2284_v15 = vld [vmem:[%s2398_s16 + $0x98] sm:$0xff]   ;;  %v2288_v19 = vld [vmem:[%s2398_s16 + $0xa0] sm:$0xff]   ;;  %v2292_v23 = vld [vmem:[%s2398_s16 + $0xa8] sm:$0xff]  }
  0x19   : > { %2056 = vmatpush3.bf16.msra.mxu1 %v2276_v7  ;;  %1993 = vmatprep.subr.bf16.mxu0 %v2277_v8  ;;  %v2293_v24 = vld [vmem:[%s2398_s16 + $0x70] sm:$0xff]   ;;  %v2297_v28 = vld [vmem:[%s2398_s16 + $0x78] sm:$0xff]   ;;  %v233_v32 = vld [vmem:[%s2435_s19] sm:$0xff] }
  0x1a   : > { %2057 = vmatprep.subr.bf16.mxu1 %v2278_v9  ;;  %v2294_v25 = vld [vmem:[%s2398_s16 + $0xf0] sm:$0xff]   ;;  %v2298_v29 = vld [vmem:[%s2398_s16 + $0xf8] sm:$0xff]   ;;  %v237_v33 = vld [vmem:[%s2435_s19 + $0x20] sm:$0xff] }
  0x1b   : > { %v2295_v26 = vld [vmem:[%s2398_s16 + $0x30] sm:$0xff]   ;;  %v2299_v30 = vld [vmem:[%s2398_s16 + $0x38] sm:$0xff]   ;;  %v234_v34 = vld [vmem:[%s2435_s19 + $0x8] sm:$0xff]  ;;  %v1777_v35 = vcombine.low %v233_v32, %v237_v33  ;;  %v1778_v36 = vcombine.high %v233_v32, %v237_v33 }
  0x1c   : > { %1994 = vmatpush3.bf16.msra.mxu0 %v2279_v10  ;;  %v2296_v27 = vld [vmem:[%s2398_s16 + $0xb0] sm:$0xff]   ;;  %v2300_v31 = vld [vmem:[%s2398_s16 + $0xb8] sm:$0xff]   ;;  %v238_v37 = vld [vmem:[%s2435_s19 + $0x28] sm:$0xff] }
  0x1d   : > { %2058 = vmatpush3.bf16.msra.mxu1 %v2280_v11  ;;  %1995 = vmatprep.subr.bf16.mxu0 %v2281_v12  ;;  %v1779_v38 = vcombine.low %v234_v34, %v238_v37  ;;  %v1780_v39 = vcombine.high %v234_v34, %v238_v37  ;;  %v2301_v40 = vld [vmem:[%s2398_s16 + $0x140] sm:$0xff]   ;;  %v242_v47 = vld [vmem:[%s2435_s19 + $0x48] sm:$0xff]  ;;  %v2309_v62 = vld [vmem:[%s2398_s16 + $0x150] sm:$0xff]  }
  0x1e   : > { %2059 = vmatprep.subr.bf16.mxu1 %v2282_v13  ;;  %1161 = vmatprep.mubr.bf16.mxu0 %v1778_v36  ;;  %v2302_v41 = vld [vmem:[%s2398_s16 + $0x100] sm:$0xff]   ;;  %v246_v48 = vld [vmem:[%s2435_s19 + $0x68] sm:$0xff]  ;;  %v2310_v63 = vld [vmem:[%s2398_s16 + $0x110] sm:$0xff]  }
  0x1f   : > { %1258 = vmatprep.mubr.bf16.mxu1 %v1780_v39  ;;  %v2303_v42 = vld [vmem:[%s2398_s16 + $0x1c0] sm:$0xff]   ;;  %v1788_v49 = vcombine.high %v242_v47, %v246_v48  ;;  %v2305_v50 = vld [vmem:[%s2398_s16 + $0x148] sm:$0xff]   ;;  %v1787_v53 = vcombine.low %v242_v47, %v246_v48  ;;  %v2311_v0 = vld [vmem:[%s2398_s16 + $0x1d0] sm:$0xff]  }
  0x20   : > { %1996 = vmatpush3.bf16.msra.mxu0 %v2283_v14  ;;  %v2304_v43 = vld [vmem:[%s2398_s16 + $0x180] sm:$0xff]   ;;  %v2306_v52 = vld [vmem:[%s2398_s16 + $0x108] sm:$0xff]   ;;  %v2312_v1 = vld [vmem:[%s2398_s16 + $0x190] sm:$0xff]  }
  0x21   : > { %2060 = vmatpush3.bf16.msra.mxu1 %v2284_v15  ;;  %1997 = vmatprep.subr.bf16.mxu0 %v2285_v16  ;;  %v241_v44 = vld [vmem:[%s2435_s19 + $0x40] sm:$0xff]  ;;  %v2307_v54 = vld [vmem:[%s2398_s16 + $0x1c8] sm:$0xff]   ;;  %v2313_v10 = vld [vmem:[%s2398_s16 + $0x158] sm:$0xff]  }
  0x22   : > { %2061 = vmatprep.subr.bf16.mxu1 %v2286_v17  ;;  %v245_v45 = vld [vmem:[%s2435_s19 + $0x60] sm:$0xff]  ;;  %v2308_v55 = vld [vmem:[%s2398_s16 + $0x188] sm:$0xff]   ;;  %v2314_v11 = vld [vmem:[%s2398_s16 + $0x118] sm:$0xff]  }
  0x23   : > { %v1786_v46 = vcombine.high %v241_v44, %v245_v45  ;;  %v1785_v51 = vcombine.low %v241_v44, %v245_v45  ;;  %v249_v56 = vld [vmem:[%s2435_s19 + $0x80] sm:$0xff]  ;;  %v250_v58 = vld [vmem:[%s2435_s19 + $0x88] sm:$0xff]  ;;  %v2315_v12 = vld [vmem:[%s2398_s16 + $0x1d8] sm:$0xff]  }
  0x24   : > { %1998 = vmatpush3.bf16.msra.mxu0 %v2287_v18  ;;  %v253_v57 = vld [vmem:[%s2435_s19 + $0xa0] sm:$0xff]  ;;  %v254_v59 = vld [vmem:[%s2435_s19 + $0xa8] sm:$0xff]  ;;  %v2316_v13 = vld [vmem:[%s2398_s16 + $0x198] sm:$0xff]  }
  0x25   : > { %2062 = vmatpush3.bf16.msra.mxu1 %v2288_v19  ;;  %1999 = vmatprep.subr.bf16.mxu0 %v2289_v20  ;;  %v1794_v60 = vcombine.high %v249_v56, %v253_v57  ;;  %v1796_v61 = vcombine.high %v250_v58, %v254_v59  ;;  %v1793_v2 = vcombine.low %v249_v56, %v253_v57  ;;  %v257_v3 = vld [vmem:[%s2435_s19 + $0xc0] sm:$0xff]  ;;  %v258_v5 = vld [vmem:[%s2435_s19 + $0xc8] sm:$0xff]  ;;  %v2326_v39 = vld [vmem:[%s2398_s16 + $0x130] sm:$0xff]  }
  0x26   : > { %2063 = vmatprep.subr.bf16.mxu1 %v2290_v21  ;;  %v261_v4 = vld [vmem:[%s2435_s19 + $0xe0] sm:$0xff]  ;;  %v1795_v6 = vcombine.low %v250_v58, %v254_v59  ;;  %v262_v8 = vld [vmem:[%s2435_s19 + $0xe8] sm:$0xff]  ;;  %v2330_v48 = vld [vmem:[%s2398_s16 + $0x138] sm:$0xff]  }
  0x27   : > { %v1802_v7 = vcombine.high %v257_v3, %v261_v4  ;;  %v1804_v9 = vcombine.high %v258_v5, %v262_v8  ;;  %v265_v14 = vld [vmem:[%s2435_s19 + $0x100] sm:$0xff]  ;;  %v266_v16 = vld [vmem:[%s2435_s19 + $0x108] sm:$0xff]  ;;  %v1801_v19 = vcombine.low %v257_v3, %v261_v4  ;;  %v1803_v21 = vcombine.low %v258_v5, %v262_v8  ;;  %v244_v8 = vld [vmem:[%s2435_s19 + $0x58] sm:$0xff] }
  0x28   : > { %2000 = vmatpush3.bf16.msra.mxu0 %v2291_v22  ;;  %v269_v15 = vld [vmem:[%s2435_s19 + $0x120] sm:$0xff]  ;;  %v270_v17 = vld [vmem:[%s2435_s19 + $0x128] sm:$0xff] }
  0x29   : > { %2064 = vmatpush3.bf16.msra.mxu1 %v2292_v23  ;;  %2001 = vmatprep.subr.bf16.mxu0 %v2293_v24  ;;  %v2317_v18 = vld [vmem:[%s2398_s16 + $0x160] sm:$0xff]   ;;  %v1810_v22 = vcombine.high %v265_v14, %v269_v15  ;;  %v1812_v24 = vcombine.high %v266_v16, %v270_v17  ;;  %v2323_v32 = vld [vmem:[%s2398_s16 + $0x1e8] sm:$0xff]   ;;  %v1809_v34 = vcombine.low %v265_v14, %v269_v15  ;;  %v251_v14 = vld [vmem:[%s2435_s19 + $0x90] sm:$0xff] }
  0x2a   : > { %2065 = vmatprep.subr.bf16.mxu1 %v2294_v25  ;;  %v2318_v20 = vld [vmem:[%s2398_s16 + $0x120] sm:$0xff]   ;;  %v2324_v33 = vld [vmem:[%s2398_s16 + $0x1a8] sm:$0xff]   ;;  %v255_v15 = vld [vmem:[%s2435_s19 + $0xb0] sm:$0xff] }
  0x2b   : > { %v2319_v23 = vld [vmem:[%s2398_s16 + $0x1e0] sm:$0xff]   ;;  %v282_v44 = vld [vmem:[%s2435_s19 + $0x188] sm:$0xff] }
  0x2c   : > { %2002 = vmatpush3.bf16.msra.mxu0 %v2295_v26  ;;  %v2320_v25 = vld [vmem:[%s2398_s16 + $0x1a0] sm:$0xff]   ;;  %v286_v45 = vld [vmem:[%s2435_s19 + $0x1a8] sm:$0xff] }
  0x2d   : > { %2066 = vmatpush3.bf16.msra.mxu1 %v2296_v27  ;;  %2003 = vmatprep.subr.bf16.mxu0 %v2297_v28  ;;  %v273_v26 = vld [vmem:[%s2435_s19 + $0x140] sm:$0xff]  ;;  %v2321_v28 = vld [vmem:[%s2398_s16 + $0x168] sm:$0xff]   ;;  %v1827_v59 = vcombine.low %v282_v44, %v286_v45 }
  0x2e   : > { %2067 = vmatprep.subr.bf16.mxu1 %v2298_v29  ;;  %v277_v27 = vld [vmem:[%s2435_s19 + $0x160] sm:$0xff]  ;;  %v274_v29 = vld [vmem:[%s2435_s19 + $0x148] sm:$0xff] }
  0x2f   : > { %v1818_v36 = vcombine.high %v273_v26, %v277_v27  ;;  %v1817_v47 = vcombine.low %v273_v26, %v277_v27  ;;  %v290_v56 = vld [vmem:[%s2435_s19 + $0x1c8] sm:$0xff]  ;;  %v1797_v26 = vcombine.low %v251_v14, %v255_v15 }
  0x30   : > { %2004 = vmatpush3.bf16.msra.mxu0 %v2299_v30  ;;  %v278_v30 = vld [vmem:[%s2435_s19 + $0x168] sm:$0xff] }
  0x31   : > { %2068 = vmatpush3.bf16.msra.mxu1 %v2300_v31  ;;  %2117 = vmatprep.subr.bf16.mxu0 %v2301_v40  ;;  %v2322_v31 = vld [vmem:[%s2398_s16 + $0x128] sm:$0xff]   ;;  %v1820_v37 = vcombine.high %v274_v29, %v278_v30  ;;  %v2327_v40 = vld [vmem:[%s2398_s16 + $0x1f0] sm:$0xff]  }
  0x32   : > { %2181 = vmatprep.subr.bf16.mxu1 %v2303_v42  ;;  %v285_v42 = vld [vmem:[%s2435_s19 + $0x1a0] sm:$0xff]  ;;  %v294_v57 = vld [vmem:[%s2435_s19 + $0x1e8] sm:$0xff] }
  0x33   : > { %1162 = vmatmul.mubr.bf16.vlgmr.msra.gmra.mrb[0].mxu0 %v1777_v35  ;;  %v1811_v35 = vcombine.low %v266_v16, %v270_v17  ;;  %v1835_v3 = vcombine.low %v290_v56, %v294_v57  ;;  %v252_v16 = vld [vmem:[%s2435_s19 + $0x98] sm:$0xff] }
  0x34   : > { %1259 = vmatmul.mubr.bf16.vlgmr.msra.gmra.mrb[0].mxu1 %v1779_v38  ;;  %2118 = vmatpush3.bf16.msra.mxu0 %v2302_v41  ;;  %v2325_v38 = vld [vmem:[%s2398_s16 + $0x170] sm:$0xff]   ;;  %v281_v41 = vld [vmem:[%s2435_s19 + $0x180] sm:$0xff]  ;;  %v256_v17 = vld [vmem:[%s2435_s19 + $0xb8] sm:$0xff] }
  0x35   : > { %2182 = vmatpush3.bf16.msra.mxu1 %v2304_v43  ;;  %1169 = vmatprep.mubr.bf16.mxu0 %v1786_v46  ;;  %v2328_v43 = vld [vmem:[%s2398_s16 + $0x1b0] sm:$0xff]   ;;  %v2329_v46 = vld [vmem:[%s2398_s16 + $0x178] sm:$0xff]   ;;  %v1825_v58 = vcombine.low %v281_v41, %v285_v42  ;;  %v1799_v27 = vcombine.low %v252_v16, %v256_v17 }
  0x36   : > { %1266 = vmatprep.mubr.bf16.mxu1 %v1788_v49  ;;  %2119 = vmatprep.subr.bf16.mxu0 %v2305_v50  ;;  %v1819_v49 = vcombine.low %v274_v29, %v278_v30  ;;  %v1826_v50 = vcombine.high %v281_v41, %v285_v42  ;;  %v267_v30 = vld [vmem:[%s2435_s19 + $0x110] sm:$0xff]  ;;  %v280_v41 = vld [vmem:[%s2435_s19 + $0x178] sm:$0xff] }
  0x37   : > { %2183 = vmatprep.subr.bf16.mxu1 %v2307_v54  ;;  %v289_v54 = vld [vmem:[%s2435_s19 + $0x1c0] sm:$0xff] }
  0x38   : > { %2120 = vmatpush3.bf16.msra.mxu0 %v2306_v52  ;;  %v1828_v52 = vcombine.high %v282_v44, %v286_v45 }
  0x39   : > { %2184 = vmatpush3.bf16.msra.mxu1 %v2308_v55  ;;  %2121 = vmatprep.subr.bf16.mxu0 %v2309_v62  ;;  %v293_v55 = vld [vmem:[%s2435_s19 + $0x1e0] sm:$0xff]  ;;  %v235_v62 = vld [vmem:[%s2435_s19 + $0x10] sm:$0xff] }
  0x3a   : > { %2185 = vmatprep.subr.bf16.mxu1 %v2311_v0  ;;  %v236_v0 = vld [vmem:[%s2435_s19 + $0x18] sm:$0xff] }
  0x3b   : > { %1170 = vmatmul.mubr.bf16.gmra.mrb[4].mxu0 %v1785_v51  ;;  %v2331_v51 = vld [vmem:[%s2398_s16 + $0x1f8] sm:$0xff]  }
  0x3c   : > { %1267 = vmatmul.mubr.bf16.gmra.mrb[4].mxu1 %v1787_v53  ;;  %1177 = vmatprep.mubr.bf16.mxu0 %v1794_v60  ;;  %v2332_v53 = vld [vmem:[%s2398_s16 + $0x1b8] sm:$0xff]   ;;  %v1834_v60 = vcombine.high %v289_v54, %v293_v55 }
  0x3d   : > { %1274 = vmatprep.mubr.bf16.mxu1 %v1796_v61  ;;  %2122 = vmatpush3.bf16.msra.mxu0 %v2310_v63  ;;  %v1836_v61 = vcombine.high %v290_v56, %v294_v57  ;;  %v239_v63 = vld [vmem:[%s2435_s19 + $0x30] sm:$0xff]  ;;  %v292_v56 = vld [vmem:[%s2435_s19 + $0x1d8] sm:$0xff] }
  0x3e   : > { %2186 = vmatpush3.bf16.msra.mxu1 %v2312_v1  ;;  %2123 = vmatprep.subr.bf16.mxu0 %v2313_v10  ;;  %v240_v1 = vld [vmem:[%s2435_s19 + $0x38] sm:$0xff]  ;;  %v1782_v4 = vcombine.high %v235_v62, %v239_v63  ;;  %v1781_v10 = vcombine.low %v235_v62, %v239_v63 }
  0x3f   : > { %2187 = vmatprep.subr.bf16.mxu1 %v2315_v12  ;;  %v1784_v5 = vcombine.high %v236_v0, %v240_v1  ;;  %v296_v57 = vld [vmem:[%s2435_s19 + $0x1f8] sm:$0xff] }
  0x40   : > { %v1839_v63 = vcombine.low %v292_v56, %v296_v57 }
  0x41   : > { %2124 = vmatpush3.bf16.msra.mxu0 %v2314_v11  ;;  %v1783_v11 = vcombine.low %v236_v0, %v240_v1 }
  0x42   : > { %2188 = vmatpush3.bf16.msra.mxu1 %v2316_v13  ;;  %2125 = vmatprep.subr.bf16.mxu0 %v2317_v18 }
  0x43   : > { %1178 = vmatmul.mubr.bf16.gmra.mrb[8].mxu0 %v1793_v2  ;;  %2189 = vmatprep.subr.bf16.mxu1 %v2319_v23  ;;  %v1833_v2 = vcombine.low %v289_v54, %v293_v55  ;;  %v263_v23 = vld [vmem:[%s2435_s19 + $0xf0] sm:$0xff] }
  0x44   : > { %1275 = vmatmul.mubr.bf16.gmra.mrb[8].mxu1 %v1795_v6  ;;  %1185 = vmatprep.mubr.bf16.mxu0 %v1802_v7  ;;  %v243_v6 = vld [vmem:[%s2435_s19 + $0x50] sm:$0xff] }
  0x45   : > { %1282 = vmatprep.mubr.bf16.mxu1 %v1804_v9  ;;  %2126 = vmatpush3.bf16.msra.mxu0 %v2318_v20  ;;  %v247_v7 = vld [vmem:[%s2435_s19 + $0x70] sm:$0xff]  ;;  %v248_v9 = vld [vmem:[%s2435_s19 + $0x78] sm:$0xff]  ;;  %v1798_v20 = vcombine.high %v251_v14, %v255_v15 }
  0x46   : > { %2190 = vmatpush3.bf16.msra.mxu1 %v2320_v25  ;;  %2127 = vmatprep.subr.bf16.mxu0 %v2321_v28  ;;  %v1790_v12 = vcombine.high %v243_v6, %v247_v7  ;;  %v1792_v13 = vcombine.high %v244_v8, %v248_v9  ;;  %v1789_v18 = vcombine.low %v243_v6, %v247_v7  ;;  %v264_v25 = vld [vmem:[%s2435_s19 + $0xf8] sm:$0xff]  ;;  %v291_v54 = vld [vmem:[%s2435_s19 + $0x1d0] sm:$0xff] }
  0x47   : > { %2191 = vmatprep.subr.bf16.mxu1 %v2323_v32  ;;  %v268_v32 = vld [vmem:[%s2435_s19 + $0x118] sm:$0xff]  ;;  %v295_v55 = vld [vmem:[%s2435_s19 + $0x1f0] sm:$0xff] }
  0x48   : > { %v1837_v62 = vcombine.low %v291_v54, %v295_v55 }
  0x49   : > { %2128 = vmatpush3.bf16.msra.mxu0 %v2322_v31  ;;  %v271_v31 = vld [vmem:[%s2435_s19 + $0x130] sm:$0xff] }
  0x4a   : > { %2192 = vmatpush3.bf16.msra.mxu1 %v2324_v33  ;;  %2129 = vmatprep.subr.bf16.mxu0 %v2325_v38  ;;  %v272_v33 = vld [vmem:[%s2435_s19 + $0x138] sm:$0xff]  ;;  %v275_v38 = vld [vmem:[%s2435_s19 + $0x150] sm:$0xff]  ;;  %v1813_v42 = vcombine.low %v267_v30, %v271_v31 }
  0x4b   : > { %1186 = vmatmul.mubr.bf16.gmra.mrb[12].mxu0 %v1801_v19  ;;  %2193 = vmatprep.subr.bf16.mxu1 %v2327_v40  ;;  %v1791_v19 = vcombine.low %v244_v8, %v248_v9  ;;  %v276_v40 = vld [vmem:[%s2435_s19 + $0x158] sm:$0xff] }
  0x4c   : > { %1283 = vmatmul.mubr.bf16.gmra.mrb[12].mxu1 %v1803_v21  ;;  %1193 = vmatprep.mubr.bf16.mxu0 %v1810_v22  ;;  %v1800_v21 = vcombine.high %v252_v16, %v256_v17  ;;  %v259_v22 = vld [vmem:[%s2435_s19 + $0xd0] sm:$0xff]  ;;  %v1824_v45 = vcombine.high %v276_v40, %v280_v41 }
  0x4d   : > { %1290 = vmatprep.mubr.bf16.mxu1 %v1812_v24  ;;  %2130 = vmatpush3.bf16.msra.mxu0 %v2326_v39  ;;  %v260_v24 = vld [vmem:[%s2435_s19 + $0xd8] sm:$0xff]  ;;  %v1806_v28 = vcombine.high %v259_v22, %v263_v23  ;;  %v279_v39 = vld [vmem:[%s2435_s19 + $0x170] sm:$0xff] }
  0x4e   : > { %2194 = vmatpush3.bf16.msra.mxu1 %v2328_v43  ;;  %2131 = vmatprep.subr.bf16.mxu0 %v2329_v46  ;;  %v1808_v29 = vcombine.high %v260_v24, %v264_v25  ;;  %v1815_v43 = vcombine.low %v268_v32, %v272_v33  ;;  %v1822_v44 = vcombine.high %v275_v38, %v279_v39  ;;  %v283_v46 = vld [vmem:[%s2435_s19 + $0x190] sm:$0xff] }
  0x4f   : > { %2195 = vmatprep.subr.bf16.mxu1 %v2331_v51  ;;  %v1823_v51 = vcombine.low %v276_v40, %v280_v41 }
  0x51   : > { %2132 = vmatpush3.bf16.msra.mxu0 %v2330_v48  ;;  %v284_v48 = vld [vmem:[%s2435_s19 + $0x198] sm:$0xff] }
  0x52   : > { %2196 = vmatpush3.bf16.msra.mxu1 %v2332_v53 }
  0x53   : > { %1194 = vmatmul.mubr.bf16.gmra.mrb[16].mxu0 %v1809_v34  ;;  %v1805_v34 = vcombine.low %v259_v22, %v263_v23 }
  0x54   : > { %1291 = vmatmul.mubr.bf16.gmra.mrb[16].mxu1 %v1811_v35  ;;  %1201 = vmatprep.mubr.bf16.mxu0 %v1818_v36  ;;  %v1807_v35 = vcombine.low %v260_v24, %v264_v25  ;;  %v1814_v36 = vcombine.high %v267_v30, %v271_v31 }
  0x55   : > { %1298 = vmatprep.mubr.bf16.mxu1 %v1820_v37  ;;  %v1816_v37 = vcombine.high %v268_v32, %v272_v33 }
  0x5b   : > { %1202 = vmatmul.mubr.bf16.gmra.mrb[20].mxu0 %v1817_v47  ;;  %v287_v47 = vld [vmem:[%s2435_s19 + $0x1b0] sm:$0xff] }
  0x5c   : > { %1299 = vmatmul.mubr.bf16.gmra.mrb[20].mxu1 %v1819_v49  ;;  %1209 = vmatprep.mubr.bf16.mxu0 %v1826_v50  ;;  %v288_v49 = vld [vmem:[%s2435_s19 + $0x1b8] sm:$0xff]  ;;  %v1821_v50 = vcombine.low %v275_v38, %v279_v39 }
  0x5d   : > { %1306 = vmatprep.mubr.bf16.mxu1 %v1828_v52  ;;  %v1830_v52 = vcombine.high %v283_v46, %v287_v47  ;;  %v1832_v53 = vcombine.high %v284_v48, %v288_v49 }
  0x63   : > { %1210 = vmatmul.mubr.bf16.gmra.mrb[24].mxu0 %v1825_v58  ;;  %v1829_v58 = vcombine.low %v283_v46, %v287_v47 }
  0x64   : > { %1307 = vmatmul.mubr.bf16.gmra.mrb[24].mxu1 %v1827_v59  ;;  %1217 = vmatprep.mubr.bf16.mxu0 %v1834_v60  ;;  %v1831_v59 = vcombine.low %v284_v48, %v288_v49  ;;  %v1838_v60 = vcombine.high %v291_v54, %v295_v55 }
  0x65   : > { %1314 = vmatprep.mubr.bf16.mxu1 %v1836_v61  ;;  %v1840_v61 = vcombine.high %v292_v56, %v296_v57 }
  0x6b   : > { %1218 = vmatmul.mubr.bf16.gmra.mrb[28].mxu0 %v1833_v2 }
  0x6c   : > { %1315 = vmatmul.mubr.bf16.gmra.mrb[28].mxu1 %v1835_v3  ;;  %1355 = vmatprep.mubr.bf16.mxu0 %v1782_v4 }
  0x6d   : > { %1452 = vmatprep.mubr.bf16.mxu1 %v1784_v5 }
  0x73   : > { %1356 = vmatmul.mubr.bf16.vlgmr.msra.gmra.mrb[32].mxu0 %v1781_v10 }
  0x74   : > { %1453 = vmatmul.mubr.bf16.vlgmr.msra.gmra.mrb[32].mxu1 %v1783_v11  ;;  %1363 = vmatprep.mubr.bf16.mxu0 %v1790_v12 }
  0x75   : > { %1460 = vmatprep.mubr.bf16.mxu1 %v1792_v13 }
  0x7b   : > { %1364 = vmatmul.mubr.bf16.gmra.mrb[36].mxu0 %v1789_v18 }
  0x7c   : > { %1461 = vmatmul.mubr.bf16.gmra.mrb[36].mxu1 %v1791_v19  ;;  %1371 = vmatprep.mubr.bf16.mxu0 %v1798_v20 }
  0x7d   : > { %1468 = vmatprep.mubr.bf16.mxu1 %v1800_v21 }
  0x83   : > { %1372 = vmatmul.mubr.bf16.gmra.mrb[40].mxu0 %v1797_v26 }
  0x84   : > { %1469 = vmatmul.mubr.bf16.gmra.mrb[40].mxu1 %v1799_v27  ;;  %1379 = vmatprep.mubr.bf16.mxu0 %v1806_v28 }
  0x85   : > { %1476 = vmatprep.mubr.bf16.mxu1 %v1808_v29 }
  0x8b   : > { %1380 = vmatmul.mubr.bf16.gmra.mrb[44].mxu0 %v1805_v34 }
  0x8c   : > { %1477 = vmatmul.mubr.bf16.gmra.mrb[44].mxu1 %v1807_v35  ;;  %1387 = vmatprep.mubr.bf16.mxu0 %v1814_v36 }
  0x8d   : > { %1484 = vmatprep.mubr.bf16.mxu1 %v1816_v37 }
  0x93   : > { %1388 = vmatmul.mubr.bf16.gmra.mrb[48].mxu0 %v1813_v42 }
  0x94   : > { %1485 = vmatmul.mubr.bf16.gmra.mrb[48].mxu1 %v1815_v43  ;;  %1395 = vmatprep.mubr.bf16.mxu0 %v1822_v44 }
  0x95   : > { %1492 = vmatprep.mubr.bf16.mxu1 %v1824_v45 }
  0x9b   : > { %1396 = vmatmul.mubr.bf16.gmra.mrb[52].mxu0 %v1821_v50 }
  0x9c   : > { %1493 = vmatmul.mubr.bf16.gmra.mrb[52].mxu1 %v1823_v51  ;;  %1403 = vmatprep.mubr.bf16.mxu0 %v1830_v52 }
  0x9d   : > { %1500 = vmatprep.mubr.bf16.mxu1 %v1832_v53 }
  0xa3   : > { %1404 = vmatmul.mubr.bf16.gmra.mrb[56].mxu0 %v1829_v58 }
  0xa4   : > { %1501 = vmatmul.mubr.bf16.gmra.mrb[56].mxu1 %v1831_v59  ;;  %1411 = vmatprep.mubr.bf16.mxu0 %v1838_v60 }
  0xa5   : > { %1508 = vmatprep.mubr.bf16.mxu1 %v1840_v61 }
  0xab   : > { %1412 = vmatmul.mubr.bf16.gmra.mrb[60].mxu0 %v1837_v62 }
  0xac   : > { %1509 = vmatmul.mubr.bf16.gmra.mrb[60].mxu1 %v1839_v63 }
 0x106   : > { %v2005_v0 = vpop.f32.mrb[0].mxu0 }
 0x107   : > { %v2069_v1 = vpop.f32.mrb[0].mxu1  ;;  %v2006_v2 = vpop.f32.mrb[1].mxu0 }
 0x108   : > { %v2007_v3 = vadd.f32 %v2006_v2, %v2005_v0  ;;  %v2070_v4 = vpop.f32.mrb[1].mxu1  ;;  %v2008_v5 = vpop.f32.mrb[2].mxu0 }
 0x109   : > { %v2071_v6 = vadd.f32 %v2070_v4, %v2069_v1  ;;  %v2072_v7 = vpop.f32.mrb[2].mxu1  ;;  %v2009_v8 = vpop.f32.mrb[3].mxu0 }
 0x10a   : > { %v2010_v9 = vadd.f32 %v2009_v8, %v2008_v5  ;;  %v2073_v10 = vpop.f32.mrb[3].mxu1 }
 0x10b   : > { %v2535_v11 = vadd.f32 %v2071_v6, %v2007_v3  ;;  %v2074_v12 = vadd.f32 %v2073_v10, %v2072_v7 }
 0x10d   : > { %v2537_v13 = vadd.f32 %v2074_v12, %v2010_v9 }
 0x10e   : > { %v2011_v14 = vpop.f32.mrb[4].mxu0 }
 0x10f   : > { %v2075_v15 = vpop.f32.mrb[4].mxu1  ;;  %v2012_v16 = vpop.f32.mrb[5].mxu0 }
 0x110   : > { %v2013_v17 = vadd.f32 %v2012_v16, %v2011_v14  ;;  %v2076_v18 = vpop.f32.mrb[5].mxu1  ;;  %v2014_v19 = vpop.f32.mrb[6].mxu0 }
 0x111   : > { %v2077_v20 = vadd.f32 %v2076_v18, %v2075_v15  ;;  %v2078_v21 = vpop.f32.mrb[6].mxu1  ;;  %v2015_v22 = vpop.f32.mrb[7].mxu0 }
 0x112   : > { %v2016_v23 = vadd.f32 %v2015_v22, %v2014_v19  ;;  %v2079_v24 = vpop.f32.mrb[7].mxu1 }
 0x113   : > { %v2539_v25 = vadd.f32 %v2077_v20, %v2013_v17  ;;  %v2080_v26 = vadd.f32 %v2079_v24, %v2078_v21 }
 0x115   : > { %v2541_v27 = vadd.f32 %v2080_v26, %v2016_v23 }
 0x116   : > { %v2017_v28 = vpop.f32.mrb[8].mxu0 }
 0x117   : > { %v2081_v29 = vpop.f32.mrb[8].mxu1  ;;  %v2018_v30 = vpop.f32.mrb[9].mxu0 }
 0x118   : > { %v2019_v31 = vadd.f32 %v2018_v30, %v2017_v28  ;;  %v2082_v32 = vpop.f32.mrb[9].mxu1  ;;  %v2020_v33 = vpop.f32.mrb[10].mxu0 }
 0x119   : > { %v2083_v34 = vadd.f32 %v2082_v32, %v2081_v29  ;;  %v2084_v35 = vpop.f32.mrb[10].mxu1  ;;  %v2021_v36 = vpop.f32.mrb[11].mxu0 }
 0x11a   : > { %v2022_v37 = vadd.f32 %v2021_v36, %v2020_v33  ;;  %v2085_v38 = vpop.f32.mrb[11].mxu1 }
 0x11b   : > { %v2543_v39 = vadd.f32 %v2083_v34, %v2019_v31  ;;  %v2086_v40 = vadd.f32 %v2085_v38, %v2084_v35 }
 0x11d   : > { %v2545_v41 = vadd.f32 %v2086_v40, %v2022_v37 }
 0x11e   : > { %v2023_v42 = vpop.f32.mrb[12].mxu0 }
 0x11f   : > { %v2087_v43 = vpop.f32.mrb[12].mxu1  ;;  %v2024_v44 = vpop.f32.mrb[13].mxu0 }
 0x120   : > { %v2025_v45 = vadd.f32 %v2024_v44, %v2023_v42  ;;  %v2088_v46 = vpop.f32.mrb[13].mxu1  ;;  %v2026_v47 = vpop.f32.mrb[14].mxu0 }
 0x121   : > { %v2089_v48 = vadd.f32 %v2088_v46, %v2087_v43  ;;  %v2090_v49 = vpop.f32.mrb[14].mxu1  ;;  %v2027_v50 = vpop.f32.mrb[15].mxu0 }
 0x122   : > { %v2028_v51 = vadd.f32 %v2027_v50, %v2026_v47  ;;  %v2091_v52 = vpop.f32.mrb[15].mxu1 }
 0x123   : > { %v2547_v53 = vadd.f32 %v2089_v48, %v2025_v45  ;;  %v2092_v54 = vadd.f32 %v2091_v52, %v2090_v49 }
 0x125   : > { %v2549_v55 = vadd.f32 %v2092_v54, %v2028_v51 }
 0x126   : > { %v2029_v56 = vpop.f32.mrb[16].mxu0 }
 0x127   : > { %v2093_v57 = vpop.f32.mrb[16].mxu1  ;;  %v2030_v58 = vpop.f32.mrb[17].mxu0 }
 0x128   : > { %v2031_v59 = vadd.f32 %v2030_v58, %v2029_v56  ;;  %v2094_v60 = vpop.f32.mrb[17].mxu1  ;;  %v2032_v61 = vpop.f32.mrb[18].mxu0 }
 0x129   : > { %v2095_v62 = vadd.f32 %v2094_v60, %v2093_v57  ;;  %v2096_v63 = vpop.f32.mrb[18].mxu1  ;;  %v2033_v0 = vpop.f32.mrb[19].mxu0 }
 0x12a   : > { %v2034_v1 = vadd.f32 %v2033_v0, %v2032_v61  ;;  %v2097_v2 = vpop.f32.mrb[19].mxu1 }
 0x12b   : > { %v2551_v3 = vadd.f32 %v2095_v62, %v2031_v59  ;;  %v2098_v4 = vadd.f32 %v2097_v2, %v2096_v63 }
 0x12d   : > { %v2553_v5 = vadd.f32 %v2098_v4, %v2034_v1 }
 0x12e   : > { %v2035_v6 = vpop.f32.mrb[20].mxu0 }
 0x12f   : > { %v2099_v7 = vpop.f32.mrb[20].mxu1  ;;  %v2036_v8 = vpop.f32.mrb[21].mxu0 }
 0x130   : > { %v2037_v9 = vadd.f32 %v2036_v8, %v2035_v6  ;;  %v2100_v10 = vpop.f32.mrb[21].mxu1  ;;  %v2038_v12 = vpop.f32.mrb[22].mxu0 }
 0x131   : > { %v2101_v14 = vadd.f32 %v2100_v10, %v2099_v7  ;;  %v2102_v15 = vpop.f32.mrb[22].mxu1  ;;  %v2039_v16 = vpop.f32.mrb[23].mxu0 }
 0x132   : > { %v2040_v17 = vadd.f32 %v2039_v16, %v2038_v12  ;;  %v2103_v18 = vpop.f32.mrb[23].mxu1 }
 0x133   : > { %v2555_v19 = vadd.f32 %v2101_v14, %v2037_v9  ;;  %v2104_v20 = vadd.f32 %v2103_v18, %v2102_v15 }
 0x135   : > { %v2557_v21 = vadd.f32 %v2104_v20, %v2040_v17 }
 0x136   : > { %v2041_v22 = vpop.f32.mrb[24].mxu0 }
 0x137   : > { %v2105_v23 = vpop.f32.mrb[24].mxu1  ;;  %v2042_v24 = vpop.f32.mrb[25].mxu0 }
 0x138   : > { %v2043_v26 = vadd.f32 %v2042_v24, %v2041_v22  ;;  %v2106_v28 = vpop.f32.mrb[25].mxu1  ;;  %v2044_v29 = vpop.f32.mrb[26].mxu0 }
 0x139   : > { %v2107_v30 = vadd.f32 %v2106_v28, %v2105_v23  ;;  %v2108_v31 = vpop.f32.mrb[26].mxu1  ;;  %v2045_v32 = vpop.f32.mrb[27].mxu0 }
 0x13a   : > { %v2046_v33 = vadd.f32 %v2045_v32, %v2044_v29  ;;  %v2109_v34 = vpop.f32.mrb[27].mxu1 }
 0x13b   : > { %v2559_v35 = vadd.f32 %v2107_v30, %v2043_v26  ;;  %v2110_v36 = vadd.f32 %v2109_v34, %v2108_v31 }
 0x13d   : > { %v2561_v37 = vadd.f32 %v2110_v36, %v2046_v33 }
 0x13e   : > { %v2047_v38 = vpop.f32.mrb[28].mxu0 }
 0x13f   : > { %v2111_v40 = vpop.f32.mrb[28].mxu1  ;;  %v2048_v42 = vpop.f32.mrb[29].mxu0 }
 0x140   : > { %v2049_v43 = vadd.f32 %v2048_v42, %v2047_v38  ;;  %v2112_v44 = vpop.f32.mrb[29].mxu1  ;;  %v2050_v45 = vpop.f32.mrb[30].mxu0 }
 0x141   : > { %v2113_v46 = vadd.f32 %v2112_v44, %v2111_v40  ;;  %v2114_v47 = vpop.f32.mrb[30].mxu1  ;;  %v2051_v48 = vpop.f32.mrb[31].mxu0 }
 0x142   : > { %v2052_v49 = vadd.f32 %v2051_v48, %v2050_v45  ;;  %v2115_v50 = vpop.f32.mrb[31].mxu1 }
 0x143   : > { %v2563_v51 = vadd.f32 %v2113_v46, %v2049_v43  ;;  %v2116_v52 = vadd.f32 %v2115_v50, %v2114_v47 }
 0x145   : > { %v2565_v54 = vadd.f32 %v2116_v52, %v2052_v49 }
 0x146   : > { %v2133_v56 = vpop.f32.mrb[32].mxu0 }
 0x147   : > { %v2197_v57 = vpop.f32.mrb[32].mxu1  ;;  %v2134_v58 = vpop.f32.mrb[33].mxu0 }
 0x148   : > { %v2135_v59 = vadd.f32 %v2134_v58, %v2133_v56  ;;  %v2198_v60 = vpop.f32.mrb[33].mxu1  ;;  %v2136_v61 = vpop.f32.mrb[34].mxu0 }
 0x149   : > { %v2199_v62 = vadd.f32 %v2198_v60, %v2197_v57  ;;  %v2200_v63 = vpop.f32.mrb[34].mxu1  ;;  %v2137_v0 = vpop.f32.mrb[35].mxu0 }
 0x14a   : > { %v1358_v1 = vadd.f32 %v2135_v59, %v2535_v11  ;;  %v2138_v2 = vadd.f32 %v2137_v0, %v2136_v61  ;;  %v2201_v4 = vpop.f32.mrb[35].mxu1 }
 0x14b   : > { %v2202_v6 = vadd.f32 %v2201_v4, %v2200_v63 }
 0x14c   : > { %v1455_v7 = vadd.f32 %v2199_v62, %v1358_v1  ;;  %v1361_v8 = vadd.f32 %v2138_v2, %v2537_v13 }
 0x14e   : > { %v1533_v9 = vmul.f32 0.3, %v1455_v7  ;;  %v1458_v10 = vadd.f32 %v2202_v6, %v1361_v8  ;;  %v2139_v12 = vpop.f32.mrb[36].mxu0  ;;  %vm1517_vm0 = vcmp.ge.f32.partialorder %v1455_v7, 0.0 }
 0x14f   : > { %v2203_v14 = vpop.f32.mrb[36].mxu1  ;;  %v2140_v15 = vpop.f32.mrb[37].mxu0 }
 0x150   : > { %vm1518_vm1 = vcmp.ge.f32.partialorder %v1458_v10, 0.0  ;;  %v1534_v16 = vmul.f32 0.3, %v1458_v10  ;;  %v2141_v17 = vadd.f32 %v2140_v15, %v2139_v12  ;;  %v2204_v18 = vpop.f32.mrb[37].mxu1  ;;  %v2142_v20 = vpop.f32.mrb[38].mxu0  ;;  %v1549_v24 = vsel %vm1517_vm0, %v1455_v7, %v1533_v9 }
 0x151   : > { %v2205_v22 = vadd.f32 %v2204_v18, %v2203_v14  ;;  %v2206_v11 = vpop.f32.mrb[38].mxu1  ;;  %v2143_v23 = vpop.f32.mrb[39].mxu0 }
 0x152   : > { %v1550_v13 = vsel %vm1518_vm1, %v1458_v10, %v1534_v16  ;;  %v1366_v26 = vadd.f32 %v2141_v17, %v2539_v25  ;;  %v2144_v28 = vadd.f32 %v2143_v23, %v2142_v20  ;;  %v2207_v29 = vpop.f32.mrb[39].mxu1 }
 0x153   : > { %v1945_v30 = vpack.c.bf16 %v1550_v13, %v1549_v24  ;;  %v2208_v31 = vadd.f32 %v2207_v29, %v2206_v11 }
 0x154   : > { %v1463_v32 = vadd.f32 %v2205_v22, %v1366_v26  ;;  %v1369_v33 = vadd.f32 %v2144_v28, %v2541_v27 }
 0x155   : > { %1946 = vst [vmem:[%s2573_s23] sm:$0xff] %v1945_v30  }
 0x156   : > { %v1535_v34 = vmul.f32 0.3, %v1463_v32  ;;  %v1466_v36 = vadd.f32 %v2208_v31, %v1369_v33  ;;  %v2145_v38 = vpop.f32.mrb[40].mxu0  ;;  %vm1519_vm2 = vcmp.ge.f32.partialorder %v1463_v32, 0.0 }
 0x157   : > { %v2209_v40 = vpop.f32.mrb[40].mxu1  ;;  %v2146_v42 = vpop.f32.mrb[41].mxu0 }
 0x158   : > { %vm1520_vm3 = vcmp.ge.f32.partialorder %v1466_v36, 0.0  ;;  %v1536_v43 = vmul.f32 0.3, %v1466_v36  ;;  %v2147_v44 = vadd.f32 %v2146_v42, %v2145_v38  ;;  %v2210_v45 = vpop.f32.mrb[41].mxu1  ;;  %v2148_v25 = vpop.f32.mrb[42].mxu0  ;;  %v1551_v49 = vsel %vm1519_vm2, %v1463_v32, %v1535_v34 }
 0x159   : > { %v2211_v46 = vadd.f32 %v2210_v45, %v2209_v40  ;;  %v2212_v47 = vpop.f32.mrb[42].mxu1  ;;  %v2149_v48 = vpop.f32.mrb[43].mxu0 }
 0x15a   : > { %v1552_v50 = vsel %vm1520_vm3, %v1466_v36, %v1536_v43  ;;  %v1374_v27 = vadd.f32 %v2147_v44, %v2543_v39  ;;  %v2150_v52 = vadd.f32 %v2149_v48, %v2148_v25  ;;  %v2213_v56 = vpop.f32.mrb[43].mxu1 }
 0x15b   : > { %v1950_v57 = vpack.c.bf16 %v1552_v50, %v1551_v49  ;;  %v2214_v58 = vadd.f32 %v2213_v56, %v2212_v47 }
 0x15c   : > { %v1471_v59 = vadd.f32 %v2211_v46, %v1374_v27  ;;  %v1377_v60 = vadd.f32 %v2150_v52, %v2545_v41 }
 0x15d   : > { %1982 = vst [vmem:[%s2573_s23 + $0x8] sm:$0xff] %v1950_v57  }
 0x15e   : > { %v1537_v61 = vmul.f32 0.3, %v1471_v59  ;;  %v1474_v62 = vadd.f32 %v2214_v58, %v1377_v60  ;;  %v2151_v63 = vpop.f32.mrb[44].mxu0  ;;  %vm1521_vm4 = vcmp.ge.f32.partialorder %v1471_v59, 0.0 }
 0x15f   : > { %v2215_v0 = vpop.f32.mrb[44].mxu1  ;;  %v2152_v1 = vpop.f32.mrb[45].mxu0 }
 0x160   : > { %vm1522_vm5 = vcmp.ge.f32.partialorder %v1474_v62, 0.0  ;;  %v1538_v2 = vmul.f32 0.3, %v1474_v62  ;;  %v2153_v4 = vadd.f32 %v2152_v1, %v2151_v63  ;;  %v2216_v6 = vpop.f32.mrb[45].mxu1  ;;  %v2154_v39 = vpop.f32.mrb[46].mxu0  ;;  %v1553_v10 = vsel %vm1521_vm4, %v1471_v59, %v1537_v61 }
 0x161   : > { %v2217_v7 = vadd.f32 %v2216_v6, %v2215_v0  ;;  %v2218_v8 = vpop.f32.mrb[46].mxu1  ;;  %v2155_v9 = vpop.f32.mrb[47].mxu0 }
 0x162   : > { %v1554_v12 = vsel %vm1522_vm5, %v1474_v62, %v1538_v2  ;;  %v1382_v41 = vadd.f32 %v2153_v4, %v2547_v53  ;;  %v2156_v14 = vadd.f32 %v2155_v9, %v2154_v39  ;;  %v2219_v15 = vpop.f32.mrb[47].mxu1 }
 0x163   : > { %v1955_v16 = vpack.c.bf16 %v1554_v12, %v1553_v10  ;;  %v2220_v17 = vadd.f32 %v2219_v15, %v2218_v8 }
 0x164   : > { %v1479_v18 = vadd.f32 %v2217_v7, %v1382_v41  ;;  %v1385_v20 = vadd.f32 %v2156_v14, %v2549_v55 }
 0x165   : > { %1983 = vst [vmem:[%s2573_s23 + $0x10] sm:$0xff] %v1955_v16  }
 0x166   : > { %v1539_v22 = vmul.f32 0.3, %v1479_v18  ;;  %v1482_v11 = vadd.f32 %v2220_v17, %v1385_v20  ;;  %v2157_v23 = vpop.f32.mrb[48].mxu0  ;;  %vm1523_vm6 = vcmp.ge.f32.partialorder %v1479_v18, 0.0 }
 0x167   : > { %v2221_v24 = vpop.f32.mrb[48].mxu1  ;;  %v2158_v13 = vpop.f32.mrb[49].mxu0 }
 0x168   : > { %vm1524_vm7 = vcmp.ge.f32.partialorder %v1482_v11, 0.0  ;;  %v1540_v26 = vmul.f32 0.3, %v1482_v11  ;;  %v2159_v28 = vadd.f32 %v2158_v13, %v2157_v23  ;;  %v2222_v29 = vpop.f32.mrb[49].mxu1  ;;  %v2160_v53 = vpop.f32.mrb[50].mxu0  ;;  %v1555_v33 = vsel %vm1523_vm6, %v1479_v18, %v1539_v22 }
 0x169   : > { %v2223_v30 = vadd.f32 %v2222_v29, %v2221_v24  ;;  %v2224_v31 = vpop.f32.mrb[50].mxu1  ;;  %v2161_v32 = vpop.f32.mrb[51].mxu0 }
 0x16a   : > { %v1556_v34 = vsel %vm1524_vm7, %v1482_v11, %v1540_v26  ;;  %v1390_v55 = vadd.f32 %v2159_v28, %v2551_v3  ;;  %v2162_v36 = vadd.f32 %v2161_v32, %v2160_v53  ;;  %v2225_v38 = vpop.f32.mrb[51].mxu1 }
 0x16b   : > { %v1960_v40 = vpack.c.bf16 %v1556_v34, %v1555_v33  ;;  %v2226_v42 = vadd.f32 %v2225_v38, %v2224_v31 }
 0x16c   : > { %v1487_v43 = vadd.f32 %v2223_v30, %v1390_v55  ;;  %v1393_v44 = vadd.f32 %v2162_v36, %v2553_v5 }
 0x16d   : > { %1984 = vst [vmem:[%s2573_s23 + $0x18] sm:$0xff] %v1960_v40  }
 0x16e   : > { %v1541_v45 = vmul.f32 0.3, %v1487_v43  ;;  %v1490_v25 = vadd.f32 %v2226_v42, %v1393_v44  ;;  %v2163_v46 = vpop.f32.mrb[52].mxu0  ;;  %vm1525_vm8 = vcmp.ge.f32.partialorder %v1487_v43, 0.0 }
 0x16f   : > { %v2227_v47 = vpop.f32.mrb[52].mxu1  ;;  %v2164_v48 = vpop.f32.mrb[53].mxu0 }
 0x170   : > { %vm1526_vm9 = vcmp.ge.f32.partialorder %v1490_v25, 0.0  ;;  %v1542_v49 = vmul.f32 0.3, %v1490_v25  ;;  %v2165_v50 = vadd.f32 %v2164_v48, %v2163_v46  ;;  %v2228_v27 = vpop.f32.mrb[53].mxu1  ;;  %v2166_v3 = vpop.f32.mrb[54].mxu0  ;;  %v1557_v58 = vsel %vm1525_vm8, %v1487_v43, %v1541_v45 }
 0x171   : > { %v2229_v52 = vadd.f32 %v2228_v27, %v2227_v47  ;;  %v2230_v56 = vpop.f32.mrb[54].mxu1  ;;  %v2167_v57 = vpop.f32.mrb[55].mxu0 }
 0x172   : > { %v1558_v59 = vsel %vm1526_vm9, %v1490_v25, %v1542_v49  ;;  %v1398_v5 = vadd.f32 %v2165_v50, %v2555_v19  ;;  %v2168_v60 = vadd.f32 %v2167_v57, %v2166_v3  ;;  %v2231_v61 = vpop.f32.mrb[55].mxu1 }
 0x173   : > { %v1965_v62 = vpack.c.bf16 %v1558_v59, %v1557_v58  ;;  %v2232_v63 = vadd.f32 %v2231_v61, %v2230_v56 }
 0x174   : > { %v1495_v0 = vadd.f32 %v2229_v52, %v1398_v5  ;;  %v1401_v1 = vadd.f32 %v2168_v60, %v2557_v21 }
 0x175   : > { %1985 = vst [vmem:[%s2573_s23 + $0x20] sm:$0xff] %v1965_v62  }
 0x176   : > { %v1543_v2 = vmul.f32 0.3, %v1495_v0  ;;  %v1498_v4 = vadd.f32 %v2232_v63, %v1401_v1  ;;  %v2169_v6 = vpop.f32.mrb[56].mxu0  ;;  %vm1527_vm10 = vcmp.ge.f32.partialorder %v1495_v0, 0.0 }
 0x177   : > { %v2233_v39 = vpop.f32.mrb[56].mxu1  ;;  %v2170_v7 = vpop.f32.mrb[57].mxu0 }
 0x178   : > { %vm1528_vm11 = vcmp.ge.f32.partialorder %v1498_v4, 0.0  ;;  %v1544_v8 = vmul.f32 0.3, %v1498_v4  ;;  %v2171_v9 = vadd.f32 %v2170_v7, %v2169_v6  ;;  %v2234_v10 = vpop.f32.mrb[57].mxu1  ;;  %v2172_v19 = vpop.f32.mrb[58].mxu0  ;;  %v1559_v15 = vsel %vm1527_vm10, %v1495_v0, %v1543_v2 }
 0x179   : > { %v2235_v12 = vadd.f32 %v2234_v10, %v2233_v39  ;;  %v2236_v41 = vpop.f32.mrb[58].mxu1  ;;  %v2173_v14 = vpop.f32.mrb[59].mxu0 }
 0x17a   : > { %v1560_v16 = vsel %vm1528_vm11, %v1498_v4, %v1544_v8  ;;  %v1406_v21 = vadd.f32 %v2171_v9, %v2559_v35  ;;  %v2174_v17 = vadd.f32 %v2173_v14, %v2172_v19  ;;  %v2237_v18 = vpop.f32.mrb[59].mxu1 }
 0x17b   : > { %v1970_v20 = vpack.c.bf16 %v1560_v16, %v1559_v15  ;;  %v2238_v22 = vadd.f32 %v2237_v18, %v2236_v41 }
 0x17c   : > { %v1503_v11 = vadd.f32 %v2235_v12, %v1406_v21  ;;  %v1409_v23 = vadd.f32 %v2174_v17, %v2561_v37 }
 0x17d   : > { %1986 = vst [vmem:[%s2573_s23 + $0x28] sm:$0xff] %v1970_v20  }
 0x17e   : > { %v1545_v24 = vmul.f32 0.3, %v1503_v11  ;;  %v1506_v13 = vadd.f32 %v2238_v22, %v1409_v23  ;;  %v2175_v26 = vpop.f32.mrb[60].mxu0  ;;  %vm1529_vm12 = vcmp.ge.f32.partialorder %v1503_v11, 0.0 }
 0x17f   : > { %v2239_v28 = vpop.f32.mrb[60].mxu1  ;;  %v2176_v29 = vpop.f32.mrb[61].mxu0 }
 0x180   : > { %vm1530_vm13 = vcmp.ge.f32.partialorder %v1506_v13, 0.0  ;;  %v1546_v53 = vmul.f32 0.3, %v1506_v13  ;;  %v2177_v30 = vadd.f32 %v2176_v29, %v2175_v26  ;;  %v2240_v31 = vpop.f32.mrb[61].mxu1  ;;  %v2178_v35 = vpop.f32.mrb[62].mxu0  ;;  %v1561_v55 = vsel %vm1529_vm12, %v1503_v11, %v1545_v24 }
 0x181   : > { %v2241_v32 = vadd.f32 %v2240_v31, %v2239_v28  ;;  %v2242_v33 = vpop.f32.mrb[62].mxu1  ;;  %v2179_v34 = vpop.f32.mrb[63].mxu0 }
 0x182   : > { %v1562_v36 = vsel %vm1530_vm13, %v1506_v13, %v1546_v53  ;;  %v1414_v37 = vadd.f32 %v2177_v30, %v2563_v51  ;;  %v2180_v38 = vadd.f32 %v2179_v34, %v2178_v35  ;;  %v2243_v40 = vpop.f32.mrb[63].mxu1 }
 0x183   : > { %v1975_v42 = vpack.c.bf16 %v1562_v36, %v1561_v55  ;;  %v2244_v43 = vadd.f32 %v2243_v40, %v2242_v33 }
 0x184   : > { %v1511_v44 = vadd.f32 %v2241_v32, %v1414_v37  ;;  %v1417_v45 = vadd.f32 %v2180_v38, %v2565_v54 }
 0x185   : > { %1987 = vst [vmem:[%s2573_s23 + $0x30] sm:$0xff] %v1975_v42  }
 0x186   : > { %v1547_v25 = vmul.f32 0.3, %v1511_v44  ;;  %v1514_v46 = vadd.f32 %v2244_v43, %v1417_v45  ;;  %vm1531_vm14 = vcmp.ge.f32.partialorder %v1511_v44, 0.0 }
 0x188   : > { %vm1532_vm15 = vcmp.ge.f32.partialorder %v1514_v46, 0.0  ;;  %v1548_v47 = vmul.f32 0.3, %v1514_v46  ;;  %v1563_v48 = vsel %vm1531_vm14, %v1511_v44, %v1547_v25 }
 0x18a   : > { %v1564_v49 = vsel %vm1532_vm15, %v1514_v46, %v1548_v47 }
 0x18b   : > { %v1980_v50 = vpack.c.bf16 %v1564_v49, %v1563_v48 }
 0x18d   : > { %1988 = vst [vmem:[%s2573_s23 + $0x38] sm:$0xff] %v1980_v50  }
 0x18e PF: > { %s12_s11 = sadd.s32 1, %s2355_s11   ;;  %s2609_s9 = smov %s2351_s10 }
 0x18f   : > { %p9_p5 = scmp.ge.s32.totalorder %s12_s11, 6   ;;  %s2610_s10 = smov %s2612_s12 }
 0x191   :  { %11 = sbr.rel (!%p9_p5) target bundleno = 2 (0x2), region = 61 }

// kernel: generator_forward.5
= control target key start
LH: loop header
LB: loop body
LE: loop exit
PB: predicated region body
PF: predicated region fallthrough
CT: control target
= control target key end

     0   :  { %s3534_s12 = smov 0   ;;  %s3536_s13 = smov 0   ;;  %s4021_s0 = inlined_call_operand.vmem [shape: bf16[4,512,512], index: 0, kind: input, shape index: {}]   ;;  %s4022_s1 = inlined_call_operand.vmem [shape: bf16[4,512,128], index: 1, kind: input, shape index: {}]   ;;  %s4023_s2 = inlined_call_operand.vmem [shape: bf16[1,128,128], index: 2, kind: input, shape index: {}]   ;;  %s4024_s3 = inlined_call_operand.vmem [shape: f32[4,512,128], index: 3, kind: output, shape index: {}]  }
   0x1   :  { %s3538_s14 = smov 0  }
   0x2 LB: > { %s32_s15 = sadd.s32 1, %s3507_s13  ;;  %p2692_p0 = scmp.ge.s32.totalorder %s3511_s14, 1  ;;  %s3511_s14 = sphi %s3538_s14, %s13_s14   ;;  %s3507_s13 = sphi %s3536_s13, %s4026_s13   ;;  %s3503_s12 = sphi %s3534_s12, %s4025_s12  }
   0x3   : > { %p34_p1 = scmp.ge.s32.totalorder %s32_s15, 4  ;;  %p183_p2 = scmp.lt.s32.totalorder %s3511_s14, 5 }
   0x5   : > { %s4028_s15 = smov (%p34_p1, %s32_s15), 0  ;;  %p184_p3 = pnand %p2692_p0, %p183_p2 }
   0x6   : > { %p228_p4 = scmp.lt.s32.totalorder (!%p184_p3), %s3503_s12, 3  ;;  %v3513_v0 = vmov (!%p184_p3), 0  }
   0x7   : > { %187 = sbr.rel (%p184_p3) target bundleno = 841 (0x349), region = 32  ;;  %1284 = vmatprep.subr.bf16.mxu0 (!%p184_p3), %v3513_v0  ;;  %2992 = vmatprep.subr.bf16.mxu1 (!%p184_p3), %v3513_v0 }
   0xe   : > { %s4030_s12 = smov (!%p228_p4, %s3503_s12), 3 }
   0xf   : > { %s2870_s16 = sshll.u32 %s4030_s12, 8  ;;  %s2869_s20 = sshll.u32 %s4030_s12, 10 }
  0x10   : > { %s3560_s19 = scalar_lea.vmem %s4022_s1, %s2870_s16  ;;  %s3576_s23 = scalar_lea.vmem %s4021_s0, %s2869_s20 }
  0x11   : > { %v3129_v1 = vld [vmem:[%s3560_s19] sm:$0xff]   ;;  %v3130_v2 = vld [vmem:[%s3560_s19 + $0x8] sm:$0xff]   ;;  %v3131_v3 = vld [vmem:[%s3560_s19 + $0x10] sm:$0xff]   ;;  %s2871_s17 = sshll.u32 %s4030_s12, 9 }
  0x12   : > { %1285 = vmatpush1.bf16.msra.mxu0 %v3129_v1  ;;  %3008 = vmatpush1.bf16.msra.mxu1 %v3129_v1  ;;  %v3132_v4 = vld [vmem:[%s3560_s19 + $0x18] sm:$0xff]   ;;  %v3133_v5 = vld [vmem:[%s3560_s19 + $0x20] sm:$0xff]   ;;  %v3134_v7 = vld [vmem:[%s3560_s19 + $0x28] sm:$0xff]   ;;  %s3942_s20 = scalar_lea.vmem %s4024_s3, %s2871_s17 }
  0x13   : > { %1286 = vmatprep.subr.bf16.mxu0 %v3513_v0  ;;  %2993 = vmatprep.subr.bf16.mxu1 %v3513_v0  ;;  %v3147_v6 = vld [vmem:[%s3576_s23 + $0x4] ss:$16 sps:$4 sm:$0xff]   ;;  %v3136_v9 = vld [vmem:[%s3560_s19 + $0x38] sm:$0xff]   ;;  %v3138_v11 = vld [vmem:[%s3560_s19 + $0x48] sm:$0xff]  }
  0x14   : > { %1316 = vmatprep.mubr.bf16.mxu0 %v3147_v6  ;;  %v3135_v8 = vld [vmem:[%s3560_s19 + $0x30] sm:$0xff]   ;;  %v3137_v10 = vld [vmem:[%s3560_s19 + $0x40] sm:$0xff]   ;;  %v3140_v13 = vld [vmem:[%s3560_s19 + $0x58] sm:$0xff]  }
  0x15   : > { %v3139_v12 = vld [vmem:[%s3560_s19 + $0x50] sm:$0xff]   ;;  %v3141_v14 = vld [vmem:[%s3560_s19 + $0x60] sm:$0xff]   ;;  %v3142_v15 = vld [vmem:[%s3560_s19 + $0x68] sm:$0xff]  }
  0x16   : > { %1287 = vmatpush1.bf16.msra.mxu0 %v3130_v2  ;;  %3009 = vmatpush1.bf16.msra.mxu1 %v3130_v2  ;;  %v3202_v16 = vld [vmem:[%s3576_s23 + $0x104] ss:$16 sps:$4 sm:$0xff]   ;;  %v3144_v18 = vld [vmem:[%s3560_s19 + $0x78] sm:$0xff]   ;;  %v3145_v19 = vld [vmem:[%s3576_s23] ss:$16 sps:$4 sm:$0xff]  }
  0x17   : > { %1288 = vmatprep.subr.bf16.mxu0 %v3513_v0  ;;  %2994 = vmatprep.subr.bf16.mxu1 %v3513_v0  ;;  %v3143_v17 = vld [vmem:[%s3560_s19 + $0x70] sm:$0xff]   ;;  %v3148_v21 = vld [vmem:[%s3560_s19 + $0x80] sm:$0xff]   ;;  %v3149_v24 = vld [vmem:[%s3560_s19 + $0x88] sm:$0xff]  }
  0x18   : > { %1380 = vmatprep.mubr.bf16.mxu1 %v3202_v16  ;;  %v3200_v20 = vld [vmem:[%s3576_s23 + $0x100] ss:$16 sps:$4 sm:$0xff]   ;;  %v3150_v22 = vld [vmem:[%s3576_s23 + $0x24] ss:$16 sps:$4 sm:$0xff]   ;;  %v3154_v30 = vld [vmem:[%s3560_s19 + $0x98] sm:$0xff]  }
  0x19   : > { %v3206_v23 = vld [vmem:[%s3576_s23 + $0x124] ss:$16 sps:$4 sm:$0xff]   ;;  %v3152_v25 = vld [vmem:[%s3576_s23 + $0x20] ss:$16 sps:$4 sm:$0xff]   ;;  %v3159_v36 = vld [vmem:[%s3560_s19 + $0xa8] sm:$0xff]  }
  0x1a   : > { %1289 = vmatpush1.bf16.msra.mxu0 %v3131_v3  ;;  %3010 = vmatpush1.bf16.msra.mxu1 %v3131_v3  ;;  %v3208_v26 = vld [vmem:[%s3576_s23 + $0x120] ss:$16 sps:$4 sm:$0xff]   ;;  %v3155_v28 = vld [vmem:[%s3576_s23 + $0x44] ss:$16 sps:$4 sm:$0xff]   ;;  %v3164_v42 = vld [vmem:[%s3560_s19 + $0xb8] sm:$0xff]  }
  0x1b   : > { %1290 = vmatprep.subr.bf16.mxu0 %v3513_v0  ;;  %2995 = vmatprep.subr.bf16.mxu1 %v3513_v0  ;;  %v3153_v27 = vld [vmem:[%s3560_s19 + $0x90] sm:$0xff]   ;;  %v3158_v33 = vld [vmem:[%s3560_s19 + $0xa0] sm:$0xff]   ;;  %v3169_v48 = vld [vmem:[%s3560_s19 + $0xc8] sm:$0xff]  }
  0x1c   : > { %v3212_v29 = vld [vmem:[%s3576_s23 + $0x144] ss:$16 sps:$4 sm:$0xff]   ;;  %v3157_v31 = vld [vmem:[%s3576_s23 + $0x40] ss:$16 sps:$4 sm:$0xff]   ;;  %v3174_v54 = vld [vmem:[%s3560_s19 + $0xd8] sm:$0xff]  }
  0x1d   : > { %v3214_v32 = vld [vmem:[%s3576_s23 + $0x140] ss:$16 sps:$4 sm:$0xff]   ;;  %v3160_v34 = vld [vmem:[%s3576_s23 + $0x64] ss:$16 sps:$4 sm:$0xff]   ;;  %v3179_v60 = vld [vmem:[%s3560_s19 + $0xe8] sm:$0xff]  }
  0x1e   : > { %1291 = vmatpush1.bf16.msra.mxu0 %v3132_v4  ;;  %3011 = vmatpush1.bf16.msra.mxu1 %v3132_v4  ;;  %v3218_v35 = vld [vmem:[%s3576_s23 + $0x164] ss:$16 sps:$4 sm:$0xff]   ;;  %v3162_v37 = vld [vmem:[%s3576_s23 + $0x60] ss:$16 sps:$4 sm:$0xff]   ;;  %v3187_v1 = vld [vmem:[%s3576_s23 + $0xc] ss:$16 sps:$4 sm:$0xff]  }
  0x1f   : > { %1292 = vmatprep.subr.bf16.mxu0 %v3513_v0  ;;  %2996 = vmatprep.subr.bf16.mxu1 %v3513_v0  ;;  %v3220_v38 = vld [vmem:[%s3576_s23 + $0x160] ss:$16 sps:$4 sm:$0xff]   ;;  %v3165_v40 = vld [vmem:[%s3576_s23 + $0x84] ss:$16 sps:$4 sm:$0xff]   ;;  %v3184_v3 = vld [vmem:[%s3560_s19 + $0xf8] sm:$0xff]  }
  0x20   : > { %v3163_v39 = vld [vmem:[%s3560_s19 + $0xb0] sm:$0xff]   ;;  %v3168_v45 = vld [vmem:[%s3560_s19 + $0xc0] sm:$0xff]   ;;  %v3185_v4 = vld [vmem:[%s3576_s23 + $0x8] ss:$16 sps:$4 sm:$0xff]  }
  0x21   : > { %v3224_v41 = vld [vmem:[%s3576_s23 + $0x184] ss:$16 sps:$4 sm:$0xff]   ;;  %v3167_v43 = vld [vmem:[%s3576_s23 + $0x80] ss:$16 sps:$4 sm:$0xff]   ;;  %v3188_v6 = vld [vmem:[%s3576_s23 + $0x2c] ss:$16 sps:$4 sm:$0xff]  }
  0x22   : > { %1293 = vmatpush1.bf16.msra.mxu0 %v3133_v5  ;;  %3012 = vmatpush1.bf16.msra.mxu1 %v3133_v5  ;;  %v3226_v44 = vld [vmem:[%s3576_s23 + $0x180] ss:$16 sps:$4 sm:$0xff]   ;;  %v3170_v46 = vld [vmem:[%s3576_s23 + $0xa4] ss:$16 sps:$4 sm:$0xff]  }
  0x23   : > { %1294 = vmatprep.subr.bf16.mxu0 %v3513_v0  ;;  %2997 = vmatprep.subr.bf16.mxu1 %v3513_v0  ;;  %v3230_v47 = vld [vmem:[%s3576_s23 + $0x1a4] ss:$16 sps:$4 sm:$0xff]   ;;  %v3172_v49 = vld [vmem:[%s3576_s23 + $0xa0] ss:$16 sps:$4 sm:$0xff]  }
  0x24   : > { %v3232_v50 = vld [vmem:[%s3576_s23 + $0x1a0] ss:$16 sps:$4 sm:$0xff]   ;;  %v3175_v52 = vld [vmem:[%s3576_s23 + $0xc4] ss:$16 sps:$4 sm:$0xff]  }
  0x25   : > { %v3173_v51 = vld [vmem:[%s3560_s19 + $0xd0] sm:$0xff]   ;;  %v3178_v57 = vld [vmem:[%s3560_s19 + $0xe0] sm:$0xff]  }
  0x26   : > { %1295 = vmatpush1.bf16.msra.mxu0 %v3134_v7  ;;  %3013 = vmatpush1.bf16.msra.mxu1 %v3134_v7  ;;  %v3236_v53 = vld [vmem:[%s3576_s23 + $0x1c4] ss:$16 sps:$4 sm:$0xff]   ;;  %v3177_v55 = vld [vmem:[%s3576_s23 + $0xc0] ss:$16 sps:$4 sm:$0xff]  }
  0x27   : > { %1296 = vmatprep.subr.bf16.mxu0 %v3513_v0  ;;  %2998 = vmatprep.subr.bf16.mxu1 %v3513_v0  ;;  %v3238_v56 = vld [vmem:[%s3576_s23 + $0x1c0] ss:$16 sps:$4 sm:$0xff]   ;;  %v3180_v58 = vld [vmem:[%s3576_s23 + $0xe4] ss:$16 sps:$4 sm:$0xff]  }
  0x28   : > { %v3242_v59 = vld [vmem:[%s3576_s23 + $0x1e4] ss:$16 sps:$4 sm:$0xff]   ;;  %v3182_v61 = vld [vmem:[%s3576_s23 + $0xe0] ss:$16 sps:$4 sm:$0xff]  }
  0x29   : > { %v3244_v62 = vld [vmem:[%s3576_s23 + $0x1e0] ss:$16 sps:$4 sm:$0xff]   ;;  %v3248_v2 = vld [vmem:[%s3576_s23 + $0x204] ss:$16 sps:$4 sm:$0xff]  }
  0x2a   : > { %1297 = vmatpush1.bf16.msra.mxu0 %v3135_v8  ;;  %3014 = vmatpush1.bf16.msra.mxu1 %v3135_v8  ;;  %v3183_v63 = vld [vmem:[%s3560_s19 + $0xf0] sm:$0xff]   ;;  %v3190_v8 = vld [vmem:[%s3576_s23 + $0x28] ss:$16 sps:$4 sm:$0xff]  }
  0x2b   : > { %1298 = vmatprep.subr.bf16.mxu0 %v3513_v0  ;;  %2999 = vmatprep.subr.bf16.mxu1 %v3513_v0  ;;  %v3250_v5 = vld [vmem:[%s3576_s23 + $0x200] ss:$16 sps:$4 sm:$0xff]   ;;  %v3254_v7 = vld [vmem:[%s3576_s23 + $0x224] ss:$16 sps:$4 sm:$0xff]  }
  0x2c   : > { %v3268_v16 = vld [vmem:[%s3576_s23 + $0x260] ss:$16 sps:$4 sm:$0xff]  }
  0x2e   : > { %1299 = vmatpush1.bf16.msra.mxu0 %v3136_v9  ;;  %3015 = vmatpush1.bf16.msra.mxu1 %v3136_v9  ;;  %v3256_v9 = vld [vmem:[%s3576_s23 + $0x220] ss:$16 sps:$4 sm:$0xff]  }
  0x2f   : > { %1300 = vmatprep.subr.bf16.mxu0 %v3513_v0  ;;  %3000 = vmatprep.subr.bf16.mxu1 %v3513_v0 }
  0x32   : > { %1301 = vmatpush1.bf16.msra.mxu0 %v3137_v10  ;;  %3016 = vmatpush1.bf16.msra.mxu1 %v3137_v10  ;;  %v3191_v10 = vld [vmem:[%s3576_s23 + $0x4c] ss:$16 sps:$4 sm:$0xff]  }
  0x33   : > { %1302 = vmatprep.subr.bf16.mxu0 %v3513_v0  ;;  %3001 = vmatprep.subr.bf16.mxu1 %v3513_v0 }
  0x36   : > { %1303 = vmatpush1.bf16.msra.mxu0 %v3138_v11  ;;  %3017 = vmatpush1.bf16.msra.mxu1 %v3138_v11  ;;  %v3193_v11 = vld [vmem:[%s3576_s23 + $0x48] ss:$16 sps:$4 sm:$0xff]  }
  0x37   : > { %1304 = vmatprep.subr.bf16.mxu0 %v3513_v0  ;;  %3002 = vmatprep.subr.bf16.mxu1 %v3513_v0 }
  0x3a   : > { %1305 = vmatpush1.bf16.msra.mxu0 %v3139_v12  ;;  %3018 = vmatpush1.bf16.msra.mxu1 %v3139_v12  ;;  %v3262_v12 = vld [vmem:[%s3576_s23 + $0x240] ss:$16 sps:$4 sm:$0xff]  }
  0x3b   : > { %1306 = vmatprep.subr.bf16.mxu0 %v3513_v0  ;;  %3003 = vmatprep.subr.bf16.mxu1 %v3513_v0 }
  0x3e   : > { %1307 = vmatpush1.bf16.msra.mxu0 %v3140_v13  ;;  %3019 = vmatpush1.bf16.msra.mxu1 %v3140_v13  ;;  %v3194_v13 = vld [vmem:[%s3576_s23 + $0x6c] ss:$16 sps:$4 sm:$0xff]  }
  0x3f   : > { %1308 = vmatprep.subr.bf16.mxu0 %v3513_v0  ;;  %3004 = vmatprep.subr.bf16.mxu1 %v3513_v0 }
  0x42   : > { %1309 = vmatpush1.bf16.msra.mxu0 %v3141_v14  ;;  %3020 = vmatpush1.bf16.msra.mxu1 %v3141_v14  ;;  %v3266_v14 = vld [vmem:[%s3576_s23 + $0x264] ss:$16 sps:$4 sm:$0xff]  }
  0x43   : > { %1310 = vmatprep.subr.bf16.mxu0 %v3513_v0  ;;  %3005 = vmatprep.subr.bf16.mxu1 %v3513_v0 }
  0x46   : > { %1311 = vmatpush1.bf16.msra.mxu0 %v3142_v15  ;;  %3021 = vmatpush1.bf16.msra.mxu1 %v3142_v15  ;;  %v3196_v15 = vld [vmem:[%s3576_s23 + $0x68] ss:$16 sps:$4 sm:$0xff]  }
  0x47   : > { %1312 = vmatprep.subr.bf16.mxu0 %v3513_v0  ;;  %3006 = vmatprep.subr.bf16.mxu1 %v3513_v0 }
  0x4a   : > { %1313 = vmatpush1.bf16.msra.mxu0 %v3143_v17  ;;  %3022 = vmatpush1.bf16.msra.mxu1 %v3143_v17  ;;  %v3197_v17 = vld [vmem:[%s3576_s23 + $0x8c] ss:$16 sps:$4 sm:$0xff]  }
  0x4b   : > { %1314 = vmatprep.subr.bf16.mxu0 %v3513_v0  ;;  %3007 = vmatprep.subr.bf16.mxu1 %v3513_v0 }
  0x4e   : > { %1315 = vmatpush1.bf16.msra.mxu0 %v3144_v18  ;;  %3023 = vmatpush1.bf16.msra.mxu1 %v3144_v18  ;;  %v3272_v18 = vld [vmem:[%s3576_s23 + $0x284] ss:$16 sps:$4 sm:$0xff]  }
  0x4f   : > { %1573 = vmatprep.subr.bf16.mxu0 %v3513_v0 }
  0x51   : > { %1317 = vmatmul.mubr.bf16.vlgmr.msra.gmra.mrb[0].mxu0 %v3145_v19  ;;  %1381 = vmatmul.mubr.bf16.vlgmr.msra.gmra.mrb[0].mxu1 %v3200_v20  ;;  %v3293_v19 = vld [vmem:[%s4023_s2] sm:$0xff]   ;;  %v3199_v20 = vld [vmem:[%s3576_s23 + $0x88] ss:$16 sps:$4 sm:$0xff]  }
  0x52   : > { %1574 = vmatpush1.bf16.msra.mxu0 %v3148_v21  ;;  %1324 = vmatprep.mubr.bf16.mxu0 %v3150_v22  ;;  %v3274_v21 = vld [vmem:[%s3576_s23 + $0x280] ss:$16 sps:$4 sm:$0xff]   ;;  %v3203_v22 = vld [vmem:[%s3576_s23 + $0xac] ss:$16 sps:$4 sm:$0xff]  }
  0x53   : > { %1575 = vmatprep.subr.bf16.mxu0 %v3513_v0  ;;  %1388 = vmatprep.mubr.bf16.mxu1 %v3206_v23  ;;  %v3278_v23 = vld [vmem:[%s3576_s23 + $0x2a4] ss:$16 sps:$4 sm:$0xff]  }
  0x54   : > { %2912 = vmatprep.subr.bf16.mxu1 %v3293_v19 }
  0x55   : > { %2913 = vmatpush3.bf16.msra.mxu1 %v3293_v19  ;;  %v3294_v19 = vld [vmem:[%s3576_s23 + $0x28c] ss:$16 sps:$4 sm:$0xff]  }
  0x56   : > { %1576 = vmatpush1.bf16.msra.mxu0 %v3149_v24  ;;  %v3205_v24 = vld [vmem:[%s3576_s23 + $0xa8] ss:$16 sps:$4 sm:$0xff]  }
  0x57   : > { %1577 = vmatprep.subr.bf16.mxu0 %v3513_v0 }
  0x59   : > { %1325 = vmatmul.mubr.bf16.gmra.mrb[4].mxu0 %v3152_v25  ;;  %1389 = vmatmul.mubr.bf16.gmra.mrb[4].mxu1 %v3208_v26  ;;  %v3280_v25 = vld [vmem:[%s3576_s23 + $0x2a0] ss:$16 sps:$4 sm:$0xff]   ;;  %v3209_v26 = vld [vmem:[%s3576_s23 + $0xcc] ss:$16 sps:$4 sm:$0xff]  }
  0x5a   : > { %1578 = vmatpush1.bf16.msra.mxu0 %v3153_v27  ;;  %1332 = vmatprep.mubr.bf16.mxu0 %v3155_v28  ;;  %v3284_v27 = vld [vmem:[%s3576_s23 + $0x2c4] ss:$16 sps:$4 sm:$0xff]   ;;  %v3211_v28 = vld [vmem:[%s3576_s23 + $0xc8] ss:$16 sps:$4 sm:$0xff]  }
  0x5b   : > { %1579 = vmatprep.subr.bf16.mxu0 %v3513_v0  ;;  %1396 = vmatprep.mubr.bf16.mxu1 %v3212_v29  ;;  %v3286_v29 = vld [vmem:[%s3576_s23 + $0x2c0] ss:$16 sps:$4 sm:$0xff]  }
  0x5e   : > { %1580 = vmatpush1.bf16.msra.mxu0 %v3154_v30  ;;  %v3215_v30 = vld [vmem:[%s3576_s23 + $0xec] ss:$16 sps:$4 sm:$0xff]  }
  0x5f   : > { %1581 = vmatprep.subr.bf16.mxu0 %v3513_v0 }
  0x61   : > { %1333 = vmatmul.mubr.bf16.gmra.mrb[8].mxu0 %v3157_v31  ;;  %1397 = vmatmul.mubr.bf16.gmra.mrb[8].mxu1 %v3214_v32  ;;  %v3290_v31 = vld [vmem:[%s3576_s23 + $0x2e4] ss:$16 sps:$4 sm:$0xff]   ;;  %v3312_v32 = vld [vmem:[%s4023_s2 + $0x8] sm:$0xff]  }
  0x62   : > { %1582 = vmatpush1.bf16.msra.mxu0 %v3158_v33  ;;  %1340 = vmatprep.mubr.bf16.mxu0 %v3160_v34  ;;  %v3217_v33 = vld [vmem:[%s3576_s23 + $0xe8] ss:$16 sps:$4 sm:$0xff]   ;;  %v3292_v34 = vld [vmem:[%s3576_s23 + $0x2e0] ss:$16 sps:$4 sm:$0xff]  }
  0x63   : > { %1583 = vmatprep.subr.bf16.mxu0 %v3513_v0  ;;  %1404 = vmatprep.mubr.bf16.mxu1 %v3218_v35  ;;  %v3221_v35 = vld [vmem:[%s3576_s23 + $0x10c] ss:$16 sps:$4 sm:$0xff]  }
  0x64   : > { %2914 = vmatprep.subr.bf16.mxu1 %v3312_v32 }
  0x65   : > { %2915 = vmatpush3.bf16.msra.mxu1 %v3312_v32 }
  0x66   : > { %1584 = vmatpush1.bf16.msra.mxu0 %v3159_v36  ;;  %v3297_v36 = vld [vmem:[%s3576_s23 + $0x304] ss:$16 sps:$4 sm:$0xff]  }
  0x67   : > { %1585 = vmatprep.subr.bf16.mxu0 %v3513_v0 }
  0x69   : > { %1341 = vmatmul.mubr.bf16.gmra.mrb[12].mxu0 %v3162_v37  ;;  %1405 = vmatmul.mubr.bf16.gmra.mrb[12].mxu1 %v3220_v38  ;;  %v3223_v37 = vld [vmem:[%s3576_s23 + $0x108] ss:$16 sps:$4 sm:$0xff]   ;;  %v3299_v38 = vld [vmem:[%s3576_s23 + $0x300] ss:$16 sps:$4 sm:$0xff]  }
  0x6a   : > { %1586 = vmatpush1.bf16.msra.mxu0 %v3163_v39  ;;  %1348 = vmatprep.mubr.bf16.mxu0 %v3165_v40  ;;  %v3227_v39 = vld [vmem:[%s3576_s23 + $0x12c] ss:$16 sps:$4 sm:$0xff]   ;;  %v3303_v40 = vld [vmem:[%s3576_s23 + $0x324] ss:$16 sps:$4 sm:$0xff]  }
  0x6b   : > { %1587 = vmatprep.subr.bf16.mxu0 %v3513_v0  ;;  %1412 = vmatprep.mubr.bf16.mxu1 %v3224_v41  ;;  %v3229_v41 = vld [vmem:[%s3576_s23 + $0x128] ss:$16 sps:$4 sm:$0xff]  }
  0x6e   : > { %1588 = vmatpush1.bf16.msra.mxu0 %v3164_v42  ;;  %v3305_v42 = vld [vmem:[%s3576_s23 + $0x320] ss:$16 sps:$4 sm:$0xff]  }
  0x6f   : > { %1589 = vmatprep.subr.bf16.mxu0 %v3513_v0 }
  0x71   : > { %1349 = vmatmul.mubr.bf16.gmra.mrb[16].mxu0 %v3167_v43  ;;  %1413 = vmatmul.mubr.bf16.gmra.mrb[16].mxu1 %v3226_v44  ;;  %v3233_v43 = vld [vmem:[%s3576_s23 + $0x14c] ss:$16 sps:$4 sm:$0xff]   ;;  %v3309_v44 = vld [vmem:[%s3576_s23 + $0x344] ss:$16 sps:$4 sm:$0xff]  }
  0x72   : > { %1590 = vmatpush1.bf16.msra.mxu0 %v3168_v45  ;;  %1356 = vmatprep.mubr.bf16.mxu0 %v3170_v46  ;;  %v3331_v45 = vld [vmem:[%s4023_s2 + $0x10] sm:$0xff]   ;;  %v3334_v46 = vld [vmem:[%s4023_s2 + $0x18] sm:$0xff]  }
  0x73   : > { %1591 = vmatprep.subr.bf16.mxu0 %v3513_v0  ;;  %1420 = vmatprep.mubr.bf16.mxu1 %v3230_v47  ;;  %v3235_v47 = vld [vmem:[%s3576_s23 + $0x148] ss:$16 sps:$4 sm:$0xff]  }
  0x74   : > { %2916 = vmatprep.subr.bf16.mxu1 %v3331_v45 }
  0x75   : > { %2917 = vmatpush3.bf16.msra.mxu1 %v3331_v45 }
  0x76   : > { %1592 = vmatpush1.bf16.msra.mxu0 %v3169_v48  ;;  %v3311_v48 = vld [vmem:[%s3576_s23 + $0x340] ss:$16 sps:$4 sm:$0xff]   ;;  %2918 = vmatprep.subr.bf16.mxu1 %v3334_v46 }
  0x77   : > { %1593 = vmatprep.subr.bf16.mxu0 %v3513_v0 }
  0x79   : > { %1357 = vmatmul.mubr.bf16.gmra.mrb[20].mxu0 %v3172_v49  ;;  %1421 = vmatmul.mubr.bf16.gmra.mrb[20].mxu1 %v3232_v50  ;;  %v3239_v49 = vld [vmem:[%s3576_s23 + $0x16c] ss:$16 sps:$4 sm:$0xff]   ;;  %v3316_v50 = vld [vmem:[%s3576_s23 + $0x364] ss:$16 sps:$4 sm:$0xff]  }
  0x7a   : > { %1594 = vmatpush1.bf16.msra.mxu0 %v3173_v51  ;;  %1364 = vmatprep.mubr.bf16.mxu0 %v3175_v52  ;;  %v3339_v51 = vld [vmem:[%s4023_s2 + $0x20] sm:$0xff]   ;;  %v3241_v52 = vld [vmem:[%s3576_s23 + $0x168] ss:$16 sps:$4 sm:$0xff]  }
  0x7b   : > { %1595 = vmatprep.subr.bf16.mxu0 %v3513_v0  ;;  %1428 = vmatprep.mubr.bf16.mxu1 %v3236_v53  ;;  %v3318_v53 = vld [vmem:[%s3576_s23 + $0x360] ss:$16 sps:$4 sm:$0xff]  }
  0x7c   : > { %2919 = vmatpush3.bf16.msra.mxu1 %v3334_v46 }
  0x7d   : > { %2920 = vmatprep.subr.bf16.mxu1 %v3339_v51 }
  0x7e   : > { %1596 = vmatpush1.bf16.msra.mxu0 %v3174_v54  ;;  %v3245_v54 = vld [vmem:[%s3576_s23 + $0x18c] ss:$16 sps:$4 sm:$0xff]  }
  0x7f   : > { %1597 = vmatprep.subr.bf16.mxu0 %v3513_v0 }
  0x80   : > { %2921 = vmatpush3.bf16.msra.mxu1 %v3339_v51 }
  0x81   : > { %1365 = vmatmul.mubr.bf16.gmra.mrb[24].mxu0 %v3177_v55  ;;  %1429 = vmatmul.mubr.bf16.gmra.mrb[24].mxu1 %v3238_v56  ;;  %v3322_v55 = vld [vmem:[%s3576_s23 + $0x384] ss:$16 sps:$4 sm:$0xff]   ;;  %v3342_v56 = vld [vmem:[%s4023_s2 + $0x28] sm:$0xff]  }
  0x82   : > { %1598 = vmatpush1.bf16.msra.mxu0 %v3178_v57  ;;  %1372 = vmatprep.mubr.bf16.mxu0 %v3180_v58  ;;  %v3347_v57 = vld [vmem:[%s4023_s2 + $0x30] sm:$0xff]   ;;  %v3247_v58 = vld [vmem:[%s3576_s23 + $0x188] ss:$16 sps:$4 sm:$0xff]  }
  0x83   : > { %1599 = vmatprep.subr.bf16.mxu0 %v3513_v0  ;;  %1436 = vmatprep.mubr.bf16.mxu1 %v3242_v59  ;;  %v3324_v59 = vld [vmem:[%s3576_s23 + $0x380] ss:$16 sps:$4 sm:$0xff]  }
  0x84   : > { %2922 = vmatprep.subr.bf16.mxu1 %v3342_v56 }
  0x85   : > { %2923 = vmatpush3.bf16.msra.mxu1 %v3342_v56 }
  0x86   : > { %1600 = vmatpush1.bf16.msra.mxu0 %v3179_v60  ;;  %2924 = vmatprep.subr.bf16.mxu1 %v3347_v57  ;;  %v3251_v60 = vld [vmem:[%s3576_s23 + $0x1ac] ss:$16 sps:$4 sm:$0xff]  }
  0x87   : > { %1601 = vmatprep.subr.bf16.mxu0 %v3513_v0 }
  0x89   : > { %1373 = vmatmul.mubr.bf16.gmra.mrb[28].mxu0 %v3182_v61  ;;  %1437 = vmatmul.mubr.bf16.gmra.mrb[28].mxu1 %v3244_v62  ;;  %v3328_v61 = vld [vmem:[%s3576_s23 + $0x3a4] ss:$16 sps:$4 sm:$0xff]   ;;  %v3350_v62 = vld [vmem:[%s4023_s2 + $0x38] sm:$0xff]  }
  0x8a   : > { %1602 = vmatpush1.bf16.msra.mxu0 %v3183_v63  ;;  %1605 = vmatprep.mubr.bf16.mxu0 %v3187_v1  ;;  %v3253_v63 = vld [vmem:[%s3576_s23 + $0x1a8] ss:$16 sps:$4 sm:$0xff]   ;;  %v3330_v1 = vld [vmem:[%s3576_s23 + $0x3a0] ss:$16 sps:$4 sm:$0xff]  }
  0x8b   : > { %1603 = vmatprep.subr.bf16.mxu0 %v3513_v0  ;;  %1444 = vmatprep.mubr.bf16.mxu1 %v3248_v2  ;;  %v3260_v0 = vld [vmem:[%s3576_s23 + $0x244] ss:$16 sps:$4 sm:$0xff]   ;;  %v3257_v2 = vld [vmem:[%s3576_s23 + $0x1cc] ss:$16 sps:$4 sm:$0xff]  }
  0x8c   : > { %2925 = vmatpush3.bf16.msra.mxu1 %v3347_v57 }
  0x8d   : > { %2926 = vmatprep.subr.bf16.mxu1 %v3350_v62 }
  0x8e   : > { %1604 = vmatpush1.bf16.msra.mxu0 %v3184_v3  ;;  %v3336_v3 = vld [vmem:[%s3576_s23 + $0x3c4] ss:$16 sps:$4 sm:$0xff]  }
  0x90   : > { %2927 = vmatpush3.bf16.msra.mxu1 %v3350_v62 }
  0x91   : > { %1606 = vmatmul.mubr.bf16.vlgmr.msra.gmra.mrb[0].mxu0 %v3185_v4  ;;  %1445 = vmatmul.mubr.bf16.gmra.mrb[32].mxu1 %v3250_v5  ;;  %v3259_v4 = vld [vmem:[%s3576_s23 + $0x1c8] ss:$16 sps:$4 sm:$0xff]   ;;  %v3338_v5 = vld [vmem:[%s3576_s23 + $0x3c0] ss:$16 sps:$4 sm:$0xff]  }
  0x92   : > { %1613 = vmatprep.mubr.bf16.mxu0 %v3188_v6  ;;  %1452 = vmatprep.mubr.bf16.mxu1 %v3254_v7  ;;  %v3263_v6 = vld [vmem:[%s3576_s23 + $0x1ec] ss:$16 sps:$4 sm:$0xff]   ;;  %v3344_v7 = vld [vmem:[%s3576_s23 + $0x3e4] ss:$16 sps:$4 sm:$0xff]  }
  0x99   : > { %1614 = vmatmul.mubr.bf16.gmra.mrb[4].mxu0 %v3190_v8  ;;  %1453 = vmatmul.mubr.bf16.gmra.mrb[36].mxu1 %v3256_v9  ;;  %v3265_v8 = vld [vmem:[%s3576_s23 + $0x1e8] ss:$16 sps:$4 sm:$0xff]   ;;  %v3346_v9 = vld [vmem:[%s3576_s23 + $0x3e0] ss:$16 sps:$4 sm:$0xff]  }
  0x9a   : > { %1621 = vmatprep.mubr.bf16.mxu0 %v3191_v10  ;;  %1460 = vmatprep.mubr.bf16.mxu1 %v3260_v0  ;;  %v3269_v10 = vld [vmem:[%s3576_s23 + $0x20c] ss:$16 sps:$4 sm:$0xff]   ;;  %v3271_v0 = vld [vmem:[%s3576_s23 + $0x208] ss:$16 sps:$4 sm:$0xff]  }
  0xa1   : > { %1622 = vmatmul.mubr.bf16.gmra.mrb[8].mxu0 %v3193_v11  ;;  %1461 = vmatmul.mubr.bf16.gmra.mrb[40].mxu1 %v3262_v12  ;;  %v3275_v11 = vld [vmem:[%s3576_s23 + $0x22c] ss:$16 sps:$4 sm:$0xff]   ;;  %v3277_v12 = vld [vmem:[%s3576_s23 + $0x228] ss:$16 sps:$4 sm:$0xff]  }
  0xa2   : > { %1629 = vmatprep.mubr.bf16.mxu0 %v3194_v13  ;;  %1468 = vmatprep.mubr.bf16.mxu1 %v3266_v14  ;;  %v3281_v13 = vld [vmem:[%s3576_s23 + $0x24c] ss:$16 sps:$4 sm:$0xff]   ;;  %v3283_v14 = vld [vmem:[%s3576_s23 + $0x248] ss:$16 sps:$4 sm:$0xff]  }
  0xa9   : > { %1630 = vmatmul.mubr.bf16.gmra.mrb[12].mxu0 %v3196_v15  ;;  %1469 = vmatmul.mubr.bf16.gmra.mrb[44].mxu1 %v3268_v16  ;;  %v3287_v15 = vld [vmem:[%s3576_s23 + $0x26c] ss:$16 sps:$4 sm:$0xff]  }
  0xaa   : > { %1637 = vmatprep.mubr.bf16.mxu0 %v3197_v17  ;;  %1476 = vmatprep.mubr.bf16.mxu1 %v3272_v18  ;;  %v3289_v17 = vld [vmem:[%s3576_s23 + $0x268] ss:$16 sps:$4 sm:$0xff]  }
  0xb1   : > { %1638 = vmatmul.mubr.bf16.gmra.mrb[16].mxu0 %v3199_v20  ;;  %1477 = vmatmul.mubr.bf16.gmra.mrb[48].mxu1 %v3274_v21 }
  0xb2   : > { %1645 = vmatprep.mubr.bf16.mxu0 %v3203_v22  ;;  %1484 = vmatprep.mubr.bf16.mxu1 %v3278_v23  ;;  %v3296_v23 = vld [vmem:[%s3576_s23 + $0x288] ss:$16 sps:$4 sm:$0xff]  }
  0xb9   : > { %1646 = vmatmul.mubr.bf16.gmra.mrb[20].mxu0 %v3205_v24  ;;  %1485 = vmatmul.mubr.bf16.gmra.mrb[52].mxu1 %v3280_v25  ;;  %v3300_v25 = vld [vmem:[%s3576_s23 + $0x2ac] ss:$16 sps:$4 sm:$0xff]  }
  0xba   : > { %1653 = vmatprep.mubr.bf16.mxu0 %v3209_v26  ;;  %1492 = vmatprep.mubr.bf16.mxu1 %v3284_v27 }
  0xc1   : > { %1654 = vmatmul.mubr.bf16.gmra.mrb[24].mxu0 %v3211_v28  ;;  %1493 = vmatmul.mubr.bf16.gmra.mrb[56].mxu1 %v3286_v29  ;;  %v3302_v29 = vld [vmem:[%s3576_s23 + $0x2a8] ss:$16 sps:$4 sm:$0xff]  }
  0xc2   : > { %1661 = vmatprep.mubr.bf16.mxu0 %v3215_v30  ;;  %1500 = vmatprep.mubr.bf16.mxu1 %v3290_v31  ;;  %v3306_v31 = vld [vmem:[%s3576_s23 + $0x2cc] ss:$16 sps:$4 sm:$0xff]  }
  0xc9   : > { %1662 = vmatmul.mubr.bf16.gmra.mrb[28].mxu0 %v3217_v33  ;;  %1501 = vmatmul.mubr.bf16.gmra.mrb[60].mxu1 %v3292_v34 }
  0xca   : > { %1669 = vmatprep.mubr.bf16.mxu0 %v3221_v35  ;;  %1508 = vmatprep.mubr.bf16.mxu1 %v3297_v36  ;;  %v3308_v35 = vld [vmem:[%s3576_s23 + $0x2c8] ss:$16 sps:$4 sm:$0xff]  }
  0xd1   : > { %1670 = vmatmul.mubr.bf16.gmra.mrb[32].mxu0 %v3223_v37  ;;  %1509 = vmatmul.mubr.bf16.gmra.mrb[64].mxu1 %v3299_v38  ;;  %v3313_v37 = vld [vmem:[%s3576_s23 + $0x2ec] ss:$16 sps:$4 sm:$0xff]  }
  0xd2   : > { %1677 = vmatprep.mubr.bf16.mxu0 %v3227_v39  ;;  %1516 = vmatprep.mubr.bf16.mxu1 %v3303_v40 }
  0xd9   : > { %1678 = vmatmul.mubr.bf16.gmra.mrb[36].mxu0 %v3229_v41  ;;  %1517 = vmatmul.mubr.bf16.gmra.mrb[68].mxu1 %v3305_v42  ;;  %v3315_v41 = vld [vmem:[%s3576_s23 + $0x2e8] ss:$16 sps:$4 sm:$0xff]  }
  0xda   : > { %1685 = vmatprep.mubr.bf16.mxu0 %v3233_v43  ;;  %1524 = vmatprep.mubr.bf16.mxu1 %v3309_v44  ;;  %v3319_v43 = vld [vmem:[%s3576_s23 + $0x30c] ss:$16 sps:$4 sm:$0xff]  }
  0xe1   : > { %1686 = vmatmul.mubr.bf16.gmra.mrb[40].mxu0 %v3235_v47  ;;  %1525 = vmatmul.mubr.bf16.gmra.mrb[72].mxu1 %v3311_v48  ;;  %v3321_v47 = vld [vmem:[%s3576_s23 + $0x308] ss:$16 sps:$4 sm:$0xff]  }
  0xe2   : > { %1693 = vmatprep.mubr.bf16.mxu0 %v3239_v49  ;;  %1532 = vmatprep.mubr.bf16.mxu1 %v3316_v50  ;;  %v3325_v49 = vld [vmem:[%s3576_s23 + $0x32c] ss:$16 sps:$4 sm:$0xff]  }
  0xe9   : > { %1694 = vmatmul.mubr.bf16.gmra.mrb[44].mxu0 %v3241_v52  ;;  %1533 = vmatmul.mubr.bf16.gmra.mrb[76].mxu1 %v3318_v53  ;;  %v3327_v53 = vld [vmem:[%s3576_s23 + $0x328] ss:$16 sps:$4 sm:$0xff]  }
  0xea   : > { %1701 = vmatprep.mubr.bf16.mxu0 %v3245_v54  ;;  %1540 = vmatprep.mubr.bf16.mxu1 %v3322_v55  ;;  %v3332_v55 = vld [vmem:[%s3576_s23 + $0x34c] ss:$16 sps:$4 sm:$0xff]  }
  0xf1   : > { %1702 = vmatmul.mubr.bf16.gmra.mrb[48].mxu0 %v3247_v58  ;;  %1541 = vmatmul.mubr.bf16.gmra.mrb[80].mxu1 %v3324_v59  ;;  %v3335_v59 = vld [vmem:[%s3576_s23 + $0x348] ss:$16 sps:$4 sm:$0xff]  }
  0xf2   : > { %1709 = vmatprep.mubr.bf16.mxu0 %v3251_v60  ;;  %1548 = vmatprep.mubr.bf16.mxu1 %v3328_v61  ;;  %v3340_v61 = vld [vmem:[%s3576_s23 + $0x36c] ss:$16 sps:$4 sm:$0xff]  }
  0xf9   : > { %1710 = vmatmul.mubr.bf16.gmra.mrb[52].mxu0 %v3253_v63  ;;  %1549 = vmatmul.mubr.bf16.gmra.mrb[84].mxu1 %v3330_v1 }
  0xfa   : > { %1717 = vmatprep.mubr.bf16.mxu0 %v3257_v2  ;;  %1556 = vmatprep.mubr.bf16.mxu1 %v3336_v3 }
 0x101   : > { %1718 = vmatmul.mubr.bf16.gmra.mrb[56].mxu0 %v3259_v4  ;;  %1557 = vmatmul.mubr.bf16.gmra.mrb[88].mxu1 %v3338_v5  ;;  %v3343_v5 = vld [vmem:[%s3576_s23 + $0x368] ss:$16 sps:$4 sm:$0xff]  }
 0x102   : > { %1725 = vmatprep.mubr.bf16.mxu0 %v3263_v6  ;;  %1564 = vmatprep.mubr.bf16.mxu1 %v3344_v7 }
 0x109   : > { %1726 = vmatmul.mubr.bf16.gmra.mrb[60].mxu0 %v3265_v8  ;;  %1565 = vmatmul.mubr.bf16.gmra.mrb[92].mxu1 %v3346_v9  ;;  %v3348_v8 = vld [vmem:[%s3576_s23 + $0x38c] ss:$16 sps:$4 sm:$0xff]  }
 0x10a   : > { %1733 = vmatprep.mubr.bf16.mxu0 %v3269_v10 }
 0x111   : > { %1734 = vmatmul.mubr.bf16.gmra.mrb[64].mxu0 %v3271_v0 }
 0x112   : > { %1741 = vmatprep.mubr.bf16.mxu0 %v3275_v11 }
 0x119   : > { %1742 = vmatmul.mubr.bf16.gmra.mrb[68].mxu0 %v3277_v12 }
 0x11a   : > { %1749 = vmatprep.mubr.bf16.mxu0 %v3281_v13 }
 0x121   : > { %1750 = vmatmul.mubr.bf16.gmra.mrb[72].mxu0 %v3283_v14 }
 0x122   : > { %1757 = vmatprep.mubr.bf16.mxu0 %v3287_v15 }
 0x124   : > { %v3773_v16 = vpop.f32.mrb[0].mxu1 }
 0x125   : > { %v1384_v18 = vpop.f32.mrb[1].mxu1 }
 0x126   : > { %v3777_v20 = vpop.f32.mrb[2].mxu1 }
 0x127   : > { %v1387_v21 = vpop.f32.mrb[3].mxu1 }
 0x128   : > { %v3351_v21 = vld [vmem:[%s3576_s23 + $0x388] ss:$16 sps:$4 sm:$0xff]  }
 0x129   : > { %1758 = vmatmul.mubr.bf16.gmra.mrb[76].mxu0 %v3289_v17 }
 0x12a   : > { %1765 = vmatprep.mubr.bf16.mxu0 %v3294_v19 }
 0x12c   : > { %v3779_v22 = vpop.f32.mrb[4].mxu1 }
 0x12d   : > { %v1392_v24 = vpop.f32.mrb[5].mxu1 }
 0x12e   : > { %v3783_v26 = vpop.f32.mrb[6].mxu1 }
 0x12f   : > { %v1395_v27 = vpop.f32.mrb[7].mxu1 }
 0x131   : > { %1766 = vmatmul.mubr.bf16.gmra.mrb[80].mxu0 %v3296_v23 }
 0x132   : > { %1773 = vmatprep.mubr.bf16.mxu0 %v3300_v25  ;;  %v3352_v25 = vld [vmem:[%s3576_s23 + $0x3ac] ss:$16 sps:$4 sm:$0xff]  }
 0x134   : > { %v3785_v28 = vpop.f32.mrb[8].mxu1 }
 0x135   : > { %v1400_v30 = vpop.f32.mrb[9].mxu1 }
 0x136   : > { %v3789_v32 = vpop.f32.mrb[10].mxu1 }
 0x137   : > { %v1403_v33 = vpop.f32.mrb[11].mxu1 }
 0x139   : > { %1774 = vmatmul.mubr.bf16.gmra.mrb[84].mxu0 %v3302_v29 }
 0x13a   : > { %1781 = vmatprep.mubr.bf16.mxu0 %v3306_v31 }
 0x13c   : > { %v3791_v34 = vpop.f32.mrb[12].mxu1 }
 0x13d   : > { %v1408_v36 = vpop.f32.mrb[13].mxu1 }
 0x13e   : > { %v3795_v38 = vpop.f32.mrb[14].mxu1 }
 0x13f   : > { %v1411_v39 = vpop.f32.mrb[15].mxu1 }
 0x141   : > { %1782 = vmatmul.mubr.bf16.gmra.mrb[88].mxu0 %v3308_v35 }
 0x142   : > { %1789 = vmatprep.mubr.bf16.mxu0 %v3313_v37 }
 0x144   : > { %v3797_v40 = vpop.f32.mrb[16].mxu1 }
 0x145   : > { %v1416_v42 = vpop.f32.mrb[17].mxu1 }
 0x146   : > { %v3801_v44 = vpop.f32.mrb[18].mxu1 }
 0x147   : > { %v1419_v45 = vpop.f32.mrb[19].mxu1 }
 0x149   : > { %1790 = vmatmul.mubr.bf16.gmra.mrb[92].mxu0 %v3315_v41 }
 0x14a   : > { %1797 = vmatprep.mubr.bf16.mxu0 %v3319_v43  ;;  %v3354_v43 = vld [vmem:[%s3576_s23 + $0x3a8] ss:$16 sps:$4 sm:$0xff]  }
 0x14c   : > { %v3803_v46 = vpop.f32.mrb[20].mxu1 }
 0x14d   : > { %v1424_v48 = vpop.f32.mrb[21].mxu1 }
 0x14e   : > { %v3807_v50 = vpop.f32.mrb[22].mxu1  ;;  %v3355_v48 = vld [vmem:[%s3576_s23 + $0x3cc] ss:$16 sps:$4 sm:$0xff]  }
 0x14f   : > { %v1427_v51 = vpop.f32.mrb[23].mxu1 }
 0x151   : > { %1798 = vmatmul.mubr.bf16.gmra.mrb[96].mxu0 %v3321_v47 }
 0x152   : > { %1805 = vmatprep.mubr.bf16.mxu0 %v3325_v49 }
 0x154   : > { %v3809_v52 = vpop.f32.mrb[24].mxu1 }
 0x155   : > { %v1432_v54 = vpop.f32.mrb[25].mxu1 }
 0x156   : > { %v3813_v56 = vpop.f32.mrb[26].mxu1 }
 0x157   : > { %v1435_v57 = vpop.f32.mrb[27].mxu1 }
 0x159   : > { %1806 = vmatmul.mubr.bf16.gmra.mrb[100].mxu0 %v3327_v53 }
 0x15a   : > { %1813 = vmatprep.mubr.bf16.mxu0 %v3332_v55 }
 0x15c   : > { %v3815_v58 = vpop.f32.mrb[28].mxu1 }
 0x15d   : > { %v1440_v60 = vpop.f32.mrb[29].mxu1 }
 0x15e   : > { %v3819_v62 = vpop.f32.mrb[30].mxu1 }
 0x15f   : > { %v1443_v63 = vpop.f32.mrb[31].mxu1 }
 0x161   : > { %1814 = vmatmul.mubr.bf16.gmra.mrb[104].mxu0 %v3335_v59 }
 0x162   : > { %1821 = vmatprep.mubr.bf16.mxu0 %v3340_v61 }
 0x164   : > { %v1607_v1 = vpop.f32.mrb[0].mxu0  ;;  %v3821_v2 = vpop.f32.mrb[32].mxu1 }
 0x165   : > { %v1926_v3 = vmul.f32 0.3, %v1607_v1  ;;  %v1609_v4 = vpop.f32.mrb[1].mxu0  ;;  %v1448_v6 = vpop.f32.mrb[33].mxu1  ;;  %vm1862_vm0 = vcmp.ge.f32.partialorder %v1607_v1, 0.0 }
 0x166   : > { %v1610_v7 = vpop.f32.mrb[2].mxu0  ;;  %v3825_v9 = vpop.f32.mrb[34].mxu1  ;;  %v3358_v6 = vld [vmem:[%s3576_s23 + $0x3ec] ss:$16 sps:$4 sm:$0xff]  }
 0x167   : > { %vm1863_vm1 = vcmp.ge.f32.partialorder %v1610_v7, 0.0  ;;  %v1927_v10 = vmul.f32 0.3, %v1610_v7  ;;  %v1612_v0 = vpop.f32.mrb[3].mxu0  ;;  %v1451_v11 = vpop.f32.mrb[35].mxu1  ;;  %v1990_v12 = vsel %vm1862_vm0, %v1607_v1, %v1926_v3 }
 0x168   : > { %v3357_v3 = vld [vmem:[%s3576_s23 + $0x3c8] ss:$16 sps:$4 sm:$0xff]  }
 0x169   : > { %v1991_v13 = vsel %vm1863_vm1, %v1610_v7, %v1927_v10  ;;  %1822 = vmatmul.mubr.bf16.gmra.mrb[108].mxu0 %v3343_v5 }
 0x16a   : > { %v2054_v14 = vpack.c.bf16 %v1991_v13, %v1990_v12  ;;  %1829 = vmatprep.mubr.bf16.mxu0 %v3348_v8 }
 0x16c   : > { %v1615_v15 = vpop.f32.mrb[4].mxu0  ;;  %2928 = vmatprep.mubr.bf16.mxu1 %v2054_v14  ;;  %v3827_v17 = vpop.f32.mrb[36].mxu1 }
 0x16d   : > { %v1928_v18 = vmul.f32 0.3, %v1615_v15  ;;  %v1617_v19 = vpop.f32.mrb[5].mxu0  ;;  %v1456_v23 = vpop.f32.mrb[37].mxu1  ;;  %vm1864_vm2 = vcmp.ge.f32.partialorder %v1615_v15, 0.0 }
 0x16e   : > { %v1618_v24 = vpop.f32.mrb[6].mxu0  ;;  %v3831_v27 = vpop.f32.mrb[38].mxu1 }
 0x16f   : > { %vm1865_vm3 = vcmp.ge.f32.partialorder %v1618_v24, 0.0  ;;  %v1929_v29 = vmul.f32 0.3, %v1618_v24  ;;  %v1620_v30 = vpop.f32.mrb[7].mxu0  ;;  %v1459_v31 = vpop.f32.mrb[39].mxu1  ;;  %v1992_v33 = vsel %vm1864_vm2, %v1615_v15, %v1928_v18 }
 0x171   : > { %v1993_v35 = vsel %vm1865_vm3, %v1618_v24, %v1929_v29  ;;  %1830 = vmatmul.mubr.bf16.gmra.mrb[112].mxu0 %v3351_v21  ;;  %v3360_v21 = vld [vmem:[%s3576_s23 + $0x3e8] ss:$16 sps:$4 sm:$0xff]  }
 0x172   : > { %v2055_v36 = vpack.c.bf16 %v1993_v35, %v1992_v33  ;;  %1837 = vmatprep.mubr.bf16.mxu0 %v3352_v25 }
 0x174   : > { %v1623_v37 = vpop.f32.mrb[8].mxu0  ;;  %2929 = vmatmul.mubr.bf16.vlgmr.msra.gmra.mrb[96].mxu1 %v2055_v36  ;;  %v3833_v39 = vpop.f32.mrb[40].mxu1 }
 0x175   : > { %v1930_v41 = vmul.f32 0.3, %v1623_v37  ;;  %v1625_v42 = vpop.f32.mrb[9].mxu0  ;;  %v1464_v45 = vpop.f32.mrb[41].mxu1  ;;  %vm1866_vm4 = vcmp.ge.f32.partialorder %v1623_v37, 0.0 }
 0x176   : > { %v1626_v47 = vpop.f32.mrb[10].mxu0  ;;  %v3837_v49 = vpop.f32.mrb[42].mxu1 }
 0x177   : > { %vm1867_vm5 = vcmp.ge.f32.partialorder %v1626_v47, 0.0  ;;  %v1931_v51 = vmul.f32 0.3, %v1626_v47  ;;  %v1628_v53 = vpop.f32.mrb[11].mxu0  ;;  %v1467_v54 = vpop.f32.mrb[43].mxu1  ;;  %v1994_v55 = vsel %vm1866_vm4, %v1623_v37, %v1930_v41 }
 0x179   : > { %v1995_v57 = vsel %vm1867_vm5, %v1626_v47, %v1931_v51  ;;  %1838 = vmatmul.mubr.bf16.gmra.mrb[116].mxu0 %v3354_v43 }
 0x17a   : > { %v2056_v59 = vpack.c.bf16 %v1995_v57, %v1994_v55  ;;  %1845 = vmatprep.mubr.bf16.mxu0 %v3355_v48 }
 0x17c   : > { %v1631_v60 = vpop.f32.mrb[12].mxu0  ;;  %2932 = vmatprep.mubr.bf16.mxu1 %v2056_v59  ;;  %v3839_v61 = vpop.f32.mrb[44].mxu1 }
 0x17d   : > { %v1932_v63 = vmul.f32 0.3, %v1631_v60  ;;  %v1633_v1 = vpop.f32.mrb[13].mxu0  ;;  %v1472_v4 = vpop.f32.mrb[45].mxu1  ;;  %vm1868_vm6 = vcmp.ge.f32.partialorder %v1631_v60, 0.0 }
 0x17e   : > { %v1634_v5 = vpop.f32.mrb[14].mxu0  ;;  %v3843_v7 = vpop.f32.mrb[46].mxu1 }
 0x17f   : > { %vm1869_vm7 = vcmp.ge.f32.partialorder %v1634_v5, 0.0  ;;  %v1933_v8 = vmul.f32 0.3, %v1634_v5  ;;  %v1636_v10 = vpop.f32.mrb[15].mxu0  ;;  %v1475_v0 = vpop.f32.mrb[47].mxu1  ;;  %v1996_v11 = vsel %vm1868_vm6, %v1631_v60, %v1932_v63 }
 0x181   : > { %v1997_v12 = vsel %vm1869_vm7, %v1634_v5, %v1933_v8  ;;  %1846 = vmatmul.mubr.bf16.gmra.mrb[120].mxu0 %v3357_v3 }
 0x182   : > { %v2057_v13 = vpack.c.bf16 %v1997_v12, %v1996_v11  ;;  %1853 = vmatprep.mubr.bf16.mxu0 %v3358_v6 }
 0x184   : > { %v1639_v14 = vpop.f32.mrb[16].mxu0  ;;  %2933 = vmatmul.mubr.bf16.gmra.mrb[100].mxu1 %v2057_v13  ;;  %v3845_v15 = vpop.f32.mrb[48].mxu1 }
 0x185   : > { %v1934_v18 = vmul.f32 0.3, %v1639_v14  ;;  %v1641_v19 = vpop.f32.mrb[17].mxu0  ;;  %v1480_v23 = vpop.f32.mrb[49].mxu1  ;;  %vm1870_vm8 = vcmp.ge.f32.partialorder %v1639_v14, 0.0 }
 0x186   : > { %v1642_v24 = vpop.f32.mrb[18].mxu0  ;;  %v3848_v25 = vpop.f32.mrb[50].mxu1 }
 0x187   : > { %vm1871_vm9 = vcmp.ge.f32.partialorder %v1642_v24, 0.0  ;;  %v1935_v29 = vmul.f32 0.3, %v1642_v24  ;;  %v1644_v30 = vpop.f32.mrb[19].mxu0  ;;  %v1483_v31 = vpop.f32.mrb[51].mxu1  ;;  %v1998_v33 = vsel %vm1870_vm8, %v1639_v14, %v1934_v18 }
 0x189   : > { %v1999_v35 = vsel %vm1871_vm9, %v1642_v24, %v1935_v29  ;;  %1854 = vmatmul.mubr.bf16.gmra.mrb[124].mxu0 %v3360_v21 }
 0x18a   : > { %v2058_v36 = vpack.c.bf16 %v1999_v35, %v1998_v33 }
 0x18c   : > { %v1647_v37 = vpop.f32.mrb[20].mxu0  ;;  %2936 = vmatprep.mubr.bf16.mxu1 %v2058_v36  ;;  %v3850_v41 = vpop.f32.mrb[52].mxu1 }
 0x18d   : > { %v1936_v42 = vmul.f32 0.3, %v1647_v37  ;;  %v1649_v43 = vpop.f32.mrb[21].mxu0  ;;  %v1488_v45 = vpop.f32.mrb[53].mxu1  ;;  %vm1872_vm10 = vcmp.ge.f32.partialorder %v1647_v37, 0.0 }
 0x18e   : > { %v1650_v47 = vpop.f32.mrb[22].mxu0  ;;  %v3852_v48 = vpop.f32.mrb[54].mxu1 }
 0x18f   : > { %vm1873_vm11 = vcmp.ge.f32.partialorder %v1650_v47, 0.0  ;;  %v1937_v51 = vmul.f32 0.3, %v1650_v47  ;;  %v1652_v53 = vpop.f32.mrb[23].mxu0  ;;  %v1491_v54 = vpop.f32.mrb[55].mxu1  ;;  %v2000_v55 = vsel %vm1872_vm10, %v1647_v37, %v1936_v42 }
 0x191   : > { %v2001_v57 = vsel %vm1873_vm11, %v1650_v47, %v1937_v51 }
 0x192   : > { %v2059_v59 = vpack.c.bf16 %v2001_v57, %v2000_v55 }
 0x194   : > { %v1655_v60 = vpop.f32.mrb[24].mxu0  ;;  %2937 = vmatmul.mubr.bf16.gmra.mrb[104].mxu1 %v2059_v59  ;;  %v3854_v63 = vpop.f32.mrb[56].mxu1 }
 0x195   : > { %v1938_v1 = vmul.f32 0.3, %v1655_v60  ;;  %v1657_v3 = vpop.f32.mrb[25].mxu0  ;;  %v1496_v4 = vpop.f32.mrb[57].mxu1  ;;  %vm1874_vm12 = vcmp.ge.f32.partialorder %v1655_v60, 0.0 }
 0x196   : > { %v1658_v5 = vpop.f32.mrb[26].mxu0  ;;  %v3856_v6 = vpop.f32.mrb[58].mxu1 }
 0x197   : > { %vm1875_vm13 = vcmp.ge.f32.partialorder %v1658_v5, 0.0  ;;  %v1939_v8 = vmul.f32 0.3, %v1658_v5  ;;  %v1660_v10 = vpop.f32.mrb[27].mxu0  ;;  %v1499_v0 = vpop.f32.mrb[59].mxu1  ;;  %v2002_v11 = vsel %vm1874_vm12, %v1655_v60, %v1938_v1 }
 0x199   : > { %v2003_v12 = vsel %vm1875_vm13, %v1658_v5, %v1939_v8 }
 0x19a   : > { %v2060_v13 = vpack.c.bf16 %v2003_v12, %v2002_v11 }
 0x19c   : > { %v1663_v14 = vpop.f32.mrb[28].mxu0  ;;  %2940 = vmatprep.mubr.bf16.mxu1 %v2060_v13  ;;  %v3858_v18 = vpop.f32.mrb[60].mxu1 }
 0x19d   : > { %v1940_v19 = vmul.f32 0.3, %v1663_v14  ;;  %v1665_v21 = vpop.f32.mrb[29].mxu0  ;;  %v1504_v23 = vpop.f32.mrb[61].mxu1  ;;  %vm1876_vm14 = vcmp.ge.f32.partialorder %v1663_v14, 0.0 }
 0x19e   : > { %v1666_v24 = vpop.f32.mrb[30].mxu0  ;;  %v3860_v29 = vpop.f32.mrb[62].mxu1 }
 0x19f   : > { %vm1877_vm15 = vcmp.ge.f32.partialorder %v1666_v24, 0.0  ;;  %v1941_v30 = vmul.f32 0.3, %v1666_v24  ;;  %v1668_v31 = vpop.f32.mrb[31].mxu0  ;;  %v1507_v33 = vpop.f32.mrb[63].mxu1  ;;  %v2004_v35 = vsel %vm1876_vm14, %v1663_v14, %v1940_v19 }
 0x1a1   : > { %v2005_v36 = vsel %vm1877_vm15, %v1666_v24, %v1941_v30 }
 0x1a2   : > { %v2061_v37 = vpack.c.bf16 %v2005_v36, %v2004_v35 }
 0x1a4   : > { %v1671_v42 = vpop.f32.mrb[32].mxu0  ;;  %2941 = vmatmul.mubr.bf16.gmra.mrb[108].mxu1 %v2061_v37  ;;  %v3862_v43 = vpop.f32.mrb[64].mxu1 }
 0x1a5   : > { %v1672_v45 = vadd.f32 %v1671_v42, %v3773_v16  ;;  %v1673_v47 = vpop.f32.mrb[33].mxu0  ;;  %v1512_v51 = vpop.f32.mrb[65].mxu1 }
 0x1a6   : > { %v1674_v53 = vpop.f32.mrb[34].mxu0  ;;  %v3865_v54 = vpop.f32.mrb[66].mxu1 }
 0x1a7   : > { %v1942_v55 = vmul.f32 0.3, %v1672_v45  ;;  %v1675_v57 = vadd.f32 %v1674_v53, %v3777_v20  ;;  %v1676_v59 = vpop.f32.mrb[35].mxu0  ;;  %v1515_v60 = vpop.f32.mrb[67].mxu1  ;;  %vm1878_vm0 = vcmp.ge.f32.partialorder %v1672_v45, 0.0 }
 0x1a9   : > { %vm1879_vm1 = vcmp.ge.f32.partialorder %v1675_v57, 0.0  ;;  %v1943_v1 = vmul.f32 0.3, %v1675_v57  ;;  %v2006_v3 = vsel %vm1878_vm0, %v1672_v45, %v1942_v55 }
 0x1ab   : > { %v2007_v4 = vsel %vm1879_vm1, %v1675_v57, %v1943_v1 }
 0x1ac   : > { %v1679_v5 = vpop.f32.mrb[36].mxu0  ;;  %v2062_v8 = vpack.c.bf16 %v2007_v4, %v2006_v3  ;;  %v3868_v10 = vpop.f32.mrb[68].mxu1 }
 0x1ad   : > { %v1680_v16 = vadd.f32 %v1679_v5, %v3779_v22  ;;  %v1681_v0 = vpop.f32.mrb[37].mxu0  ;;  %v1520_v11 = vpop.f32.mrb[69].mxu1 }
 0x1ae   : > { %v1682_v12 = vpop.f32.mrb[38].mxu0  ;;  %2944 = vmatprep.mubr.bf16.mxu1 %v2062_v8  ;;  %v3871_v13 = vpop.f32.mrb[70].mxu1 }
 0x1af   : > { %v1944_v20 = vmul.f32 0.3, %v1680_v16  ;;  %v1683_v14 = vadd.f32 %v1682_v12, %v3783_v26  ;;  %v1684_v19 = vpop.f32.mrb[39].mxu0  ;;  %v1523_v21 = vpop.f32.mrb[71].mxu1  ;;  %vm1880_vm2 = vcmp.ge.f32.partialorder %v1680_v16, 0.0 }
 0x1b1   : > { %vm1881_vm3 = vcmp.ge.f32.partialorder %v1683_v14, 0.0  ;;  %v1945_v23 = vmul.f32 0.3, %v1683_v14  ;;  %v2008_v24 = vsel %vm1880_vm2, %v1680_v16, %v1944_v20 }
 0x1b3   : > { %v2009_v30 = vsel %vm1881_vm3, %v1683_v14, %v1945_v23 }
 0x1b4   : > { %v1687_v31 = vpop.f32.mrb[40].mxu0  ;;  %v2063_v33 = vpack.c.bf16 %v2009_v30, %v2008_v24  ;;  %v3874_v35 = vpop.f32.mrb[72].mxu1 }
 0x1b5   : > { %v1688_v22 = vadd.f32 %v1687_v31, %v3785_v28  ;;  %v1689_v36 = vpop.f32.mrb[41].mxu0  ;;  %v1528_v37 = vpop.f32.mrb[73].mxu1 }
 0x1b6   : > { %v1690_v42 = vpop.f32.mrb[42].mxu0  ;;  %2945 = vmatmul.mubr.bf16.gmra.mrb[112].mxu1 %v2063_v33  ;;  %v3877_v45 = vpop.f32.mrb[74].mxu1 }
 0x1b7   : > { %v1946_v26 = vmul.f32 0.3, %v1688_v22  ;;  %v1691_v47 = vadd.f32 %v1690_v42, %v3789_v32  ;;  %v1692_v51 = vpop.f32.mrb[43].mxu0  ;;  %v1531_v53 = vpop.f32.mrb[75].mxu1  ;;  %vm1882_vm4 = vcmp.ge.f32.partialorder %v1688_v22, 0.0 }
 0x1b9   : > { %vm1883_vm5 = vcmp.ge.f32.partialorder %v1691_v47, 0.0  ;;  %v1947_v55 = vmul.f32 0.3, %v1691_v47  ;;  %v2010_v57 = vsel %vm1882_vm4, %v1688_v22, %v1946_v26 }
 0x1bb   : > { %v2011_v59 = vsel %vm1883_vm5, %v1691_v47, %v1947_v55 }
 0x1bc   : > { %v1695_v60 = vpop.f32.mrb[44].mxu0  ;;  %v2064_v1 = vpack.c.bf16 %v2011_v59, %v2010_v57  ;;  %v3880_v3 = vpop.f32.mrb[76].mxu1 }
 0x1bd   : > { %v1696_v28 = vadd.f32 %v1695_v60, %v3791_v34  ;;  %v1697_v4 = vpop.f32.mrb[45].mxu0  ;;  %v1536_v5 = vpop.f32.mrb[77].mxu1 }
 0x1be   : > { %v1698_v8 = vpop.f32.mrb[46].mxu0  ;;  %2948 = vmatprep.mubr.bf16.mxu1 %v2064_v1  ;;  %v3883_v16 = vpop.f32.mrb[78].mxu1 }
 0x1bf   : > { %v1948_v32 = vmul.f32 0.3, %v1696_v28  ;;  %v1699_v0 = vadd.f32 %v1698_v8, %v3795_v38  ;;  %v1700_v11 = vpop.f32.mrb[47].mxu0  ;;  %v1539_v12 = vpop.f32.mrb[79].mxu1  ;;  %vm1884_vm6 = vcmp.ge.f32.partialorder %v1696_v28, 0.0 }
 0x1c1   : > { %vm1885_vm7 = vcmp.ge.f32.partialorder %v1699_v0, 0.0  ;;  %v1949_v20 = vmul.f32 0.3, %v1699_v0  ;;  %v2012_v14 = vsel %vm1884_vm6, %v1696_v28, %v1948_v32 }
 0x1c3   : > { %v2013_v19 = vsel %vm1885_vm7, %v1699_v0, %v1949_v20 }
 0x1c4   : > { %v1703_v21 = vpop.f32.mrb[48].mxu0  ;;  %v2065_v23 = vpack.c.bf16 %v2013_v19, %v2012_v14  ;;  %v3886_v24 = vpop.f32.mrb[80].mxu1 }
 0x1c5   : > { %v1704_v34 = vadd.f32 %v1703_v21, %v3797_v40  ;;  %v1705_v30 = vpop.f32.mrb[49].mxu0  ;;  %v1544_v31 = vpop.f32.mrb[81].mxu1 }
 0x1c6   : > { %v1706_v33 = vpop.f32.mrb[50].mxu0  ;;  %2949 = vmatmul.mubr.bf16.gmra.mrb[116].mxu1 %v2065_v23  ;;  %v3889_v22 = vpop.f32.mrb[82].mxu1 }
 0x1c7   : > { %v1950_v38 = vmul.f32 0.3, %v1704_v34  ;;  %v1707_v36 = vadd.f32 %v1706_v33, %v3801_v44  ;;  %v1708_v37 = vpop.f32.mrb[51].mxu0  ;;  %v1547_v42 = vpop.f32.mrb[83].mxu1  ;;  %vm1886_vm8 = vcmp.ge.f32.partialorder %v1704_v34, 0.0 }
 0x1c9   : > { %vm1887_vm9 = vcmp.ge.f32.partialorder %v1707_v36, 0.0  ;;  %v1951_v26 = vmul.f32 0.3, %v1707_v36  ;;  %v2014_v47 = vsel %vm1886_vm8, %v1704_v34, %v1950_v38 }
 0x1cb   : > { %v2015_v51 = vsel %vm1887_vm9, %v1707_v36, %v1951_v26 }
 0x1cc   : > { %v1711_v53 = vpop.f32.mrb[52].mxu0  ;;  %v2066_v55 = vpack.c.bf16 %v2015_v51, %v2014_v47  ;;  %v3892_v57 = vpop.f32.mrb[84].mxu1 }
 0x1cd   : > { %v1712_v40 = vadd.f32 %v1711_v53, %v3803_v46  ;;  %v1713_v59 = vpop.f32.mrb[53].mxu0  ;;  %v1552_v60 = vpop.f32.mrb[85].mxu1 }
 0x1ce   : > { %v1714_v1 = vpop.f32.mrb[54].mxu0  ;;  %2952 = vmatprep.mubr.bf16.mxu1 %v2066_v55  ;;  %v3895_v28 = vpop.f32.mrb[86].mxu1 }
 0x1cf   : > { %v1952_v44 = vmul.f32 0.3, %v1712_v40  ;;  %v1715_v4 = vadd.f32 %v1714_v1, %v3807_v50  ;;  %v1716_v5 = vpop.f32.mrb[55].mxu0  ;;  %v1555_v8 = vpop.f32.mrb[87].mxu1  ;;  %vm1888_vm10 = vcmp.ge.f32.partialorder %v1712_v40, 0.0 }
 0x1d1   : > { %vm1889_vm11 = vcmp.ge.f32.partialorder %v1715_v4, 0.0  ;;  %v1953_v32 = vmul.f32 0.3, %v1715_v4  ;;  %v2016_v0 = vsel %vm1888_vm10, %v1712_v40, %v1952_v44 }
 0x1d3   : > { %v2017_v11 = vsel %vm1889_vm11, %v1715_v4, %v1953_v32 }
 0x1d4   : > { %v1719_v12 = vpop.f32.mrb[56].mxu0  ;;  %v2067_v20 = vpack.c.bf16 %v2017_v11, %v2016_v0  ;;  %v3898_v14 = vpop.f32.mrb[88].mxu1 }
 0x1d5   : > { %v1720_v46 = vadd.f32 %v1719_v12, %v3809_v52  ;;  %v1721_v19 = vpop.f32.mrb[57].mxu0  ;;  %v1560_v21 = vpop.f32.mrb[89].mxu1 }
 0x1d6   : > { %v1722_v23 = vpop.f32.mrb[58].mxu0  ;;  %2953 = vmatmul.mubr.bf16.gmra.mrb[120].mxu1 %v2067_v20  ;;  %v3901_v34 = vpop.f32.mrb[90].mxu1 }
 0x1d7   : > { %v1954_v50 = vmul.f32 0.3, %v1720_v46  ;;  %v1723_v30 = vadd.f32 %v1722_v23, %v3813_v56  ;;  %v1724_v31 = vpop.f32.mrb[59].mxu0  ;;  %v1563_v33 = vpop.f32.mrb[91].mxu1  ;;  %vm1890_vm12 = vcmp.ge.f32.partialorder %v1720_v46, 0.0 }
 0x1d9   : > { %vm1891_vm13 = vcmp.ge.f32.partialorder %v1723_v30, 0.0  ;;  %v1955_v38 = vmul.f32 0.3, %v1723_v30  ;;  %v2018_v36 = vsel %vm1890_vm12, %v1720_v46, %v1954_v50 }
 0x1db   : > { %v2019_v37 = vsel %vm1891_vm13, %v1723_v30, %v1955_v38 }
 0x1dc   : > { %v1727_v42 = vpop.f32.mrb[60].mxu0  ;;  %v2068_v26 = vpack.c.bf16 %v2019_v37, %v2018_v36  ;;  %v3904_v47 = vpop.f32.mrb[92].mxu1 }
 0x1dd   : > { %v1728_v52 = vadd.f32 %v1727_v42, %v3815_v58  ;;  %v1729_v51 = vpop.f32.mrb[61].mxu0  ;;  %v1568_v53 = vpop.f32.mrb[93].mxu1 }
 0x1de   : > { %v1730_v55 = vpop.f32.mrb[62].mxu0  ;;  %2956 = vmatprep.mubr.bf16.mxu1 %v2068_v26  ;;  %v3907_v40 = vpop.f32.mrb[94].mxu1 }
 0x1df   : > { %v1956_v56 = vmul.f32 0.3, %v1728_v52  ;;  %v1731_v59 = vadd.f32 %v1730_v55, %v3819_v62  ;;  %v1732_v60 = vpop.f32.mrb[63].mxu0  ;;  %v1571_v1 = vpop.f32.mrb[95].mxu1  ;;  %vm1892_vm14 = vcmp.ge.f32.partialorder %v1728_v52, 0.0 }
 0x1e1   : > { %vm1893_vm15 = vcmp.ge.f32.partialorder %v1731_v59, 0.0  ;;  %v1957_v44 = vmul.f32 0.3, %v1731_v59  ;;  %v2020_v4 = vsel %vm1892_vm14, %v1728_v52, %v1956_v56 }
 0x1e3   : > { %v2021_v5 = vsel %vm1893_vm15, %v1731_v59, %v1957_v44 }
 0x1e4   : > { %v1735_v8 = vpop.f32.mrb[64].mxu0  ;;  %v2069_v32 = vpack.c.bf16 %v2021_v5, %v2020_v4 }
 0x1e5   : > { %v1736_v58 = vadd.f32 %v1735_v8, %v3821_v2  ;;  %v1737_v0 = vpop.f32.mrb[65].mxu0 }
 0x1e6   : > { %v1738_v11 = vpop.f32.mrb[66].mxu0  ;;  %2957 = vmatmul.mubr.bf16.gmra.mrb[124].mxu1 %v2069_v32 }
 0x1e7   : > { %v1958_v12 = vmul.f32 0.3, %v1736_v58  ;;  %v1739_v20 = vadd.f32 %v1738_v11, %v3825_v9  ;;  %v1740_v46 = vpop.f32.mrb[67].mxu0  ;;  %vm1894_vm0 = vcmp.ge.f32.partialorder %v1736_v58, 0.0 }
 0x1e9   : > { %vm1895_vm1 = vcmp.ge.f32.partialorder %v1739_v20, 0.0  ;;  %v1959_v62 = vmul.f32 0.3, %v1739_v20  ;;  %v2022_v19 = vsel %vm1894_vm0, %v1736_v58, %v1958_v12 }
 0x1eb   : > { %v2023_v21 = vsel %vm1895_vm1, %v1739_v20, %v1959_v62 }
 0x1ec   : > { %v1743_v23 = vpop.f32.mrb[68].mxu0  ;;  %v2070_v50 = vpack.c.bf16 %v2023_v21, %v2022_v19 }
 0x1ed   : > { %v1744_v30 = vadd.f32 %v1743_v23, %v3827_v17  ;;  %v1745_v31 = vpop.f32.mrb[69].mxu0 }
 0x1ee   : > { %v1746_v33 = vpop.f32.mrb[70].mxu0  ;;  %2960 = vmatprep.mubr.bf16.mxu1 %v2070_v50 }
 0x1ef   : > { %v1960_v2 = vmul.f32 0.3, %v1744_v30  ;;  %v1747_v38 = vadd.f32 %v1746_v33, %v3831_v27  ;;  %v1748_v36 = vpop.f32.mrb[71].mxu0  ;;  %vm1896_vm2 = vcmp.ge.f32.partialorder %v1744_v30, 0.0 }
 0x1f1   : > { %vm1897_vm3 = vcmp.ge.f32.partialorder %v1747_v38, 0.0  ;;  %v1961_v9 = vmul.f32 0.3, %v1747_v38  ;;  %v2024_v37 = vsel %vm1896_vm2, %v1744_v30, %v1960_v2 }
 0x1f3   : > { %v2025_v42 = vsel %vm1897_vm3, %v1747_v38, %v1961_v9 }
 0x1f4   : > { %v1751_v26 = vpop.f32.mrb[72].mxu0  ;;  %v2071_v52 = vpack.c.bf16 %v2025_v42, %v2024_v37 }
 0x1f5   : > { %v1752_v51 = vadd.f32 %v1751_v26, %v3833_v39  ;;  %v1753_v53 = vpop.f32.mrb[73].mxu0 }
 0x1f6   : > { %v1754_v55 = vpop.f32.mrb[74].mxu0  ;;  %2961 = vmatmul.mubr.bf16.gmra.mrb[128].mxu1 %v2071_v52 }
 0x1f7   : > { %v1962_v17 = vmul.f32 0.3, %v1752_v51  ;;  %v1755_v56 = vadd.f32 %v1754_v55, %v3837_v49  ;;  %v1756_v59 = vpop.f32.mrb[75].mxu0  ;;  %vm1898_vm4 = vcmp.ge.f32.partialorder %v1752_v51, 0.0 }
 0x1f9   : > { %vm1899_vm5 = vcmp.ge.f32.partialorder %v1755_v56, 0.0  ;;  %v1963_v27 = vmul.f32 0.3, %v1755_v56  ;;  %v2026_v60 = vsel %vm1898_vm4, %v1752_v51, %v1962_v17 }
 0x1fb   : > { %v2027_v1 = vsel %vm1899_vm5, %v1755_v56, %v1963_v27 }
 0x1fc   : > { %v1759_v44 = vpop.f32.mrb[76].mxu0  ;;  %v2072_v4 = vpack.c.bf16 %v2027_v1, %v2026_v60 }
 0x1fd   : > { %v1760_v5 = vadd.f32 %v1759_v44, %v3839_v61  ;;  %v1761_v8 = vpop.f32.mrb[77].mxu0 }
 0x1fe   : > { %v1762_v32 = vpop.f32.mrb[78].mxu0  ;;  %2964 = vmatprep.mubr.bf16.mxu1 %v2072_v4 }
 0x1ff   : > { %v1964_v39 = vmul.f32 0.3, %v1760_v5  ;;  %v1763_v58 = vadd.f32 %v1762_v32, %v3843_v7  ;;  %v1764_v0 = vpop.f32.mrb[79].mxu0  ;;  %vm1900_vm6 = vcmp.ge.f32.partialorder %v1760_v5, 0.0 }
 0x201   : > { %vm1901_vm7 = vcmp.ge.f32.partialorder %v1763_v58, 0.0  ;;  %v1965_v49 = vmul.f32 0.3, %v1763_v58  ;;  %v2028_v11 = vsel %vm1900_vm6, %v1760_v5, %v1964_v39 }
 0x203   : > { %v2029_v12 = vsel %vm1901_vm7, %v1763_v58, %v1965_v49 }
 0x204   : > { %v1767_v20 = vpop.f32.mrb[80].mxu0  ;;  %v2073_v46 = vpack.c.bf16 %v2029_v12, %v2028_v11 }
 0x205   : > { %v1768_v62 = vadd.f32 %v1767_v20, %v3845_v15  ;;  %v1769_v19 = vpop.f32.mrb[81].mxu0 }
 0x206   : > { %v1770_v21 = vpop.f32.mrb[82].mxu0  ;;  %2965 = vmatmul.mubr.bf16.gmra.mrb[132].mxu1 %v2073_v46 }
 0x207   : > { %v1966_v61 = vmul.f32 0.3, %v1768_v62  ;;  %v1771_v23 = vadd.f32 %v1770_v21, %v3848_v25  ;;  %v1772_v50 = vpop.f32.mrb[83].mxu0  ;;  %vm1902_vm8 = vcmp.ge.f32.partialorder %v1768_v62, 0.0 }
 0x209   : > { %vm1903_vm9 = vcmp.ge.f32.partialorder %v1771_v23, 0.0  ;;  %v1967_v7 = vmul.f32 0.3, %v1771_v23  ;;  %v2030_v30 = vsel %vm1902_vm8, %v1768_v62, %v1966_v61 }
 0x20b   : > { %v2031_v31 = vsel %vm1903_vm9, %v1771_v23, %v1967_v7 }
 0x20c   : > { %v1775_v33 = vpop.f32.mrb[84].mxu0  ;;  %v2074_v2 = vpack.c.bf16 %v2031_v31, %v2030_v30 }
 0x20d   : > { %v1776_v38 = vadd.f32 %v1775_v33, %v3850_v41  ;;  %v1777_v36 = vpop.f32.mrb[85].mxu0 }
 0x20e   : > { %v1778_v9 = vpop.f32.mrb[86].mxu0  ;;  %2968 = vmatprep.mubr.bf16.mxu1 %v2074_v2 }
 0x20f   : > { %v1968_v15 = vmul.f32 0.3, %v1776_v38  ;;  %v1779_v37 = vadd.f32 %v1778_v9, %v3852_v48  ;;  %v1780_v42 = vpop.f32.mrb[87].mxu0  ;;  %vm1904_vm10 = vcmp.ge.f32.partialorder %v1776_v38, 0.0 }
 0x211   : > { %vm1905_vm11 = vcmp.ge.f32.partialorder %v1779_v37, 0.0  ;;  %v1969_v25 = vmul.f32 0.3, %v1779_v37  ;;  %v2032_v26 = vsel %vm1904_vm10, %v1776_v38, %v1968_v15 }
 0x213   : > { %v2033_v52 = vsel %vm1905_vm11, %v1779_v37, %v1969_v25 }
 0x214   : > { %v1783_v51 = vpop.f32.mrb[88].mxu0  ;;  %v2075_v53 = vpack.c.bf16 %v2033_v52, %v2032_v26 }
 0x215   : > { %v1784_v55 = vadd.f32 %v1783_v51, %v3854_v63  ;;  %v1785_v17 = vpop.f32.mrb[89].mxu0 }
 0x216   : > { %v1786_v56 = vpop.f32.mrb[90].mxu0  ;;  %2969 = vmatmul.mubr.bf16.gmra.mrb[136].mxu1 %v2075_v53 }
 0x217   : > { %v1970_v41 = vmul.f32 0.3, %v1784_v55  ;;  %v1787_v59 = vadd.f32 %v1786_v56, %v3856_v6  ;;  %v1788_v27 = vpop.f32.mrb[91].mxu0  ;;  %vm1906_vm12 = vcmp.ge.f32.partialorder %v1784_v55, 0.0 }
 0x219   : > { %vm1907_vm13 = vcmp.ge.f32.partialorder %v1787_v59, 0.0  ;;  %v1971_v48 = vmul.f32 0.3, %v1787_v59  ;;  %v2034_v60 = vsel %vm1906_vm12, %v1784_v55, %v1970_v41 }
 0x21b   : > { %v2035_v1 = vsel %vm1907_vm13, %v1787_v59, %v1971_v48 }
 0x21c   : > { %v1791_v44 = vpop.f32.mrb[92].mxu0  ;;  %v2076_v4 = vpack.c.bf16 %v2035_v1, %v2034_v60 }
 0x21d   : > { %v1792_v5 = vadd.f32 %v1791_v44, %v3858_v18  ;;  %v1793_v8 = vpop.f32.mrb[93].mxu0 }
 0x21e   : > { %v1794_v32 = vpop.f32.mrb[94].mxu0  ;;  %2972 = vmatprep.mubr.bf16.mxu1 %v2076_v4 }
 0x21f   : > { %v1972_v63 = vmul.f32 0.3, %v1792_v5  ;;  %v1795_v39 = vadd.f32 %v1794_v32, %v3860_v29  ;;  %v1796_v58 = vpop.f32.mrb[95].mxu0  ;;  %vm1908_vm14 = vcmp.ge.f32.partialorder %v1792_v5, 0.0 }
 0x221   : > { %vm1909_vm15 = vcmp.ge.f32.partialorder %v1795_v39, 0.0  ;;  %v1973_v6 = vmul.f32 0.3, %v1795_v39  ;;  %v2036_v0 = vsel %vm1908_vm14, %v1792_v5, %v1972_v63 }
 0x223   : > { %v2037_v49 = vsel %vm1909_vm15, %v1795_v39, %v1973_v6 }
 0x224   : > { %v1799_v11 = vpop.f32.mrb[96].mxu0  ;;  %v2077_v12 = vpack.c.bf16 %v2037_v49, %v2036_v0 }
 0x225   : > { %v1800_v20 = vadd.f32 %v1799_v11, %v3862_v43  ;;  %v1801_v46 = vpop.f32.mrb[97].mxu0 }
 0x226   : > { %v1802_v62 = vpop.f32.mrb[98].mxu0  ;;  %2973 = vmatmul.mubr.bf16.gmra.mrb[140].mxu1 %v2077_v12 }
 0x227   : > { %v1974_v18 = vmul.f32 0.3, %v1800_v20  ;;  %v1803_v19 = vadd.f32 %v1802_v62, %v3865_v54  ;;  %v1804_v21 = vpop.f32.mrb[99].mxu0  ;;  %vm1910_vm0 = vcmp.ge.f32.partialorder %v1800_v20, 0.0 }
 0x229   : > { %vm1911_vm1 = vcmp.ge.f32.partialorder %v1803_v19, 0.0  ;;  %v1975_v29 = vmul.f32 0.3, %v1803_v19  ;;  %v2038_v61 = vsel %vm1910_vm0, %v1800_v20, %v1974_v18 }
 0x22b   : > { %v2039_v23 = vsel %vm1911_vm1, %v1803_v19, %v1975_v29 }
 0x22c   : > { %v1807_v50 = vpop.f32.mrb[100].mxu0  ;;  %v2078_v7 = vpack.c.bf16 %v2039_v23, %v2038_v61 }
 0x22d   : > { %v1808_v30 = vadd.f32 %v1807_v50, %v3868_v10  ;;  %v1809_v31 = vpop.f32.mrb[101].mxu0 }
 0x22e   : > { %v1810_v33 = vpop.f32.mrb[102].mxu0  ;;  %2976 = vmatprep.mubr.bf16.mxu1 %v2078_v7 }
 0x22f   : > { %v1976_v43 = vmul.f32 0.3, %v1808_v30  ;;  %v1811_v2 = vadd.f32 %v1810_v33, %v3871_v13  ;;  %v1812_v38 = vpop.f32.mrb[103].mxu0  ;;  %vm1912_vm2 = vcmp.ge.f32.partialorder %v1808_v30, 0.0 }
 0x231   : > { %vm1913_vm3 = vcmp.ge.f32.partialorder %v1811_v2, 0.0  ;;  %v1977_v54 = vmul.f32 0.3, %v1811_v2  ;;  %v2040_v36 = vsel %vm1912_vm2, %v1808_v30, %v1976_v43 }
 0x233   : > { %v2041_v9 = vsel %vm1913_vm3, %v1811_v2, %v1977_v54 }
 0x234   : > { %v1815_v15 = vpop.f32.mrb[104].mxu0  ;;  %v2079_v37 = vpack.c.bf16 %v2041_v9, %v2040_v36 }
 0x235   : > { %v1816_v42 = vadd.f32 %v1815_v15, %v3874_v35  ;;  %v1817_v25 = vpop.f32.mrb[105].mxu0 }
 0x236   : > { %v1818_v26 = vpop.f32.mrb[106].mxu0  ;;  %2977 = vmatmul.mubr.bf16.gmra.mrb[144].mxu1 %v2079_v37 }
 0x237   : > { %v1978_v10 = vmul.f32 0.3, %v1816_v42  ;;  %v1819_v52 = vadd.f32 %v1818_v26, %v3877_v45  ;;  %v1820_v51 = vpop.f32.mrb[107].mxu0  ;;  %vm1914_vm4 = vcmp.ge.f32.partialorder %v1816_v42, 0.0 }
 0x239   : > { %vm1915_vm5 = vcmp.ge.f32.partialorder %v1819_v52, 0.0  ;;  %v1979_v13 = vmul.f32 0.3, %v1819_v52  ;;  %v2042_v53 = vsel %vm1914_vm4, %v1816_v42, %v1978_v10 }
 0x23b   : > { %v2043_v55 = vsel %vm1915_vm5, %v1819_v52, %v1979_v13 }
 0x23c   : > { %v1823_v17 = vpop.f32.mrb[108].mxu0  ;;  %v2080_v56 = vpack.c.bf16 %v2043_v55, %v2042_v53 }
 0x23d   : > { %v1824_v41 = vadd.f32 %v1823_v17, %v3880_v3  ;;  %v1825_v59 = vpop.f32.mrb[109].mxu0 }
 0x23e   : > { %v1826_v27 = vpop.f32.mrb[110].mxu0  ;;  %2980 = vmatprep.mubr.bf16.mxu1 %v2080_v56 }
 0x23f   : > { %v1980_v35 = vmul.f32 0.3, %v1824_v41  ;;  %v1827_v48 = vadd.f32 %v1826_v27, %v3883_v16  ;;  %v1828_v60 = vpop.f32.mrb[111].mxu0  ;;  %vm1916_vm6 = vcmp.ge.f32.partialorder %v1824_v41, 0.0 }
 0x241   : > { %vm1917_vm7 = vcmp.ge.f32.partialorder %v1827_v48, 0.0  ;;  %v1981_v45 = vmul.f32 0.3, %v1827_v48  ;;  %v2044_v1 = vsel %vm1916_vm6, %v1824_v41, %v1980_v35 }
 0x243   : > { %v2045_v44 = vsel %vm1917_vm7, %v1827_v48, %v1981_v45 }
 0x244   : > { %v1831_v4 = vpop.f32.mrb[112].mxu0  ;;  %v2081_v5 = vpack.c.bf16 %v2045_v44, %v2044_v1 }
 0x245   : > { %v1832_v8 = vadd.f32 %v1831_v4, %v3886_v24  ;;  %v1833_v32 = vpop.f32.mrb[113].mxu0 }
 0x246   : > { %v1834_v63 = vpop.f32.mrb[114].mxu0  ;;  %2981 = vmatmul.mubr.bf16.gmra.mrb[148].mxu1 %v2081_v5 }
 0x247   : > { %v1982_v3 = vmul.f32 0.3, %v1832_v8  ;;  %v1835_v39 = vadd.f32 %v1834_v63, %v3889_v22  ;;  %v1836_v58 = vpop.f32.mrb[115].mxu0  ;;  %v2930_v6 = vpop.f32.mrb[96].mxu1  ;;  %vm1918_vm8 = vcmp.ge.f32.partialorder %v1832_v8, 0.0 }
 0x248   : > { %3361 = vtanh.f32 %v2930_v6  ;;  %v2184_v16 = vpop.f32.mrb[97].mxu1 }
 0x249   : > { %vm1919_vm9 = vcmp.ge.f32.partialorder %v1835_v39, 0.0  ;;  %v1983_v0 = vmul.f32 0.3, %v1835_v39  ;;  %3363 = vtanh.f32 %v2184_v16  ;;  %v2931_v49 = vpop.f32.mrb[98].mxu1  ;;  %v2046_v24 = vsel %vm1918_vm8, %v1832_v8, %v1982_v3 }
 0x24a   : > { %3365 = vtanh.f32 %v2931_v49  ;;  %v2187_v11 = vpop.f32.mrb[99].mxu1 }
 0x24b   : > { %3367 = vtanh.f32 %v2187_v11  ;;  %v2047_v12 = vsel %vm1919_vm9, %v1835_v39, %v1983_v0 }
 0x24c   : > { %v1839_v20 = vpop.f32.mrb[116].mxu0  ;;  %v2082_v46 = vpack.c.bf16 %v2047_v12, %v2046_v24 }
 0x24d   : > { %v1840_v22 = vadd.f32 %v1839_v20, %v3892_v57  ;;  %v1841_v62 = vpop.f32.mrb[117].mxu0 }
 0x24e   : > { %v1842_v18 = vpop.f32.mrb[118].mxu0  ;;  %2984 = vmatprep.mubr.bf16.mxu1 %v2082_v46 }
 0x24f   : > { %v1984_v19 = vmul.f32 0.3, %v1840_v22  ;;  %v1843_v21 = vadd.f32 %v1842_v18, %v3895_v28  ;;  %v1844_v29 = vpop.f32.mrb[119].mxu0  ;;  %vm1920_vm10 = vcmp.ge.f32.partialorder %v1840_v22, 0.0 }
 0x251   : > { %vm1921_vm11 = vcmp.ge.f32.partialorder %v1843_v21, 0.0  ;;  %v1985_v61 = vmul.f32 0.3, %v1843_v21  ;;  %v2048_v50 = vsel %vm1920_vm10, %v1840_v22, %v1984_v19 }
 0x252   : > { %v3362_v57 = vpop.eup %3361 }
 0x253   : > { %v3364_v23 = vpop.eup %3363  ;;  %2505 = vst [vmem:[%s3942_s20 + $0x10] sm:$0xff] %v3362_v57  ;;  %v2049_v7 = vsel %vm1921_vm11, %v1843_v21, %v1985_v61 }
 0x254   : > { %v3366_v30 = vpop.eup %3365  ;;  %2503 = vst [vmem:[%s3942_s20] sm:$0xff] %v3364_v23  ;;  %v1847_v28 = vpop.f32.mrb[120].mxu0  ;;  %v2083_v31 = vpack.c.bf16 %v2049_v7, %v2048_v50 }
 0x255   : > { %v3368_v33 = vpop.eup %3367  ;;  %2506 = vst [vmem:[%s3942_s20 + $0x18] sm:$0xff] %v3366_v30  ;;  %v1848_v43 = vadd.f32 %v1847_v28, %v3898_v14  ;;  %v1849_v2 = vpop.f32.mrb[121].mxu0 }
 0x256   : > { %2504 = vst [vmem:[%s3942_s20 + $0x8] sm:$0xff] %v3368_v33  ;;  %v1850_v38 = vpop.f32.mrb[122].mxu0  ;;  %2985 = vmatmul.mubr.bf16.gmra.mrb[152].mxu1 %v2083_v31 }
 0x257   : > { %v1986_v54 = vmul.f32 0.3, %v1848_v43  ;;  %v1851_v36 = vadd.f32 %v1850_v38, %v3901_v34  ;;  %v1852_v9 = vpop.f32.mrb[123].mxu0  ;;  %v2934_v15 = vpop.f32.mrb[100].mxu1  ;;  %vm1922_vm12 = vcmp.ge.f32.partialorder %v1848_v43, 0.0 }
 0x258   : > { %3369 = vtanh.f32 %v2934_v15  ;;  %v2200_v37 = vpop.f32.mrb[101].mxu1 }
 0x259   : > { %vm1923_vm13 = vcmp.ge.f32.partialorder %v1851_v36, 0.0  ;;  %v1987_v42 = vmul.f32 0.3, %v1851_v36  ;;  %3371 = vtanh.f32 %v2200_v37  ;;  %v2935_v25 = vpop.f32.mrb[102].mxu1  ;;  %v2050_v14 = vsel %vm1922_vm12, %v1848_v43, %v1986_v54 }
 0x25a   : > { %3373 = vtanh.f32 %v2935_v25  ;;  %v2203_v26 = vpop.f32.mrb[103].mxu1 }
 0x25b   : > { %3375 = vtanh.f32 %v2203_v26  ;;  %v2051_v10 = vsel %vm1923_vm13, %v1851_v36, %v1987_v42 }
 0x25c   : > { %v1855_v52 = vpop.f32.mrb[124].mxu0  ;;  %v2084_v51 = vpack.c.bf16 %v2051_v10, %v2050_v14 }
 0x25d   : > { %v1856_v13 = vadd.f32 %v1855_v52, %v3904_v47  ;;  %v1857_v34 = vpop.f32.mrb[125].mxu0 }
 0x25e   : > { %v1858_v53 = vpop.f32.mrb[126].mxu0  ;;  %2988 = vmatprep.mubr.bf16.mxu1 %v2084_v51 }
 0x25f   : > { %v1988_v55 = vmul.f32 0.3, %v1856_v13  ;;  %v1859_v17 = vadd.f32 %v1858_v53, %v3907_v40  ;;  %v1860_v56 = vpop.f32.mrb[127].mxu0  ;;  %vm1924_vm14 = vcmp.ge.f32.partialorder %v1856_v13, 0.0 }
 0x261   : > { %vm1925_vm15 = vcmp.ge.f32.partialorder %v1859_v17, 0.0  ;;  %v1989_v41 = vmul.f32 0.3, %v1859_v17  ;;  %v2052_v35 = vsel %vm1924_vm14, %v1856_v13, %v1988_v55 }
 0x262   : > { %v3370_v59 = vpop.eup %3369 }
 0x263   : > { %v3372_v27 = vpop.eup %3371  ;;  %2509 = vst [vmem:[%s3942_s20 + $0x30] sm:$0xff] %v3370_v59  ;;  %v2053_v48 = vsel %vm1925_vm15, %v1859_v17, %v1989_v41 }
 0x264   : > { %v3374_v60 = vpop.eup %3373  ;;  %2507 = vst [vmem:[%s3942_s20 + $0x20] sm:$0xff] %v3372_v27  ;;  %v2085_v47 = vpack.c.bf16 %v2053_v48, %v2052_v35 }
 0x265   : > { %v3376_v45 = vpop.eup %3375  ;;  %2510 = vst [vmem:[%s3942_s20 + $0x38] sm:$0xff] %v3374_v60 }
 0x266   : > { %2508 = vst [vmem:[%s3942_s20 + $0x28] sm:$0xff] %v3376_v45  ;;  %2989 = vmatmul.mubr.bf16.gmra.mrb[156].mxu1 %v2085_v47 }
 0x267   : > { %v2938_v40 = vpop.f32.mrb[104].mxu1 }
 0x268   : > { %3377 = vtanh.f32 %v2938_v40  ;;  %v2216_v1 = vpop.f32.mrb[105].mxu1 }
 0x269   : > { %3379 = vtanh.f32 %v2216_v1  ;;  %v2939_v44 = vpop.f32.mrb[106].mxu1 }
 0x26a   : > { %3381 = vtanh.f32 %v2939_v44  ;;  %v2219_v4 = vpop.f32.mrb[107].mxu1 }
 0x26b   : > { %3383 = vtanh.f32 %v2219_v4 }
 0x272   : > { %v3378_v5 = vpop.eup %3377 }
 0x273   : > { %v3380_v8 = vpop.eup %3379  ;;  %2513 = vst [vmem:[%s3942_s20 + $0x50] sm:$0xff] %v3378_v5 }
 0x274   : > { %v3382_v32 = vpop.eup %3381  ;;  %2511 = vst [vmem:[%s3942_s20 + $0x40] sm:$0xff] %v3380_v8 }
 0x275   : > { %v3384_v63 = vpop.eup %3383  ;;  %2514 = vst [vmem:[%s3942_s20 + $0x58] sm:$0xff] %v3382_v32 }
 0x276   : > { %2512 = vst [vmem:[%s3942_s20 + $0x48] sm:$0xff] %v3384_v63 }
 0x277   : > { %v2942_v3 = vpop.f32.mrb[108].mxu1 }
 0x278   : > { %3385 = vtanh.f32 %v2942_v3  ;;  %v2232_v39 = vpop.f32.mrb[109].mxu1 }
 0x279   : > { %3387 = vtanh.f32 %v2232_v39  ;;  %v2943_v58 = vpop.f32.mrb[110].mxu1 }
 0x27a   : > { %3389 = vtanh.f32 %v2943_v58  ;;  %v2235_v6 = vpop.f32.mrb[111].mxu1 }
 0x27b   : > { %3391 = vtanh.f32 %v2235_v6 }
 0x282   : > { %v3386_v16 = vpop.eup %3385 }
 0x283   : > { %v3388_v0 = vpop.eup %3387  ;;  %2517 = vst [vmem:[%s3942_s20 + $0x70] sm:$0xff] %v3386_v16 }
 0x284   : > { %v3390_v49 = vpop.eup %3389  ;;  %2515 = vst [vmem:[%s3942_s20 + $0x60] sm:$0xff] %v3388_v0 }
 0x285   : > { %v3392_v11 = vpop.eup %3391  ;;  %2518 = vst [vmem:[%s3942_s20 + $0x78] sm:$0xff] %v3390_v49 }
 0x286   : > { %2516 = vst [vmem:[%s3942_s20 + $0x68] sm:$0xff] %v3392_v11 }
 0x289   : > { %v2946_v24 = vpop.f32.mrb[112].mxu1 }
 0x28a   : > { %3393 = vtanh.f32 %v2946_v24  ;;  %v2248_v12 = vpop.f32.mrb[113].mxu1 }
 0x28b   : > { %3395 = vtanh.f32 %v2248_v12  ;;  %v2947_v20 = vpop.f32.mrb[114].mxu1 }
 0x28c   : > { %3397 = vtanh.f32 %v2947_v20  ;;  %v2251_v46 = vpop.f32.mrb[115].mxu1 }
 0x28d   : > { %3399 = vtanh.f32 %v2251_v46 }
 0x294   : > { %v3394_v22 = vpop.eup %3393 }
 0x295   : > { %v3396_v62 = vpop.eup %3395  ;;  %2521 = vst [vmem:[%s3942_s20 + $0x90] sm:$0xff] %v3394_v22 }
 0x296   : > { %v3398_v18 = vpop.eup %3397  ;;  %2519 = vst [vmem:[%s3942_s20 + $0x80] sm:$0xff] %v3396_v62 }
 0x297   : > { %v3400_v19 = vpop.eup %3399  ;;  %2522 = vst [vmem:[%s3942_s20 + $0x98] sm:$0xff] %v3398_v18 }
 0x298   : > { %2520 = vst [vmem:[%s3942_s20 + $0x88] sm:$0xff] %v3400_v19 }
 0x299   : > { %v2950_v21 = vpop.f32.mrb[116].mxu1 }
 0x29a   : > { %3401 = vtanh.f32 %v2950_v21  ;;  %v2264_v29 = vpop.f32.mrb[117].mxu1 }
 0x29b   : > { %3403 = vtanh.f32 %v2264_v29  ;;  %v2951_v61 = vpop.f32.mrb[118].mxu1 }
 0x29c   : > { %3405 = vtanh.f32 %v2951_v61  ;;  %v2267_v57 = vpop.f32.mrb[119].mxu1 }
 0x29d   : > { %3407 = vtanh.f32 %v2267_v57 }
 0x2a4   : > { %v3402_v23 = vpop.eup %3401 }
 0x2a5   : > { %v3404_v50 = vpop.eup %3403  ;;  %2525 = vst [vmem:[%s3942_s20 + $0xb0] sm:$0xff] %v3402_v23 }
 0x2a6   : > { %v3406_v7 = vpop.eup %3405  ;;  %2523 = vst [vmem:[%s3942_s20 + $0xa0] sm:$0xff] %v3404_v50 }
 0x2a7   : > { %v3408_v30 = vpop.eup %3407  ;;  %2526 = vst [vmem:[%s3942_s20 + $0xb8] sm:$0xff] %v3406_v7 }
 0x2a8   : > { %2524 = vst [vmem:[%s3942_s20 + $0xa8] sm:$0xff] %v3408_v30 }
 0x2a9   : > { %v2954_v28 = vpop.f32.mrb[120].mxu1 }
 0x2aa   : > { %3409 = vtanh.f32 %v2954_v28  ;;  %v2280_v31 = vpop.f32.mrb[121].mxu1 }
 0x2ab   : > { %3411 = vtanh.f32 %v2280_v31  ;;  %v2955_v33 = vpop.f32.mrb[122].mxu1 }
 0x2ac   : > { %3413 = vtanh.f32 %v2955_v33  ;;  %v2283_v43 = vpop.f32.mrb[123].mxu1 }
 0x2ad   : > { %3415 = vtanh.f32 %v2283_v43 }
 0x2b4   : > { %v3410_v2 = vpop.eup %3409 }
 0x2b5   : > { %v3412_v38 = vpop.eup %3411  ;;  %2529 = vst [vmem:[%s3942_s20 + $0xd0] sm:$0xff] %v3410_v2 }
 0x2b6   : > { %v3414_v54 = vpop.eup %3413  ;;  %2527 = vst [vmem:[%s3942_s20 + $0xc0] sm:$0xff] %v3412_v38 }
 0x2b7   : > { %v3416_v36 = vpop.eup %3415  ;;  %2530 = vst [vmem:[%s3942_s20 + $0xd8] sm:$0xff] %v3414_v54 }
 0x2b8   : > { %2528 = vst [vmem:[%s3942_s20 + $0xc8] sm:$0xff] %v3416_v36 }
 0x2b9   : > { %v2958_v9 = vpop.f32.mrb[124].mxu1 }
 0x2ba   : > { %3417 = vtanh.f32 %v2958_v9  ;;  %v2296_v15 = vpop.f32.mrb[125].mxu1 }
 0x2bb   : > { %3419 = vtanh.f32 %v2296_v15  ;;  %v2959_v37 = vpop.f32.mrb[126].mxu1 }
 0x2bc   : > { %3421 = vtanh.f32 %v2959_v37  ;;  %v2299_v42 = vpop.f32.mrb[127].mxu1 }
 0x2bd   : > { %3423 = vtanh.f32 %v2299_v42 }
 0x2c4   : > { %v3418_v25 = vpop.eup %3417 }
 0x2c5   : > { %v3420_v26 = vpop.eup %3419  ;;  %2533 = vst [vmem:[%s3942_s20 + $0xf0] sm:$0xff] %v3418_v25 }
 0x2c6   : > { %v3422_v14 = vpop.eup %3421  ;;  %2531 = vst [vmem:[%s3942_s20 + $0xe0] sm:$0xff] %v3420_v26 }
 0x2c7   : > { %v3424_v10 = vpop.eup %3423  ;;  %2534 = vst [vmem:[%s3942_s20 + $0xf8] sm:$0xff] %v3422_v14 }
 0x2c8   : > { %2532 = vst [vmem:[%s3942_s20 + $0xe8] sm:$0xff] %v3424_v10 }
 0x2c9   : > { %v2962_v52 = vpop.f32.mrb[128].mxu1 }
 0x2ca   : > { %3425 = vtanh.f32 %v2962_v52  ;;  %v2312_v51 = vpop.f32.mrb[129].mxu1 }
 0x2cb   : > { %3427 = vtanh.f32 %v2312_v51  ;;  %v2963_v13 = vpop.f32.mrb[130].mxu1 }
 0x2cc   : > { %3429 = vtanh.f32 %v2963_v13  ;;  %v2315_v34 = vpop.f32.mrb[131].mxu1 }
 0x2cd   : > { %3431 = vtanh.f32 %v2315_v34 }
 0x2d4   : > { %v3426_v53 = vpop.eup %3425 }
 0x2d5   : > { %v3428_v55 = vpop.eup %3427  ;;  %2537 = vst [vmem:[%s3942_s20 + $0x110] sm:$0xff] %v3426_v53 }
 0x2d6   : > { %v3430_v17 = vpop.eup %3429  ;;  %2535 = vst [vmem:[%s3942_s20 + $0x100] sm:$0xff] %v3428_v55 }
 0x2d7   : > { %v3432_v56 = vpop.eup %3431  ;;  %2538 = vst [vmem:[%s3942_s20 + $0x118] sm:$0xff] %v3430_v17 }
 0x2d8   : > { %2536 = vst [vmem:[%s3942_s20 + $0x108] sm:$0xff] %v3432_v56 }
 0x2d9   : > { %v2966_v41 = vpop.f32.mrb[132].mxu1 }
 0x2da   : > { %3433 = vtanh.f32 %v2966_v41  ;;  %v2328_v59 = vpop.f32.mrb[133].mxu1 }
 0x2db   : > { %3435 = vtanh.f32 %v2328_v59  ;;  %v2967_v27 = vpop.f32.mrb[134].mxu1 }
 0x2dc   : > { %3437 = vtanh.f32 %v2967_v27  ;;  %v2331_v35 = vpop.f32.mrb[135].mxu1 }
 0x2dd   : > { %3439 = vtanh.f32 %v2331_v35 }
 0x2e4   : > { %v3434_v48 = vpop.eup %3433 }
 0x2e5   : > { %v3436_v60 = vpop.eup %3435  ;;  %2541 = vst [vmem:[%s3942_s20 + $0x130] sm:$0xff] %v3434_v48 }
 0x2e6   : > { %v3438_v47 = vpop.eup %3437  ;;  %2539 = vst [vmem:[%s3942_s20 + $0x120] sm:$0xff] %v3436_v60 }
 0x2e7   : > { %v3440_v45 = vpop.eup %3439  ;;  %2542 = vst [vmem:[%s3942_s20 + $0x138] sm:$0xff] %v3438_v47 }
 0x2e8   : > { %2540 = vst [vmem:[%s3942_s20 + $0x128] sm:$0xff] %v3440_v45 }
 0x2e9   : > { %v2970_v40 = vpop.f32.mrb[136].mxu1 }
 0x2ea   : > { %3441 = vtanh.f32 %v2970_v40  ;;  %v2344_v1 = vpop.f32.mrb[137].mxu1 }
 0x2eb   : > { %3443 = vtanh.f32 %v2344_v1  ;;  %v2971_v44 = vpop.f32.mrb[138].mxu1 }
 0x2ec   : > { %3445 = vtanh.f32 %v2971_v44  ;;  %v2347_v4 = vpop.f32.mrb[139].mxu1 }
 0x2ed   : > { %3447 = vtanh.f32 %v2347_v4 }
 0x2f4   : > { %v3442_v5 = vpop.eup %3441 }
 0x2f5   : > { %v3444_v8 = vpop.eup %3443  ;;  %2545 = vst [vmem:[%s3942_s20 + $0x150] sm:$0xff] %v3442_v5 }
 0x2f6   : > { %v3446_v32 = vpop.eup %3445  ;;  %2543 = vst [vmem:[%s3942_s20 + $0x140] sm:$0xff] %v3444_v8 }
 0x2f7   : > { %v3448_v63 = vpop.eup %3447  ;;  %2546 = vst [vmem:[%s3942_s20 + $0x158] sm:$0xff] %v3446_v32 }
 0x2f8   : > { %2544 = vst [vmem:[%s3942_s20 + $0x148] sm:$0xff] %v3448_v63 }
 0x2f9   : > { %v2974_v3 = vpop.f32.mrb[140].mxu1 }
 0x2fa   : > { %3449 = vtanh.f32 %v2974_v3  ;;  %v2360_v39 = vpop.f32.mrb[141].mxu1 }
 0x2fb   : > { %3451 = vtanh.f32 %v2360_v39  ;;  %v2975_v58 = vpop.f32.mrb[142].mxu1 }
 0x2fc   : > { %3453 = vtanh.f32 %v2975_v58  ;;  %v2363_v6 = vpop.f32.mrb[143].mxu1 }
 0x2fd   : > { %3455 = vtanh.f32 %v2363_v6 }
 0x304   : > { %v3450_v16 = vpop.eup %3449 }
 0x305   : > { %v3452_v0 = vpop.eup %3451  ;;  %2549 = vst [vmem:[%s3942_s20 + $0x170] sm:$0xff] %v3450_v16 }
 0x306   : > { %v3454_v49 = vpop.eup %3453  ;;  %2547 = vst [vmem:[%s3942_s20 + $0x160] sm:$0xff] %v3452_v0 }
 0x307   : > { %v3456_v11 = vpop.eup %3455  ;;  %2550 = vst [vmem:[%s3942_s20 + $0x178] sm:$0xff] %v3454_v49 }
 0x308   : > { %2548 = vst [vmem:[%s3942_s20 + $0x168] sm:$0xff] %v3456_v11 }
 0x309   : > { %v2978_v24 = vpop.f32.mrb[144].mxu1 }
 0x30a   : > { %3457 = vtanh.f32 %v2978_v24  ;;  %v2376_v12 = vpop.f32.mrb[145].mxu1 }
 0x30b   : > { %3459 = vtanh.f32 %v2376_v12  ;;  %v2979_v20 = vpop.f32.mrb[146].mxu1 }
 0x30c   : > { %3461 = vtanh.f32 %v2979_v20  ;;  %v2379_v46 = vpop.f32.mrb[147].mxu1 }
 0x30d   : > { %3463 = vtanh.f32 %v2379_v46 }
 0x314   : > { %v3458_v22 = vpop.eup %3457 }
 0x315   : > { %v3460_v62 = vpop.eup %3459  ;;  %2553 = vst [vmem:[%s3942_s20 + $0x190] sm:$0xff] %v3458_v22 }
 0x316   : > { %v3462_v18 = vpop.eup %3461  ;;  %2551 = vst [vmem:[%s3942_s20 + $0x180] sm:$0xff] %v3460_v62 }
 0x317   : > { %v3464_v19 = vpop.eup %3463  ;;  %2554 = vst [vmem:[%s3942_s20 + $0x198] sm:$0xff] %v3462_v18 }
 0x318   : > { %2552 = vst [vmem:[%s3942_s20 + $0x188] sm:$0xff] %v3464_v19 }
 0x319   : > { %v2982_v21 = vpop.f32.mrb[148].mxu1 }
 0x31a   : > { %3465 = vtanh.f32 %v2982_v21  ;;  %v2392_v29 = vpop.f32.mrb[149].mxu1 }
 0x31b   : > { %3467 = vtanh.f32 %v2392_v29  ;;  %v2983_v61 = vpop.f32.mrb[150].mxu1 }
 0x31c   : > { %3469 = vtanh.f32 %v2983_v61  ;;  %v2395_v57 = vpop.f32.mrb[151].mxu1 }
 0x31d   : > { %3471 = vtanh.f32 %v2395_v57 }
 0x324   : > { %v3466_v23 = vpop.eup %3465 }
 0x325   : > { %v3468_v50 = vpop.eup %3467  ;;  %2557 = vst [vmem:[%s3942_s20 + $0x1b0] sm:$0xff] %v3466_v23 }
 0x326   : > { %v3470_v7 = vpop.eup %3469  ;;  %2555 = vst [vmem:[%s3942_s20 + $0x1a0] sm:$0xff] %v3468_v50 }
 0x327   : > { %v3472_v30 = vpop.eup %3471  ;;  %2558 = vst [vmem:[%s3942_s20 + $0x1b8] sm:$0xff] %v3470_v7 }
 0x328   : > { %2556 = vst [vmem:[%s3942_s20 + $0x1a8] sm:$0xff] %v3472_v30 }
 0x329   : > { %v2986_v28 = vpop.f32.mrb[152].mxu1 }
 0x32a   : > { %3473 = vtanh.f32 %v2986_v28  ;;  %v2408_v31 = vpop.f32.mrb[153].mxu1 }
 0x32b   : > { %3475 = vtanh.f32 %v2408_v31  ;;  %v2987_v33 = vpop.f32.mrb[154].mxu1 }
 0x32c   : > { %3477 = vtanh.f32 %v2987_v33  ;;  %v2411_v43 = vpop.f32.mrb[155].mxu1 }
 0x32d   : > { %3479 = vtanh.f32 %v2411_v43 }
 0x334   : > { %v3474_v2 = vpop.eup %3473 }
 0x335   : > { %v3476_v38 = vpop.eup %3475  ;;  %2561 = vst [vmem:[%s3942_s20 + $0x1d0] sm:$0xff] %v3474_v2 }
 0x336   : > { %v3478_v54 = vpop.eup %3477  ;;  %2559 = vst [vmem:[%s3942_s20 + $0x1c0] sm:$0xff] %v3476_v38 }
 0x337   : > { %v3480_v36 = vpop.eup %3479  ;;  %2562 = vst [vmem:[%s3942_s20 + $0x1d8] sm:$0xff] %v3478_v54 }
 0x338   : > { %2560 = vst [vmem:[%s3942_s20 + $0x1c8] sm:$0xff] %v3480_v36 }
 0x339   : > { %v2990_v9 = vpop.f32.mrb[156].mxu1 }
 0x33a   : > { %3481 = vtanh.f32 %v2990_v9  ;;  %v2424_v15 = vpop.f32.mrb[157].mxu1 }
 0x33b   : > { %3483 = vtanh.f32 %v2424_v15  ;;  %v2991_v37 = vpop.f32.mrb[158].mxu1 }
 0x33c   : > { %3485 = vtanh.f32 %v2991_v37  ;;  %v2427_v42 = vpop.f32.mrb[159].mxu1 }
 0x33d   : > { %3487 = vtanh.f32 %v2427_v42 }
 0x344   : > { %v3482_v25 = vpop.eup %3481 }
 0x345   : > { %v3484_v26 = vpop.eup %3483  ;;  %2565 = vst [vmem:[%s3942_s20 + $0x1f0] sm:$0xff] %v3482_v25 }
 0x346   : > { %v3486_v14 = vpop.eup %3485  ;;  %2563 = vst [vmem:[%s3942_s20 + $0x1e0] sm:$0xff] %v3484_v26 }
 0x347   : > { %v3488_v10 = vpop.eup %3487  ;;  %2566 = vst [vmem:[%s3942_s20 + $0x1f8] sm:$0xff] %v3486_v14 }
 0x348   : > { %2564 = vst [vmem:[%s3942_s20 + $0x1e8] sm:$0xff] %v3488_v10 }
 0x349 PF: > { %s13_s14 = sadd.s32 1, %s3511_s14   ;;  %s4025_s12 = smov %s3507_s13 }
 0x34a   : > { %p10_p5 = scmp.ge.s32.totalorder %s13_s14, 6   ;;  %s4026_s13 = smov %s4028_s15 }
 0x34c   :  { %12 = sbr.rel (!%p10_p5) target bundleno = 2 (0x2), region = 65 }

</bundles_post_ra>
